<compile_context>
chip_gen: v6e
topology: v6e:2x2x1
jax: 0.10.0
libtpu: 0.0.40
codegen_flags: <defaults>
</compile_context>

<pallas_src>
import functools

import jax
import jax.numpy as jnp
from jax import lax
from jax.experimental import pallas as pl
from jax.experimental.pallas import tpu as pltpu

EPS = 1e-5
NEG_INF = -1e9  # finite large-negative mask (avoids -inf - -inf = NaN hazard)


def _layernorm(x, g, b):
    mu = jnp.mean(x, axis=-1, keepdims=True)
    var = jnp.mean(jnp.square(x - mu), axis=-1, keepdims=True)
    return (x - mu) * lax.rsqrt(var + EPS) * g + b


# ---------------------------------------------------------------------------
# Fused tower + epilogue kernel: grid = (batch_tiles, n_layers).
# The f32 activation block lives in VMEM scratch across the layer axis; only
# the projected EOT rows (TB, E) are written to HBM.
# ---------------------------------------------------------------------------
def tower_kernel(x_ref, onehot_ref, mask_ref,
                 ln1g_ref, ln1b_ref, wqkv_ref, bqkv_ref, wo_ref, bo_ref,
                 ln2g_ref, ln2b_ref, wfc_ref, bfc_ref, wpj_ref, bpj_ref,
                 lnfg_ref, lnfb_ref, proj_ref,
                 o_ref, act_ref, attn_ref, *, S, D, H, TB):
    hd = D // H
    scale = 1.0 / float(hd) ** 0.5
    l = pl.program_id(1)
    n_layers = pl.num_programs(1)

    # Layer 0: load this batch tile into the resident f32 activation scratch.
    @pl.when(l == 0)
    def _():
        act_ref[...] = x_ref[...].astype(jnp.float32)

    x = act_ref[...]                                           # (TB, S, D) f32

    # --- attention branch:  x = x + attn(ln_1(x)) ---
    xn = _layernorm(x, ln1g_ref[0], ln1b_ref[0])
    qkv = jnp.dot(xn.reshape(TB * S, D).astype(jnp.bfloat16), wqkv_ref[0],
                  preferred_element_type=jnp.float32) + bqkv_ref[0]  # (TB*S, 3D) f32
    q = qkv[:, 0:D] * scale
    k = qkv[:, D:2 * D]
    v = qkv[:, 2 * D:3 * D]

    mask = mask_ref[...]                                       # (S, S) additive causal
    for h in range(H):                                         # heads; batched over TB
        sl = slice(h * hd, (h + 1) * hd)
        qh = q[:, sl].reshape(TB, S, hd).astype(jnp.bfloat16)
        kh = k[:, sl].reshape(TB, S, hd).astype(jnp.bfloat16)
        vh = v[:, sl].reshape(TB, S, hd).astype(jnp.bfloat16)
        s = jnp.einsum('bqd,bkd->bqk', qh, kh,
                       preferred_element_type=jnp.float32) + mask
        s = s - jnp.max(s, axis=-1, keepdims=True)
        p = jnp.exp(s)
        p = p * pl.reciprocal(jnp.sum(p, axis=-1, keepdims=True), approx=True)
        ho = jnp.einsum('bqk,bkd->bqd', p.astype(jnp.bfloat16), vh,
                        preferred_element_type=jnp.float32)    # (TB, S, hd) f32
        # Store this head into its lane slice of the (TB*S, D) scratch.
        attn_ref[:, sl] = ho.reshape(TB * S, hd)

    # Single full-K output projection.
    attn = jnp.dot(attn_ref[...].astype(jnp.bfloat16), wo_ref[0],
                   preferred_element_type=jnp.float32) + bo_ref[0]
    x = x + attn.reshape(TB, S, D)

    # --- MLP branch:  x = x + mlp(ln_2(x)) ---
    xn2 = _layernorm(x, ln2g_ref[0], ln2b_ref[0])
    hmid = jnp.dot(xn2.reshape(TB * S, D).astype(jnp.bfloat16), wfc_ref[0],
                   preferred_element_type=jnp.float32) + bfc_ref[0]
    hmid = hmid * jax.nn.sigmoid(1.702 * hmid)                 # QuickGELU
    m = jnp.dot(hmid.astype(jnp.bfloat16), wpj_ref[0],
                preferred_element_type=jnp.float32) + bpj_ref[0]
    x = x + m.reshape(TB, S, D)

    act_ref[...] = x                                           # keep residual f32

    # --- fused epilogue: EOT gather + ln_final + text_projection ---
    @pl.when(l == n_layers - 1)
    def _():
        x_eot = jnp.sum(x * onehot_ref[...][..., None], axis=1)   # (TB, D)
        xe = _layernorm(x_eot, lnfg_ref[...], lnfb_ref[...])
        o_ref[...] = jnp.dot(xe, proj_ref[...],
                             preferred_element_type=jnp.float32).astype(o_ref.dtype)


def _vmem_budget_bytes():
    """~75% of physical per-core VMEM (48 MiB on v7x, 96 MiB on v5e/v6e)."""
    cap = 64 * 1024 * 1024
    try:
        info = pltpu.get_tpu_info()
        c = getattr(info, "vmem_capacity_bytes", None)
        if c:
            cap = int(c)
    except Exception:
        pass
    return min(int(cap * 0.75), 110 * 1024 * 1024)


def _estimate_vmem(TB, S, D, E):
    wbytes = 2 * (12 * D * D * 2 + 8 * D * 4)      # double-buffered bf16 weights + f32 biases
    scratch = 2 * TB * S * D * 4                   # activation + attention scratch (f32)
    xin = 2 * TB * S * D * 4                       # double-buffered input block
    tmp = TB * S * 7 * D * 4                       # qkv + hmid f32 temporaries
    misc = S * S * 4 + TB * S * 4 + D * E * 4 + (2 << 20)
    return wbytes + scratch + xin + tmp + misc


# ---------------------------------------------------------------------------
# Wrapper: pads S to a sublane multiple and B to a multiple of 8, casts the big
# weights to bf16, sizes TB / vmem_limit per chip, and runs the fused kernel.
# ---------------------------------------------------------------------------
def transformer_tower_and_head(x, eot_idx, w, lnf_g, lnf_b, proj, *, num_heads):
    B, S0, D = x.shape
    E = proj.shape[1]
    S = ((S0 + 7) // 8) * 8
    if S != S0:
        x = jnp.pad(x, ((0, 0), (0, S - S0), (0, 0)))
    B_pad = ((B + 7) // 8) * 8
    if B_pad != B:
        x = jnp.pad(x, ((0, B_pad - B), (0, 0), (0, 0)))
        eot_idx = jnp.pad(eot_idx, (0, B_pad - B))
    L = w["w_qkv"].shape[0]

    vmem_limit = _vmem_budget_bytes()
    TB = 8
    for cand in (32, 16, 8):
        if B_pad % cand == 0 and _estimate_vmem(cand, S, D, E) <= int(vmem_limit * 0.8):
            TB = cand
            break

    rows = jnp.arange(S, dtype=jnp.int32)
    mask = jnp.where(rows[None, :] <= rows[:, None], 0.0, NEG_INF).astype(jnp.float32)
    onehot = jax.nn.one_hot(eot_idx, S, dtype=jnp.float32)          # (B_pad, S)

    bf = jnp.bfloat16
    weights = (w["ln1_g"], w["ln1_b"],
               w["w_qkv"].astype(bf), w["b_qkv"],
               w["w_o"].astype(bf), w["b_o"],
               w["ln2_g"], w["ln2_b"],
               w["w_fc"].astype(bf), w["b_fc"],
               w["w_proj"].astype(bf), w["b_proj"])

    in_specs = [pl.BlockSpec((TB, S, D), lambda b, l: (b, 0, 0)),
                pl.BlockSpec((TB, S), lambda b, l: (b, 0)),
                pl.BlockSpec((S, S), lambda b, l: (0, 0))]
    for arr in weights:
        in_specs.append(
            pl.BlockSpec((1,) + arr.shape[1:],
                         lambda b, l, n=arr.ndim: (l,) + (0,) * (n - 1)))
    in_specs += [pl.BlockSpec(lnf_g.shape, lambda b, l: (0, 0)),
                 pl.BlockSpec(lnf_b.shape, lambda b, l: (0, 0)),
                 pl.BlockSpec(proj.shape, lambda b, l: (0, 0))]

    out = pl.pallas_call(
        functools.partial(tower_kernel, S=S, D=D, H=num_heads, TB=TB),
        out_shape=jax.ShapeDtypeStruct((B_pad, E), x.dtype),
        grid_spec=pltpu.PrefetchScalarGridSpec(
            num_scalar_prefetch=0,
            grid=(B_pad // TB, L),
            in_specs=in_specs,
            out_specs=pl.BlockSpec((TB, E), lambda b, l: (b, 0)),
            scratch_shapes=[pltpu.VMEM((TB, S, D), jnp.float32),   # resident activations
                            pltpu.VMEM((TB * S, D), jnp.float32)]),  # per-layer attn out
        compiler_params=pltpu.CompilerParams(
            dimension_semantics=("parallel", "arbitrary"),
            vmem_limit_bytes=vmem_limit),
    )(x, onehot, mask, *weights, lnf_g, lnf_b, proj)
    return out[:B]


# ---------------------------------------------------------------------------
# Parameter init (deterministic synthetic "clip_model" weights, layer-stacked).
# ---------------------------------------------------------------------------
def init_params(key, *, vocab, seq, d_model, n_layers, embed_dim):
    D, L = d_model, n_layers
    keys = jax.random.split(key, 4)
    wk = jax.random.split(keys[3], 4)
    return {
        "token_embedding": 0.02 * jax.random.normal(keys[0], (vocab, D), jnp.float32),
        "positional_embedding": 0.01 * jax.random.normal(keys[1], (seq, D), jnp.float32),
        "ln_final_g": jnp.ones((1, D), jnp.float32),
        "ln_final_b": jnp.zeros((1, D), jnp.float32),
        "text_projection": 0.02 * jax.random.normal(keys[2], (D, embed_dim), jnp.float32),
        "blocks": {
            "ln1_g": jnp.ones((L, 1, D), jnp.float32),
            "ln1_b": jnp.zeros((L, 1, D), jnp.float32),
            "w_qkv": 0.02 * jax.random.normal(wk[0], (L, D, 3 * D), jnp.float32),
            "b_qkv": jnp.zeros((L, 1, 3 * D), jnp.float32),
            "w_o": 0.02 * jax.random.normal(wk[1], (L, D, D), jnp.float32),
            "b_o": jnp.zeros((L, 1, D), jnp.float32),
            "ln2_g": jnp.ones((L, 1, D), jnp.float32),
            "ln2_b": jnp.zeros((L, 1, D), jnp.float32),
            "w_fc": 0.02 * jax.random.normal(wk[2], (L, D, 4 * D), jnp.float32),
            "b_fc": jnp.zeros((L, 1, 4 * D), jnp.float32),
            "w_proj": 0.02 * jax.random.normal(wk[3], (L, 4 * D, D), jnp.float32),
            "b_proj": jnp.zeros((L, 1, D), jnp.float32),
        },
    }


# ---------------------------------------------------------------------------
# TextEncoder.forward equivalent.
# ---------------------------------------------------------------------------
def text_encoder_forward(params, prompts, tokenized_prompts=None, *, num_heads):
    if tokenized_prompts is None:
        x = jnp.take(params["token_embedding"], prompts, axis=0)   # (B, S, D)
        eot_tokens = prompts
    else:
        x = prompts                                                # already embedded
        eot_tokens = tokenized_prompts
    x = x + params["positional_embedding"][None, :, :]

    # EOT index = argmax over token ids (CLIP tokenizer: EOT has the largest id).
    eot_idx = jnp.argmax(eot_tokens, axis=-1).astype(jnp.int32)

    # permute(1,0,2) -> transformer -> permute(1,0,2) -> ln_final -> gather ->
    # text_projection, all absorbed into one batch-major fused kernel.
    return transformer_tower_and_head(
        x, eot_idx, params["blocks"],
        params["ln_final_g"], params["ln_final_b"], params["text_projection"],
        num_heads=num_heads)


if __name__ == "__main__":
    B, S, D, H, L, VOCAB, E = 2, 8, 32, 4, 2, 64, 16

    key = jax.random.PRNGKey(0)
    k_param, k_tok = jax.random.split(key)
    params = init_params(k_param, vocab=VOCAB, seq=S, d_model=D,
                         n_layers=L, embed_dim=E)
    prompts = jax.random.randint(k_tok, (B, S), 0, VOCAB, dtype=jnp.int32)

    out = text_encoder_forward(params, prompts, num_heads=H)
    out = jax.block_until_ready(out)
    assert out.shape == (B, E)
    assert jnp.all(jnp.isfinite(out))
    print("KERNEL_OK")
</pallas_src>

<mosaic_0001>
module attributes {stable_mosaic.version = 11 : i64} {
  func.func @tower_kernel(%arg0: i32, %arg1: i32, %arg2: memref<8x8x32xf32, #tpu.memory_space<vmem>>, %arg3: memref<8x8xf32, #tpu.memory_space<vmem>>, %arg4: memref<8x8xf32, #tpu.memory_space<vmem>>, %arg5: memref<1x1x32xf32, #tpu.memory_space<vmem>>, %arg6: memref<1x1x32xf32, #tpu.memory_space<vmem>>, %arg7: memref<1x32x96xbf16, #tpu.memory_space<vmem>>, %arg8: memref<1x1x96xf32, #tpu.memory_space<vmem>>, %arg9: memref<1x32x32xbf16, #tpu.memory_space<vmem>>, %arg10: memref<1x1x32xf32, #tpu.memory_space<vmem>>, %arg11: memref<1x1x32xf32, #tpu.memory_space<vmem>>, %arg12: memref<1x1x32xf32, #tpu.memory_space<vmem>>, %arg13: memref<1x32x128xbf16, #tpu.memory_space<vmem>>, %arg14: memref<1x1x128xf32, #tpu.memory_space<vmem>>, %arg15: memref<1x128x32xbf16, #tpu.memory_space<vmem>>, %arg16: memref<1x1x32xf32, #tpu.memory_space<vmem>>, %arg17: memref<1x32xf32, #tpu.memory_space<vmem>>, %arg18: memref<1x32xf32, #tpu.memory_space<vmem>>, %arg19: memref<32x16xf32, #tpu.memory_space<vmem>>, %arg20: memref<8x16xf32, #tpu.memory_space<vmem>>, %arg21: memref<8x8x32xf32, #tpu.memory_space<vmem>>, %arg22: memref<64x32xf32, #tpu.memory_space<vmem>>) attributes {dimension_semantics = [#tpu.dimension_semantics<parallel>, #tpu.dimension_semantics<arbitrary>], iteration_bounds = array<i64: 1, 2>, scalar_prefetch = 0 : i64, scratch_operands = 2 : i64, tpu.core_type = #tpu.core_type<tc>, window_params = [{transform_indices = @transform_0, window_bounds = array<i64: 8, 8, 32>}, {transform_indices = @transform_1, window_bounds = array<i64: 8, 8>}, {pipeline_mode = #tpu.pipeline_mode<synchronous>, transform_indices = @transform_2, window_bounds = array<i64: 8, 8>}, {transform_indices = @transform_3, window_bounds = array<i64: 1, 1, 32>}, {transform_indices = @transform_4, window_bounds = array<i64: 1, 1, 32>}, {transform_indices = @transform_5, window_bounds = array<i64: 1, 32, 96>}, {transform_indices = @transform_6, window_bounds = array<i64: 1, 1, 96>}, {transform_indices = @transform_7, window_bounds = array<i64: 1, 32, 32>}, {transform_indices = @transform_8, window_bounds = array<i64: 1, 1, 32>}, {transform_indices = @transform_9, window_bounds = array<i64: 1, 1, 32>}, {transform_indices = @transform_10, window_bounds = array<i64: 1, 1, 32>}, {transform_indices = @transform_11, window_bounds = array<i64: 1, 32, 128>}, {transform_indices = @transform_12, window_bounds = array<i64: 1, 1, 128>}, {transform_indices = @transform_13, window_bounds = array<i64: 1, 128, 32>}, {transform_indices = @transform_14, window_bounds = array<i64: 1, 1, 32>}, {pipeline_mode = #tpu.pipeline_mode<synchronous>, transform_indices = @transform_15, window_bounds = array<i64: 1, 32>}, {pipeline_mode = #tpu.pipeline_mode<synchronous>, transform_indices = @transform_16, window_bounds = array<i64: 1, 32>}, {pipeline_mode = #tpu.pipeline_mode<synchronous>, transform_indices = @transform_17, window_bounds = array<i64: 32, 16>}, {transform_indices = @transform_18, window_bounds = array<i64: 8, 16>}]} {
    %c0_i32 = arith.constant 0 : i32
    %0 = arith.cmpi eq, %arg1, %c0_i32 : i32
    %1 = arith.extui %0 : i1 to i32
    %c0_i32_0 = arith.constant 0 : i32
    %2 = arith.cmpi ne, %1, %c0_i32_0 : i32
    scf.if %2 {
      %c0_84 = arith.constant 0 : index
      %c0_85 = arith.constant 0 : index
      %c0_86 = arith.constant 0 : index
      %225 = vector.load %arg2[%c0_84, %c0_85, %c0_86] : memref<8x8x32xf32, #tpu.memory_space<vmem>>, vector<8x8x32xf32>
      %c0_87 = arith.constant 0 : index
      %c0_88 = arith.constant 0 : index
      %c0_89 = arith.constant 0 : index
      %226 = vector.load %arg21[%c0_87, %c0_88, %c0_89] : memref<8x8x32xf32, #tpu.memory_space<vmem>>, vector<8x8x32xf32>
      tpu.vector_store %arg21[%c0_87, %c0_88, %c0_89], %225 {strides = array<i32>} : memref<8x8x32xf32, #tpu.memory_space<vmem>>, vector<8x8x32xf32>,
    } else {
    }
    %c0 = arith.constant 0 : index
    %c0_1 = arith.constant 0 : index
    %c0_2 = arith.constant 0 : index
    %3 = vector.load %arg21[%c0, %c0_1, %c0_2] : memref<8x8x32xf32, #tpu.memory_space<vmem>>, vector<8x8x32xf32>
    %c0_3 = arith.constant 0 : index
    %c0_4 = arith.constant 0 : index
    %c0_5 = arith.constant 0 : index
    %4 = vector.load %arg5[%c0_3, %c0_4, %c0_5] : memref<1x1x32xf32, #tpu.memory_space<vmem>>, vector<1x1x32xf32>
    %5 = vector.shape_cast %4 : vector<1x1x32xf32> to vector<1x32xf32>
    %c0_6 = arith.constant 0 : index
    %c0_7 = arith.constant 0 : index
    %c0_8 = arith.constant 0 : index
    %6 = vector.load %arg6[%c0_6, %c0_7, %c0_8] : memref<1x1x32xf32, #tpu.memory_space<vmem>>, vector<1x1x32xf32>
    %7 = vector.shape_cast %6 : vector<1x1x32xf32> to vector<1x32xf32>
    %cst = arith.constant dense<0.000000e+00> : vector<8x8xf32>
    %8 = vector.multi_reduction <add>, %3, %cst [2] : vector<8x8x32xf32> to vector<8x8xf32>
    %9 = vector.shape_cast %8 : vector<8x8xf32> to vector<8x8x1xf32>
    %cst_9 = arith.constant 3.200000e+01 : f32
    %10 = vector.broadcast %cst_9 : f32 to vector<8x8x1xf32>
    %11 = arith.divf %9, %10 : vector<8x8x1xf32>
    %12 = vector.broadcast %11 : vector<8x8x1xf32> to vector<8x8x32xf32>
    %13 = arith.subf %3, %12 : vector<8x8x32xf32>
    %14 = arith.mulf %13, %13 : vector<8x8x32xf32>
    %cst_10 = arith.constant dense<0.000000e+00> : vector<8x8xf32>
    %15 = vector.multi_reduction <add>, %14, %cst_10 [2] : vector<8x8x32xf32> to vector<8x8xf32>
    %16 = vector.shape_cast %15 : vector<8x8xf32> to vector<8x8x1xf32>
    %cst_11 = arith.constant 3.200000e+01 : f32
    %17 = vector.broadcast %cst_11 : f32 to vector<8x8x1xf32>
    %18 = arith.divf %16, %17 : vector<8x8x1xf32>
    %19 = vector.broadcast %11 : vector<8x8x1xf32> to vector<8x8x32xf32>
    %20 = arith.subf %3, %19 : vector<8x8x32xf32>
    %cst_12 = arith.constant 9.99999974E-6 : f32
    %21 = vector.broadcast %cst_12 : f32 to vector<8x8x1xf32>
    %22 = arith.addf %18, %21 : vector<8x8x1xf32>
    %23 = math.rsqrt %22 : vector<8x8x1xf32>
    %24 = vector.broadcast %23 : vector<8x8x1xf32> to vector<8x8x32xf32>
    %25 = arith.mulf %20, %24 : vector<8x8x32xf32>
    %26 = vector.shape_cast %5 : vector<1x32xf32> to vector<1x1x32xf32>
    %27 = vector.broadcast %26 : vector<1x1x32xf32> to vector<8x8x32xf32>
    %28 = arith.mulf %25, %27 : vector<8x8x32xf32>
    %29 = vector.shape_cast %7 : vector<1x32xf32> to vector<1x1x32xf32>
    %30 = vector.broadcast %29 : vector<1x1x32xf32> to vector<8x8x32xf32>
    %31 = arith.addf %28, %30 : vector<8x8x32xf32>
    %32 = vector.shape_cast %31 : vector<8x8x32xf32> to vector<64x32xf32>
    %33 = arith.truncf %32 : vector<64x32xf32> to vector<64x32xbf16>
    %c0_13 = arith.constant 0 : index
    %c0_14 = arith.constant 0 : index
    %c0_15 = arith.constant 0 : index
    %34 = vector.load %arg7[%c0_13, %c0_14, %c0_15] : memref<1x32x96xbf16, #tpu.memory_space<vmem>>, vector<1x32x96xbf16>
    %35 = vector.shape_cast %34 : vector<1x32x96xbf16> to vector<32x96xbf16>
    %cst_16 = arith.constant dense<0.000000e+00> : vector<64x96xf32>
    %36 = tpu.matmul %33, %35, %cst_16 {dimension_numbers = #tpu.dot_dimension_numbers<[1], [0], [0], [1], [0, 0, 1, 1], [], []>} : vector<64x32xbf16>, vector<32x96xbf16>, vector<64x96xf32> -> vector<64x96xf32>
    %c0_17 = arith.constant 0 : index
    %c0_18 = arith.constant 0 : index
    %c0_19 = arith.constant 0 : index
    %37 = vector.load %arg8[%c0_17, %c0_18, %c0_19] : memref<1x1x96xf32, #tpu.memory_space<vmem>>, vector<1x1x96xf32>
    %38 = vector.shape_cast %37 : vector<1x1x96xf32> to vector<1x96xf32>
    %39 = vector.broadcast %38 : vector<1x96xf32> to vector<64x96xf32>
    %40 = arith.addf %36, %39 : vector<64x96xf32>
    %41 = vector.extract_strided_slice %40 {offsets = [0, 0], sizes = [64, 32], strides = [1, 1]} : vector<64x96xf32> to vector<64x32xf32>
    %cst_20 = arith.constant 0.353553385 : f32
    %42 = vector.broadcast %cst_20 : f32 to vector<64x32xf32>
    %43 = arith.mulf %41, %42 : vector<64x32xf32>
    %44 = vector.extract_strided_slice %40 {offsets = [0, 32], sizes = [64, 32], strides = [1, 1]} : vector<64x96xf32> to vector<64x32xf32>
    %45 = vector.extract_strided_slice %40 {offsets = [0, 64], sizes = [64, 32], strides = [1, 1]} : vector<64x96xf32> to vector<64x32xf32>
    %c0_21 = arith.constant 0 : index
    %c0_22 = arith.constant 0 : index
    %46 = vector.load %arg4[%c0_21, %c0_22] : memref<8x8xf32, #tpu.memory_space<vmem>>, vector<8x8xf32>
    %47 = vector.extract_strided_slice %43 {offsets = [0, 0], sizes = [64, 8], strides = [1, 1]} : vector<64x32xf32> to vector<64x8xf32>
    %48 = vector.shape_cast %47 : vector<64x8xf32> to vector<8x8x8xf32>
    %49 = arith.truncf %48 : vector<8x8x8xf32> to vector<8x8x8xbf16>
    %50 = vector.extract_strided_slice %44 {offsets = [0, 0], sizes = [64, 8], strides = [1, 1]} : vector<64x32xf32> to vector<64x8xf32>
    %51 = vector.shape_cast %50 : vector<64x8xf32> to vector<8x8x8xf32>
    %52 = arith.truncf %51 : vector<8x8x8xf32> to vector<8x8x8xbf16>
    %53 = vector.extract_strided_slice %45 {offsets = [0, 0], sizes = [64, 8], strides = [1, 1]} : vector<64x32xf32> to vector<64x8xf32>
    %54 = vector.shape_cast %53 : vector<64x8xf32> to vector<8x8x8xf32>
    %55 = arith.truncf %54 : vector<8x8x8xf32> to vector<8x8x8xbf16>
    "tpu.trace_start"() <{level = 10 : i32, message = "bqd,bkd->bqk"}> : () -> ()
    %cst_23 = arith.constant dense<0.000000e+00> : vector<8x8x8xf32>
    %56 = tpu.matmul %49, %52, %cst_23 {dimension_numbers = #tpu.dot_dimension_numbers<[2], [2], [1], [1], [0, 0, 0, 1, 1, 1], [0], [0]>} : vector<8x8x8xbf16>, vector<8x8x8xbf16>, vector<8x8x8xf32> -> vector<8x8x8xf32>
    "tpu.trace_stop"() : () -> ()
    %57 = vector.shape_cast %46 : vector<8x8xf32> to vector<1x8x8xf32>
    %58 = vector.broadcast %57 : vector<1x8x8xf32> to vector<8x8x8xf32>
    %59 = arith.addf %56, %58 : vector<8x8x8xf32>
    %cst_24 = arith.constant dense<0xFF800000> : vector<8x8xf32>
    %60 = vector.multi_reduction <maximumf>, %59, %cst_24 [2] : vector<8x8x8xf32> to vector<8x8xf32>
    %61 = vector.shape_cast %60 : vector<8x8xf32> to vector<8x8x1xf32>
    %62 = vector.broadcast %61 : vector<8x8x1xf32> to vector<8x8x8xf32>
    %63 = arith.subf %59, %62 : vector<8x8x8xf32>
    %64 = math.exp %63 : vector<8x8x8xf32>
    %cst_25 = arith.constant dense<0.000000e+00> : vector<8x8xf32>
    %65 = vector.multi_reduction <add>, %64, %cst_25 [2] : vector<8x8x8xf32> to vector<8x8xf32>
    %66 = vector.shape_cast %65 : vector<8x8xf32> to vector<8x8x1xf32>
    %67 = tpu.reciprocal %66 {approx = true} : vector<8x8x1xf32> -> vector<8x8x1xf32>
    %68 = vector.broadcast %67 : vector<8x8x1xf32> to vector<8x8x8xf32>
    %69 = arith.mulf %64, %68 : vector<8x8x8xf32>
    %70 = arith.truncf %69 : vector<8x8x8xf32> to vector<8x8x8xbf16>
    "tpu.trace_start"() <{level = 10 : i32, message = "bqk,bkd->bqd"}> : () -> ()
    %cst_26 = arith.constant dense<0.000000e+00> : vector<8x8x8xf32>
    %71 = tpu.matmul %70, %55, %cst_26 {dimension_numbers = #tpu.dot_dimension_numbers<[2], [1], [1], [2], [0, 0, 0, 1, 1, 2], [0], [0]>} : vector<8x8x8xbf16>, vector<8x8x8xbf16>, vector<8x8x8xf32> -> vector<8x8x8xf32>
    "tpu.trace_stop"() : () -> ()
    %72 = vector.shape_cast %71 : vector<8x8x8xf32> to vector<64x8xf32>
    %c0_27 = arith.constant 0 : index
    %c0_28 = arith.constant 0 : index
    %73 = vector.load %arg22[%c0_27, %c0_28] : memref<64x32xf32, #tpu.memory_space<vmem>>, vector<64x8xf32>
    tpu.vector_store %arg22[%c0_27, %c0_28], %72 {strides = array<i32>} : memref<64x32xf32, #tpu.memory_space<vmem>>, vector<64x8xf32>,
    %74 = vector.extract_strided_slice %43 {offsets = [0, 8], sizes = [64, 8], strides = [1, 1]} : vector<64x32xf32> to vector<64x8xf32>
    %75 = vector.shape_cast %74 : vector<64x8xf32> to vector<8x8x8xf32>
    %76 = arith.truncf %75 : vector<8x8x8xf32> to vector<8x8x8xbf16>
    %77 = vector.extract_strided_slice %44 {offsets = [0, 8], sizes = [64, 8], strides = [1, 1]} : vector<64x32xf32> to vector<64x8xf32>
    %78 = vector.shape_cast %77 : vector<64x8xf32> to vector<8x8x8xf32>
    %79 = arith.truncf %78 : vector<8x8x8xf32> to vector<8x8x8xbf16>
    %80 = vector.extract_strided_slice %45 {offsets = [0, 8], sizes = [64, 8], strides = [1, 1]} : vector<64x32xf32> to vector<64x8xf32>
    %81 = vector.shape_cast %80 : vector<64x8xf32> to vector<8x8x8xf32>
    %82 = arith.truncf %81 : vector<8x8x8xf32> to vector<8x8x8xbf16>
    "tpu.trace_start"() <{level = 10 : i32, message = "bqd,bkd->bqk"}> : () -> ()
    %cst_29 = arith.constant dense<0.000000e+00> : vector<8x8x8xf32>
    %83 = tpu.matmul %76, %79, %cst_29 {dimension_numbers = #tpu.dot_dimension_numbers<[2], [2], [1], [1], [0, 0, 0, 1, 1, 1], [0], [0]>} : vector<8x8x8xbf16>, vector<8x8x8xbf16>, vector<8x8x8xf32> -> vector<8x8x8xf32>
    "tpu.trace_stop"() : () -> ()
    %84 = vector.shape_cast %46 : vector<8x8xf32> to vector<1x8x8xf32>
    %85 = vector.broadcast %84 : vector<1x8x8xf32> to vector<8x8x8xf32>
    %86 = arith.addf %83, %85 : vector<8x8x8xf32>
    %cst_30 = arith.constant dense<0xFF800000> : vector<8x8xf32>
    %87 = vector.multi_reduction <maximumf>, %86, %cst_30 [2] : vector<8x8x8xf32> to vector<8x8xf32>
    %88 = vector.shape_cast %87 : vector<8x8xf32> to vector<8x8x1xf32>
    %89 = vector.broadcast %88 : vector<8x8x1xf32> to vector<8x8x8xf32>
    %90 = arith.subf %86, %89 : vector<8x8x8xf32>
    %91 = math.exp %90 : vector<8x8x8xf32>
    %cst_31 = arith.constant dense<0.000000e+00> : vector<8x8xf32>
    %92 = vector.multi_reduction <add>, %91, %cst_31 [2] : vector<8x8x8xf32> to vector<8x8xf32>
    %93 = vector.shape_cast %92 : vector<8x8xf32> to vector<8x8x1xf32>
    %94 = tpu.reciprocal %93 {approx = true} : vector<8x8x1xf32> -> vector<8x8x1xf32>
    %95 = vector.broadcast %94 : vector<8x8x1xf32> to vector<8x8x8xf32>
    %96 = arith.mulf %91, %95 : vector<8x8x8xf32>
    %97 = arith.truncf %96 : vector<8x8x8xf32> to vector<8x8x8xbf16>
    "tpu.trace_start"() <{level = 10 : i32, message = "bqk,bkd->bqd"}> : () -> ()
    %cst_32 = arith.constant dense<0.000000e+00> : vector<8x8x8xf32>
    %98 = tpu.matmul %97, %82, %cst_32 {dimension_numbers = #tpu.dot_dimension_numbers<[2], [1], [1], [2], [0, 0, 0, 1, 1, 2], [0], [0]>} : vector<8x8x8xbf16>, vector<8x8x8xbf16>, vector<8x8x8xf32> -> vector<8x8x8xf32>
    "tpu.trace_stop"() : () -> ()
    %99 = vector.shape_cast %98 : vector<8x8x8xf32> to vector<64x8xf32>
    %c0_33 = arith.constant 0 : index
    %c8 = arith.constant 8 : index
    %100 = vector.load %arg22[%c0_33, %c8] : memref<64x32xf32, #tpu.memory_space<vmem>>, vector<64x8xf32>
    tpu.vector_store %arg22[%c0_33, %c8], %99 {strides = array<i32>} : memref<64x32xf32, #tpu.memory_space<vmem>>, vector<64x8xf32>,
    %101 = vector.extract_strided_slice %43 {offsets = [0, 16], sizes = [64, 8], strides = [1, 1]} : vector<64x32xf32> to vector<64x8xf32>
    %102 = vector.shape_cast %101 : vector<64x8xf32> to vector<8x8x8xf32>
    %103 = arith.truncf %102 : vector<8x8x8xf32> to vector<8x8x8xbf16>
    %104 = vector.extract_strided_slice %44 {offsets = [0, 16], sizes = [64, 8], strides = [1, 1]} : vector<64x32xf32> to vector<64x8xf32>
    %105 = vector.shape_cast %104 : vector<64x8xf32> to vector<8x8x8xf32>
    %106 = arith.truncf %105 : vector<8x8x8xf32> to vector<8x8x8xbf16>
    %107 = vector.extract_strided_slice %45 {offsets = [0, 16], sizes = [64, 8], strides = [1, 1]} : vector<64x32xf32> to vector<64x8xf32>
    %108 = vector.shape_cast %107 : vector<64x8xf32> to vector<8x8x8xf32>
    %109 = arith.truncf %108 : vector<8x8x8xf32> to vector<8x8x8xbf16>
    "tpu.trace_start"() <{level = 10 : i32, message = "bqd,bkd->bqk"}> : () -> ()
    %cst_34 = arith.constant dense<0.000000e+00> : vector<8x8x8xf32>
    %110 = tpu.matmul %103, %106, %cst_34 {dimension_numbers = #tpu.dot_dimension_numbers<[2], [2], [1], [1], [0, 0, 0, 1, 1, 1], [0], [0]>} : vector<8x8x8xbf16>, vector<8x8x8xbf16>, vector<8x8x8xf32> -> vector<8x8x8xf32>
    "tpu.trace_stop"() : () -> ()
    %111 = vector.shape_cast %46 : vector<8x8xf32> to vector<1x8x8xf32>
    %112 = vector.broadcast %111 : vector<1x8x8xf32> to vector<8x8x8xf32>
    %113 = arith.addf %110, %112 : vector<8x8x8xf32>
    %cst_35 = arith.constant dense<0xFF800000> : vector<8x8xf32>
    %114 = vector.multi_reduction <maximumf>, %113, %cst_35 [2] : vector<8x8x8xf32> to vector<8x8xf32>
    %115 = vector.shape_cast %114 : vector<8x8xf32> to vector<8x8x1xf32>
    %116 = vector.broadcast %115 : vector<8x8x1xf32> to vector<8x8x8xf32>
    %117 = arith.subf %113, %116 : vector<8x8x8xf32>
    %118 = math.exp %117 : vector<8x8x8xf32>
    %cst_36 = arith.constant dense<0.000000e+00> : vector<8x8xf32>
    %119 = vector.multi_reduction <add>, %118, %cst_36 [2] : vector<8x8x8xf32> to vector<8x8xf32>
    %120 = vector.shape_cast %119 : vector<8x8xf32> to vector<8x8x1xf32>
    %121 = tpu.reciprocal %120 {approx = true} : vector<8x8x1xf32> -> vector<8x8x1xf32>
    %122 = vector.broadcast %121 : vector<8x8x1xf32> to vector<8x8x8xf32>
    %123 = arith.mulf %118, %122 : vector<8x8x8xf32>
    %124 = arith.truncf %123 : vector<8x8x8xf32> to vector<8x8x8xbf16>
    "tpu.trace_start"() <{level = 10 : i32, message = "bqk,bkd->bqd"}> : () -> ()
    %cst_37 = arith.constant dense<0.000000e+00> : vector<8x8x8xf32>
    %125 = tpu.matmul %124, %109, %cst_37 {dimension_numbers = #tpu.dot_dimension_numbers<[2], [1], [1], [2], [0, 0, 0, 1, 1, 2], [0], [0]>} : vector<8x8x8xbf16>, vector<8x8x8xbf16>, vector<8x8x8xf32> -> vector<8x8x8xf32>
    "tpu.trace_stop"() : () -> ()
    %126 = vector.shape_cast %125 : vector<8x8x8xf32> to vector<64x8xf32>
    %c0_38 = arith.constant 0 : index
    %c16 = arith.constant 16 : index
    %127 = vector.load %arg22[%c0_38, %c16] : memref<64x32xf32, #tpu.memory_space<vmem>>, vector<64x8xf32>
    tpu.vector_store %arg22[%c0_38, %c16], %126 {strides = array<i32>} : memref<64x32xf32, #tpu.memory_space<vmem>>, vector<64x8xf32>,
    %128 = vector.extract_strided_slice %43 {offsets = [0, 24], sizes = [64, 8], strides = [1, 1]} : vector<64x32xf32> to vector<64x8xf32>
    %129 = vector.shape_cast %128 : vector<64x8xf32> to vector<8x8x8xf32>
    %130 = arith.truncf %129 : vector<8x8x8xf32> to vector<8x8x8xbf16>
    %131 = vector.extract_strided_slice %44 {offsets = [0, 24], sizes = [64, 8], strides = [1, 1]} : vector<64x32xf32> to vector<64x8xf32>
    %132 = vector.shape_cast %131 : vector<64x8xf32> to vector<8x8x8xf32>
    %133 = arith.truncf %132 : vector<8x8x8xf32> to vector<8x8x8xbf16>
    %134 = vector.extract_strided_slice %45 {offsets = [0, 24], sizes = [64, 8], strides = [1, 1]} : vector<64x32xf32> to vector<64x8xf32>
    %135 = vector.shape_cast %134 : vector<64x8xf32> to vector<8x8x8xf32>
    %136 = arith.truncf %135 : vector<8x8x8xf32> to vector<8x8x8xbf16>
    "tpu.trace_start"() <{level = 10 : i32, message = "bqd,bkd->bqk"}> : () -> ()
    %cst_39 = arith.constant dense<0.000000e+00> : vector<8x8x8xf32>
    %137 = tpu.matmul %130, %133, %cst_39 {dimension_numbers = #tpu.dot_dimension_numbers<[2], [2], [1], [1], [0, 0, 0, 1, 1, 1], [0], [0]>} : vector<8x8x8xbf16>, vector<8x8x8xbf16>, vector<8x8x8xf32> -> vector<8x8x8xf32>
    "tpu.trace_stop"() : () -> ()
    %138 = vector.shape_cast %46 : vector<8x8xf32> to vector<1x8x8xf32>
    %139 = vector.broadcast %138 : vector<1x8x8xf32> to vector<8x8x8xf32>
    %140 = arith.addf %137, %139 : vector<8x8x8xf32>
    %cst_40 = arith.constant dense<0xFF800000> : vector<8x8xf32>
    %141 = vector.multi_reduction <maximumf>, %140, %cst_40 [2] : vector<8x8x8xf32> to vector<8x8xf32>
    %142 = vector.shape_cast %141 : vector<8x8xf32> to vector<8x8x1xf32>
    %143 = vector.broadcast %142 : vector<8x8x1xf32> to vector<8x8x8xf32>
    %144 = arith.subf %140, %143 : vector<8x8x8xf32>
    %145 = math.exp %144 : vector<8x8x8xf32>
    %cst_41 = arith.constant dense<0.000000e+00> : vector<8x8xf32>
    %146 = vector.multi_reduction <add>, %145, %cst_41 [2] : vector<8x8x8xf32> to vector<8x8xf32>
    %147 = vector.shape_cast %146 : vector<8x8xf32> to vector<8x8x1xf32>
    %148 = tpu.reciprocal %147 {approx = true} : vector<8x8x1xf32> -> vector<8x8x1xf32>
    %149 = vector.broadcast %148 : vector<8x8x1xf32> to vector<8x8x8xf32>
    %150 = arith.mulf %145, %149 : vector<8x8x8xf32>
    %151 = arith.truncf %150 : vector<8x8x8xf32> to vector<8x8x8xbf16>
    "tpu.trace_start"() <{level = 10 : i32, message = "bqk,bkd->bqd"}> : () -> ()
    %cst_42 = arith.constant dense<0.000000e+00> : vector<8x8x8xf32>
    %152 = tpu.matmul %151, %136, %cst_42 {dimension_numbers = #tpu.dot_dimension_numbers<[2], [1], [1], [2], [0, 0, 0, 1, 1, 2], [0], [0]>} : vector<8x8x8xbf16>, vector<8x8x8xbf16>, vector<8x8x8xf32> -> vector<8x8x8xf32>
    "tpu.trace_stop"() : () -> ()
    %153 = vector.shape_cast %152 : vector<8x8x8xf32> to vector<64x8xf32>
    %c0_43 = arith.constant 0 : index
    %c24 = arith.constant 24 : index
    %154 = vector.load %arg22[%c0_43, %c24] : memref<64x32xf32, #tpu.memory_space<vmem>>, vector<64x8xf32>
    tpu.vector_store %arg22[%c0_43, %c24], %153 {strides = array<i32>} : memref<64x32xf32, #tpu.memory_space<vmem>>, vector<64x8xf32>,
    %c0_44 = arith.constant 0 : index
    %c0_45 = arith.constant 0 : index
    %155 = vector.load %arg22[%c0_44, %c0_45] : memref<64x32xf32, #tpu.memory_space<vmem>>, vector<64x32xf32>
    %156 = arith.truncf %155 : vector<64x32xf32> to vector<64x32xbf16>
    %c0_46 = arith.constant 0 : index
    %c0_47 = arith.constant 0 : index
    %c0_48 = arith.constant 0 : index
    %157 = vector.load %arg9[%c0_46, %c0_47, %c0_48] : memref<1x32x32xbf16, #tpu.memory_space<vmem>>, vector<1x32x32xbf16>
    %158 = vector.shape_cast %157 : vector<1x32x32xbf16> to vector<32x32xbf16>
    %cst_49 = arith.constant dense<0.000000e+00> : vector<64x32xf32>
    %159 = tpu.matmul %156, %158, %cst_49 {dimension_numbers = #tpu.dot_dimension_numbers<[1], [0], [0], [1], [0, 0, 1, 1], [], []>} : vector<64x32xbf16>, vector<32x32xbf16>, vector<64x32xf32> -> vector<64x32xf32>
    %c0_50 = arith.constant 0 : index
    %c0_51 = arith.constant 0 : index
    %c0_52 = arith.constant 0 : index
    %160 = vector.load %arg10[%c0_50, %c0_51, %c0_52] : memref<1x1x32xf32, #tpu.memory_space<vmem>>, vector<1x1x32xf32>
    %161 = vector.shape_cast %160 : vector<1x1x32xf32> to vector<1x32xf32>
    %162 = vector.broadcast %161 : vector<1x32xf32> to vector<64x32xf32>
    %163 = arith.addf %159, %162 : vector<64x32xf32>
    %164 = vector.shape_cast %163 : vector<64x32xf32> to vector<8x8x32xf32>
    %165 = arith.addf %3, %164 : vector<8x8x32xf32>
    %c0_53 = arith.constant 0 : index
    %c0_54 = arith.constant 0 : index
    %c0_55 = arith.constant 0 : index
    %166 = vector.load %arg11[%c0_53, %c0_54, %c0_55] : memref<1x1x32xf32, #tpu.memory_space<vmem>>, vector<1x1x32xf32>
    %167 = vector.shape_cast %166 : vector<1x1x32xf32> to vector<1x32xf32>
    %c0_56 = arith.constant 0 : index
    %c0_57 = arith.constant 0 : index
    %c0_58 = arith.constant 0 : index
    %168 = vector.load %arg12[%c0_56, %c0_57, %c0_58] : memref<1x1x32xf32, #tpu.memory_space<vmem>>, vector<1x1x32xf32>
    %169 = vector.shape_cast %168 : vector<1x1x32xf32> to vector<1x32xf32>
    %cst_59 = arith.constant dense<0.000000e+00> : vector<8x8xf32>
    %170 = vector.multi_reduction <add>, %165, %cst_59 [2] : vector<8x8x32xf32> to vector<8x8xf32>
    %171 = vector.shape_cast %170 : vector<8x8xf32> to vector<8x8x1xf32>
    %cst_60 = arith.constant 3.200000e+01 : f32
    %172 = vector.broadcast %cst_60 : f32 to vector<8x8x1xf32>
    %173 = arith.divf %171, %172 : vector<8x8x1xf32>
    %174 = vector.broadcast %173 : vector<8x8x1xf32> to vector<8x8x32xf32>
    %175 = arith.subf %165, %174 : vector<8x8x32xf32>
    %176 = arith.mulf %175, %175 : vector<8x8x32xf32>
    %cst_61 = arith.constant dense<0.000000e+00> : vector<8x8xf32>
    %177 = vector.multi_reduction <add>, %176, %cst_61 [2] : vector<8x8x32xf32> to vector<8x8xf32>
    %178 = vector.shape_cast %177 : vector<8x8xf32> to vector<8x8x1xf32>
    %cst_62 = arith.constant 3.200000e+01 : f32
    %179 = vector.broadcast %cst_62 : f32 to vector<8x8x1xf32>
    %180 = arith.divf %178, %179 : vector<8x8x1xf32>
    %181 = vector.broadcast %173 : vector<8x8x1xf32> to vector<8x8x32xf32>
    %182 = arith.subf %165, %181 : vector<8x8x32xf32>
    %cst_63 = arith.constant 9.99999974E-6 : f32
    %183 = vector.broadcast %cst_63 : f32 to vector<8x8x1xf32>
    %184 = arith.addf %180, %183 : vector<8x8x1xf32>
    %185 = math.rsqrt %184 : vector<8x8x1xf32>
    %186 = vector.broadcast %185 : vector<8x8x1xf32> to vector<8x8x32xf32>
    %187 = arith.mulf %182, %186 : vector<8x8x32xf32>
    %188 = vector.shape_cast %167 : vector<1x32xf32> to vector<1x1x32xf32>
    %189 = vector.broadcast %188 : vector<1x1x32xf32> to vector<8x8x32xf32>
    %190 = arith.mulf %187, %189 : vector<8x8x32xf32>
    %191 = vector.shape_cast %169 : vector<1x32xf32> to vector<1x1x32xf32>
    %192 = vector.broadcast %191 : vector<1x1x32xf32> to vector<8x8x32xf32>
    %193 = arith.addf %190, %192 : vector<8x8x32xf32>
    %194 = vector.shape_cast %193 : vector<8x8x32xf32> to vector<64x32xf32>
    %195 = arith.truncf %194 : vector<64x32xf32> to vector<64x32xbf16>
    %c0_64 = arith.constant 0 : index
    %c0_65 = arith.constant 0 : index
    %c0_66 = arith.constant 0 : index
    %196 = vector.load %arg13[%c0_64, %c0_65, %c0_66] : memref<1x32x128xbf16, #tpu.memory_space<vmem>>, vector<1x32x128xbf16>
    %197 = vector.shape_cast %196 : vector<1x32x128xbf16> to vector<32x128xbf16>
    %cst_67 = arith.constant dense<0.000000e+00> : vector<64x128xf32>
    %198 = tpu.matmul %195, %197, %cst_67 {dimension_numbers = #tpu.dot_dimension_numbers<[1], [0], [0], [1], [0, 0, 1, 1], [], []>} : vector<64x32xbf16>, vector<32x128xbf16>, vector<64x128xf32> -> vector<64x128xf32>
    %c0_68 = arith.constant 0 : index
    %c0_69 = arith.constant 0 : index
    %c0_70 = arith.constant 0 : index
    %199 = vector.load %arg14[%c0_68, %c0_69, %c0_70] : memref<1x1x128xf32, #tpu.memory_space<vmem>>, vector<1x1x128xf32>
    %200 = vector.shape_cast %199 : vector<1x1x128xf32> to vector<1x128xf32>
    %201 = vector.broadcast %200 : vector<1x128xf32> to vector<64x128xf32>
    %202 = arith.addf %198, %201 : vector<64x128xf32>
    %cst_71 = arith.constant 1.702000e+00 : f32
    %203 = vector.broadcast %cst_71 : f32 to vector<64x128xf32>
    %204 = arith.mulf %203, %202 : vector<64x128xf32>
    %205 = arith.negf %204 : vector<64x128xf32>
    %206 = math.exp %205 : vector<64x128xf32>
    %cst_72 = arith.constant 1.000000e+00 : f32
    %207 = vector.broadcast %cst_72 : f32 to vector<64x128xf32>
    %208 = arith.addf %207, %206 : vector<64x128xf32>
    %209 = arith.divf %207, %208 : vector<64x128xf32>
    %210 = arith.mulf %202, %209 : vector<64x128xf32>
    %211 = arith.truncf %210 : vector<64x128xf32> to vector<64x128xbf16>
    %c0_73 = arith.constant 0 : index
    %c0_74 = arith.constant 0 : index
    %c0_75 = arith.constant 0 : index
    %212 = vector.load %arg15[%c0_73, %c0_74, %c0_75] : memref<1x128x32xbf16, #tpu.memory_space<vmem>>, vector<1x128x32xbf16>
    %213 = vector.shape_cast %212 : vector<1x128x32xbf16> to vector<128x32xbf16>
    %cst_76 = arith.constant dense<0.000000e+00> : vector<64x32xf32>
    %214 = tpu.matmul %211, %213, %cst_76 {dimension_numbers = #tpu.dot_dimension_numbers<[1], [0], [0], [1], [0, 0, 1, 1], [], []>} : vector<64x128xbf16>, vector<128x32xbf16>, vector<64x32xf32> -> vector<64x32xf32>
    %c0_77 = arith.constant 0 : index
    %c0_78 = arith.constant 0 : index
    %c0_79 = arith.constant 0 : index
    %215 = vector.load %arg16[%c0_77, %c0_78, %c0_79] : memref<1x1x32xf32, #tpu.memory_space<vmem>>, vector<1x1x32xf32>
    %216 = vector.shape_cast %215 : vector<1x1x32xf32> to vector<1x32xf32>
    %217 = vector.broadcast %216 : vector<1x32xf32> to vector<64x32xf32>
    %218 = arith.addf %214, %217 : vector<64x32xf32>
    %219 = vector.shape_cast %218 : vector<64x32xf32> to vector<8x8x32xf32>
    %220 = arith.addf %165, %219 : vector<8x8x32xf32>
    %c0_80 = arith.constant 0 : index
    %c0_81 = arith.constant 0 : index
    %c0_82 = arith.constant 0 : index
    %221 = vector.load %arg21[%c0_80, %c0_81, %c0_82] : memref<8x8x32xf32, #tpu.memory_space<vmem>>, vector<8x8x32xf32>
    tpu.vector_store %arg21[%c0_80, %c0_81, %c0_82], %220 {strides = array<i32>} : memref<8x8x32xf32, #tpu.memory_space<vmem>>, vector<8x8x32xf32>,
    %c1_i32 = arith.constant 1 : i32
    %222 = arith.cmpi eq, %arg1, %c1_i32 : i32
    %223 = arith.extui %222 : i1 to i32
    %c0_i32_83 = arith.constant 0 : i32
    %224 = arith.cmpi ne, %223, %c0_i32_83 : i32
    scf.if %224 {
      %c0_84 = arith.constant 0 : index
      %c0_85 = arith.constant 0 : index
      %225 = vector.load %arg3[%c0_84, %c0_85] : memref<8x8xf32, #tpu.memory_space<vmem>>, vector<8x8xf32>
      %226 = vector.shape_cast %225 : vector<8x8xf32> to vector<8x8x1xf32>
      %227 = vector.broadcast %226 : vector<8x8x1xf32> to vector<8x8x32xf32>
      %228 = arith.mulf %220, %227 : vector<8x8x32xf32>
      %cst_86 = arith.constant dense<0.000000e+00> : vector<8x32xf32>
      %229 = vector.multi_reduction <add>, %228, %cst_86 [1] : vector<8x8x32xf32> to vector<8x32xf32>
      %c0_87 = arith.constant 0 : index
      %c0_88 = arith.constant 0 : index
      %230 = vector.load %arg17[%c0_87, %c0_88] : memref<1x32xf32, #tpu.memory_space<vmem>>, vector<1x32xf32>
      %c0_89 = arith.constant 0 : index
      %c0_90 = arith.constant 0 : index
      %231 = vector.load %arg18[%c0_89, %c0_90] : memref<1x32xf32, #tpu.memory_space<vmem>>, vector<1x32xf32>
      %cst_91 = arith.constant dense<0.000000e+00> : vector<8xf32>
      %232 = vector.multi_reduction <add>, %229, %cst_91 [1] : vector<8x32xf32> to vector<8xf32>
      %233 = vector.shape_cast %232 : vector<8xf32> to vector<8x1xf32>
      %cst_92 = arith.constant 3.200000e+01 : f32
      %234 = vector.broadcast %cst_92 : f32 to vector<8x1xf32>
      %235 = arith.divf %233, %234 : vector<8x1xf32>
      %236 = vector.broadcast %235 : vector<8x1xf32> to vector<8x32xf32>
      %237 = arith.subf %229, %236 : vector<8x32xf32>
      %238 = arith.mulf %237, %237 : vector<8x32xf32>
      %cst_93 = arith.constant dense<0.000000e+00> : vector<8xf32>
      %239 = vector.multi_reduction <add>, %238, %cst_93 [1] : vector<8x32xf32> to vector<8xf32>
      %240 = vector.shape_cast %239 : vector<8xf32> to vector<8x1xf32>
      %cst_94 = arith.constant 3.200000e+01 : f32
      %241 = vector.broadcast %cst_94 : f32 to vector<8x1xf32>
      %242 = arith.divf %240, %241 : vector<8x1xf32>
      %243 = vector.broadcast %235 : vector<8x1xf32> to vector<8x32xf32>
      %244 = arith.subf %229, %243 : vector<8x32xf32>
      %cst_95 = arith.constant 9.99999974E-6 : f32
      %245 = vector.broadcast %cst_95 : f32 to vector<8x1xf32>
      %246 = arith.addf %242, %245 : vector<8x1xf32>
      %247 = math.rsqrt %246 : vector<8x1xf32>
      %248 = vector.broadcast %247 : vector<8x1xf32> to vector<8x32xf32>
      %249 = arith.mulf %244, %248 : vector<8x32xf32>
      %250 = vector.broadcast %230 : vector<1x32xf32> to vector<8x32xf32>
      %251 = arith.mulf %249, %250 : vector<8x32xf32>
      %252 = vector.broadcast %231 : vector<1x32xf32> to vector<8x32xf32>
      %253 = arith.addf %251, %252 : vector<8x32xf32>
      %c0_96 = arith.constant 0 : index
      %c0_97 = arith.constant 0 : index
      %254 = vector.load %arg19[%c0_96, %c0_97] : memref<32x16xf32, #tpu.memory_space<vmem>>, vector<32x16xf32>
      %cst_98 = arith.constant dense<0.000000e+00> : vector<8x16xf32>
      %255 = tpu.matmul %253, %254, %cst_98 {dimension_numbers = #tpu.dot_dimension_numbers<[1], [0], [0], [1], [0, 0, 1, 1], [], []>} : vector<8x32xf32>, vector<32x16xf32>, vector<8x16xf32> -> vector<8x16xf32>
      %c0_99 = arith.constant 0 : index
      %c0_100 = arith.constant 0 : index
      %256 = vector.load %arg20[%c0_99, %c0_100] : memref<8x16xf32, #tpu.memory_space<vmem>>, vector<8x16xf32>
      tpu.vector_store %arg20[%c0_99, %c0_100], %255 {strides = array<i32>} : memref<8x16xf32, #tpu.memory_space<vmem>>, vector<8x16xf32>,
    } else {
    }
    return
  }
  func.func @transform_0(%arg0: i32, %arg1: i32) -> (i32, i32, i32) {
    %c0_i32 = arith.constant 0 : i32
    %c0_i32_0 = arith.constant 0 : i32
    %c0_i32_1 = arith.constant 0 : i32
    return %arg0, %c0_i32, %c0_i32_0 : i32, i32, i32
  }
  func.func @transform_1(%arg0: i32, %arg1: i32) -> (i32, i32) {
    %c0_i32 = arith.constant 0 : i32
    %c0_i32_0 = arith.constant 0 : i32
    return %arg0, %c0_i32 : i32, i32
  }
  func.func @transform_2(%arg0: i32, %arg1: i32) -> (i32, i32) {
    %c0_i32 = arith.constant 0 : i32
    %c0_i32_0 = arith.constant 0 : i32
    %c0_i32_1 = arith.constant 0 : i32
    return %c0_i32, %c0_i32_0 : i32, i32
  }
  func.func @transform_3(%arg0: i32, %arg1: i32) -> (i32, i32, i32) {
    %c0_i32 = arith.constant 0 : i32
    %c0_i32_0 = arith.constant 0 : i32
    %c0_i32_1 = arith.constant 0 : i32
    return %arg1, %c0_i32, %c0_i32_0 : i32, i32, i32
  }
  func.func @transform_4(%arg0: i32, %arg1: i32) -> (i32, i32, i32) {
    %c0_i32 = arith.constant 0 : i32
    %c0_i32_0 = arith.constant 0 : i32
    %c0_i32_1 = arith.constant 0 : i32
    return %arg1, %c0_i32, %c0_i32_0 : i32, i32, i32
  }
  func.func @transform_5(%arg0: i32, %arg1: i32) -> (i32, i32, i32) {
    %c0_i32 = arith.constant 0 : i32
    %c0_i32_0 = arith.constant 0 : i32
    %c0_i32_1 = arith.constant 0 : i32
    return %arg1, %c0_i32, %c0_i32_0 : i32, i32, i32
  }
  func.func @transform_6(%arg0: i32, %arg1: i32) -> (i32, i32, i32) {
    %c0_i32 = arith.constant 0 : i32
    %c0_i32_0 = arith.constant 0 : i32
    %c0_i32_1 = arith.constant 0 : i32
    return %arg1, %c0_i32, %c0_i32_0 : i32, i32, i32
  }
  func.func @transform_7(%arg0: i32, %arg1: i32) -> (i32, i32, i32) {
    %c0_i32 = arith.constant 0 : i32
    %c0_i32_0 = arith.constant 0 : i32
    %c0_i32_1 = arith.constant 0 : i32
    return %arg1, %c0_i32, %c0_i32_0 : i32, i32, i32
  }
  func.func @transform_8(%arg0: i32, %arg1: i32) -> (i32, i32, i32) {
    %c0_i32 = arith.constant 0 : i32
    %c0_i32_0 = arith.constant 0 : i32
    %c0_i32_1 = arith.constant 0 : i32
    return %arg1, %c0_i32, %c0_i32_0 : i32, i32, i32
  }
  func.func @transform_9(%arg0: i32, %arg1: i32) -> (i32, i32, i32) {
    %c0_i32 = arith.constant 0 : i32
    %c0_i32_0 = arith.constant 0 : i32
    %c0_i32_1 = arith.constant 0 : i32
    return %arg1, %c0_i32, %c0_i32_0 : i32, i32, i32
  }
  func.func @transform_10(%arg0: i32, %arg1: i32) -> (i32, i32, i32) {
    %c0_i32 = arith.constant 0 : i32
    %c0_i32_0 = arith.constant 0 : i32
    %c0_i32_1 = arith.constant 0 : i32
    return %arg1, %c0_i32, %c0_i32_0 : i32, i32, i32
  }
  func.func @transform_11(%arg0: i32, %arg1: i32) -> (i32, i32, i32) {
    %c0_i32 = arith.constant 0 : i32
    %c0_i32_0 = arith.constant 0 : i32
    %c0_i32_1 = arith.constant 0 : i32
    return %arg1, %c0_i32, %c0_i32_0 : i32, i32, i32
  }
  func.func @transform_12(%arg0: i32, %arg1: i32) -> (i32, i32, i32) {
    %c0_i32 = arith.constant 0 : i32
    %c0_i32_0 = arith.constant 0 : i32
    %c0_i32_1 = arith.constant 0 : i32
    return %arg1, %c0_i32, %c0_i32_0 : i32, i32, i32
  }
  func.func @transform_13(%arg0: i32, %arg1: i32) -> (i32, i32, i32) {
    %c0_i32 = arith.constant 0 : i32
    %c0_i32_0 = arith.constant 0 : i32
    %c0_i32_1 = arith.constant 0 : i32
    return %arg1, %c0_i32, %c0_i32_0 : i32, i32, i32
  }
  func.func @transform_14(%arg0: i32, %arg1: i32) -> (i32, i32, i32) {
    %c0_i32 = arith.constant 0 : i32
    %c0_i32_0 = arith.constant 0 : i32
    %c0_i32_1 = arith.constant 0 : i32
    return %arg1, %c0_i32, %c0_i32_0 : i32, i32, i32
  }
  func.func @transform_15(%arg0: i32, %arg1: i32) -> (i32, i32) {
    %c0_i32 = arith.constant 0 : i32
    %c0_i32_0 = arith.constant 0 : i32
    %c0_i32_1 = arith.constant 0 : i32
    return %c0_i32, %c0_i32_0 : i32, i32
  }
  func.func @transform_16(%arg0: i32, %arg1: i32) -> (i32, i32) {
    %c0_i32 = arith.constant 0 : i32
    %c0_i32_0 = arith.constant 0 : i32
    %c0_i32_1 = arith.constant 0 : i32
    return %c0_i32, %c0_i32_0 : i32, i32
  }
  func.func @transform_17(%arg0: i32, %arg1: i32) -> (i32, i32) {
    %c0_i32 = arith.constant 0 : i32
    %c0_i32_0 = arith.constant 0 : i32
    %c0_i32_1 = arith.constant 0 : i32
    return %c0_i32, %c0_i32_0 : i32, i32
  }
  func.func @transform_18(%arg0: i32, %arg1: i32) -> (i32, i32) {
    %c0_i32 = arith.constant 0 : i32
    %c0_i32_0 = arith.constant 0 : i32
    return %arg0, %c0_i32 : i32, i32
  }
}

</mosaic_0001>

<bundles_post_ra>
// kernel: tpu_custom_call.1
= control target key start
LH: loop header
LB: loop body
LE: loop exit
PB: predicated region body
PF: predicated region fallthrough
CT: control target
= control target key end

     0   :  { %s8692_s0 = inlined_call_operand.vmem [shape: f32[8,8,32], index: 0, kind: input, shape index: {}]   ;;  %s8693_s1 = inlined_call_operand.vmem [shape: f32[8,8], index: 1, kind: input, shape index: {}]   ;;  %s8694_s2 = inlined_call_operand.vmem [shape: f32[8,8], index: 2, kind: input, shape index: {}]   ;;  %s8695_s3 = inlined_call_operand.vmem [shape: f32[2,1,32], index: 3, kind: input, shape index: {}]   ;;  %s8696_s4 = inlined_call_operand.vmem [shape: f32[2,1,32], index: 4, kind: input, shape index: {}]   ;;  %s8697_s5 = inlined_call_operand.vmem [shape: bf16[2,32,96], index: 5, kind: input, shape index: {}]   ;;  %s8698_s6 = inlined_call_operand.vmem [shape: f32[2,1,96], index: 6, kind: input, shape index: {}]   ;;  %s8699_s7 = inlined_call_operand.vmem [shape: bf16[2,32,32], index: 7, kind: input, shape index: {}]   ;;  %s8700_s8 = inlined_call_operand.vmem [shape: f32[2,1,32], index: 8, kind: input, shape index: {}]   ;;  %s8701_s9 = inlined_call_operand.vmem [shape: f32[2,1,32], index: 9, kind: input, shape index: {}]   ;;  %s8702_s10 = inlined_call_operand.vmem [shape: f32[2,1,32], index: 10, kind: input, shape index: {}]   ;;  %s8703_s11 = inlined_call_operand.vmem [shape: bf16[2,32,128], index: 11, kind: input, shape index: {}]   ;;  %s8704_s12 = inlined_call_operand.vmem [shape: f32[2,1,128], index: 12, kind: input, shape index: {}]   ;;  %s8705_s13 = inlined_call_operand.vmem [shape: bf16[2,128,32], index: 13, kind: input, shape index: {}]   ;;  %s8706_s14 = inlined_call_operand.hbm [shape: f32[2,1,32], index: 14, kind: input, shape index: {}]   ;;  %s8707_s15 = inlined_call_operand.vmem [shape: f32[1,32], index: 15, kind: input, shape index: {}]   ;;  %s8708_s16 = inlined_call_operand.hbm [shape: f32[1,32], index: 16, kind: input, shape index: {}]   ;;  %s8709_s17 = inlined_call_operand.vmem [shape: f32[32,16], index: 17, kind: input, shape index: {}]   ;;  %s8710_s18 = inlined_call_operand.hbm [shape: f32[8,16], index: 18, kind: output, shape index: {}]  }
   0x1   :  { %8720 = sst [smem:[#allocation19_spill]] %s8692_s0 }
   0x2   :  { %8721 = sst [smem:[#allocation20_spill]] %s8693_s1 }
   0x3   :  { %8722 = sst [smem:[#allocation21_spill]] %s8694_s2 }
   0x4   :  { %8723 = sst [smem:[#allocation22_spill]] %s8697_s5 }
   0x5   :  { %8724 = sst [smem:[#allocation23_spill]] %s8699_s7 }
   0x6   :  { %8725 = sst [smem:[#allocation24_spill]] %s8704_s12 }
   0x7   :  { %8726 = sst [smem:[#allocation25_spill]] %s8705_s13 }
   0x8   :  { %8727 = sst [smem:[#allocation26_spill]] %s8706_s14 }
   0x9   :  { %8728 = sst [smem:[#allocation27_spill]] %s8707_s15 }
   0xa   :  { %8729 = sst [smem:[#allocation28_spill]] %s8708_s16 }
   0xb   :  { %8730 = sst [smem:[#allocation29_spill]] %s8709_s17 }
   0xc   :  { %8731 = sst [smem:[#allocation30_spill]] %s8710_s18 }
   0xd   :  { %23 = vsyncpa [#allocation5], 0 }
   0xe   :  { %25 = vsyncpa [#allocation5 + $0x1], 0 }
   0xf   :  { %26 = vsyncpa [#allocation8], 0 }
  0x10   :  { %27 = vsyncpa [#allocation6], 0  ;;  %s7250_s27 = smov 0   ;;  %s7252_s28 = smov 0  }
  0x11   :  { %s7254_s29 = smov 0   ;;  %s7256_s30 = smov 0  }
  0x12   :  { %s7258_s0 = smov 0   ;;  %s7260_s19 = smov 0  }
  0x13 LB: > { %8732 = sst [smem:[#allocation13_spill]] %s7116_s28  ;;  %s8713_s1 = sadd.s32 4294967295, %s7132_s19   ;;  %s7132_s19 = sphi %s7260_s19, %s33_s19   ;;  %s7128_s0 = sphi %s7258_s0, %s8768_s0   ;;  %s7124_s30 = sphi %s7256_s30, %s8767_s30   ;;  %s7120_s29 = sphi %s7254_s29, %s8766_s29   ;;  %s7116_s28 = sphi %s7252_s28, %s8765_s28   ;;  %s7112_s27 = sphi %s7250_s27, %s8764_s27  }
  0x14   : > { %8733 = sst [smem:[#allocation14_spill]] %s7120_s29  ;;  %p424_p0 = scmp.ne.s32.totalorder %s7116_s28, %s7112_s27 }
  0x15   : > { %8734 = sst [smem:[#allocation15_spill]] %s7128_s0  ;;  %p7282_p1 = scmp.eq.s32.totalorder %s8713_s1, 0 }
  0x16   : > { %8735 = sst [smem:[#allocation16_spill]] %s7132_s19  ;;  %p5935_p2 = scmp.ge.s32.totalorder %s7132_s19, 1 }
  0x17   : > { %p524_p3 = scmp.lt.s32.totalorder %s7132_s19, 3  ;;  %p7290_p4 = por %p7282_p1, %p424_p0 }
  0x18   : > { %s7134_s2 = smov [#allocation7]   ;;  %s42_s25 = sadd.s32 1, %s7128_s0 }
  0x19   : > { %p7294_p5 = pnand %p5935_p2, %p524_p3  ;;  %s559_s23 = sshll.u32 %s7134_s2, 4  ;;  %s560_s23 = int_to_ptr.vmem [resolvable:$true] %s559_s23 }
  0x1a   : > { %s411_s26 = sadd.s32 1, %s7120_s29  ;;  %p43_p8 = scmp.ge.s32.totalorder %s42_s25, 2 }
  0x1b   : > { %p6698_p6 = pneg %p7294_p5  ;;  %s7007_s27 = scalar_lea.vmem %s560_s23, 16 }
  0x1c   : > { %p7008_p10 = scmp.ne.s32.totalorder %s560_s23, %s7007_s27  ;;  %s7014_s1 = scalar_lea.vmem %s560_s23, 32 }
  0x1d   : > { %p7302_p7 = pnand %p6698_p6, %p7282_p1  ;;  %p7015_p13 = scmp.lt.s32.totalorder %s560_s23, %s560_s23 }
  0x1e   : > { %p7016_p0 = scmp.lt.s32.totalorder %s7014_s1, %s7007_s27 }
  0x1f   : > { %p6998_p9 = pneg %p7302_p7 }
  0x20   : > { %p7017_p2 = por %p7016_p0, %p7015_p13 }
  0x21   : > { %p7010_p11 = pnand %p7008_p10, %p6998_p9 }
  0x23   : > { %p7011_p12 = pneg %p7010_p11 }
  0x25   : > { %p7018_p3 = pnand %p7017_p2, %p7011_p12 }
  0x27   : > { %7021 = shalt.err (!%p7018_p3)
}
  0x28   : > { %s8740_s16 = sld [smem:[#allocation28_spill]]  ;;  %s8770_s25 = smov (%p43_p8, %s42_s25), 0 }
  0x29   : > { %8741 = sst [smem:[#allocation17_spill]] %s8770_s25  ;;  %p418_p6 = scmp.ne.s32.totalorder %s7120_s29, %s7116_s28 }
  0x2a   : > { %p419_p9 = scmp.eq.s32.totalorder %s7132_s19, 0  ;;  %s408_s1 = ssub.s32 %s7128_s0, %s8770_s25 }
  0x2b   : > { %p6707_p10 = scmp.lt.s32.totalorder %s7132_s19, 2  ;;  %p409_p11 = scmp.eq.s32.totalorder %s408_s1, 0 }
  0x2c   : > { %p420_p12 = por %p419_p9, %p418_p6  ;;  %s647_s24 = sand.u32 1, %s7120_s29  }
  0x2d   : > { %s5940_s18 = sshll.u32 %s7128_s0, 4  ;;  %s8743_s14 = sld [smem:[#allocation26_spill]] }
  0x2e   : > { %6701 = dma.hbm_to_vmem [thread:$0]  (!%p7302_p7), %s8740_s16, 16, %s560_s23, [#allocation8]  }
  0x2f   : > { %s7326_s27 = scalar_select %p409_p11, %s7120_s29, %s411_s26  }
  0x30   : > { %s650_s13 = scalar_lea.vmem [#allocation4], %s647_s24  ;;  %p7331_p7 = pnand %p6707_p10, %p420_p12 }
  0x31   : > { %8742 = sst [smem:[#allocation18_spill]] %s7326_s27  ;;  %s657_s12 = sshll.u32 %s650_s13, 4  ;;  %s658_s12 = int_to_ptr.vmem [resolvable:$true] %s657_s12 }
  0x32   : > { %s648_s16 = scalar_lea.sflag [#allocation5], %s647_s24  ;;  %p7024_p8 = pneg %p7331_p7 }
  0x33   : > { %s655_s17 = scalar_lea.hbm %s8743_s14, %s5940_s18  ;;  %s7035_s1 = scalar_lea.vmem %s658_s12, 16 }
  0x34   : > { %p7036_p13 = scmp.ne.s32.totalorder %s658_s12, %s7035_s1  ;;  %s7135_s26 = smov [#allocation4]  }
  0x35   : > { %s7040_s25 = sshll.u32 %s7135_s26, 4  ;;  %s7041_s25 = int_to_ptr.vmem [resolvable:$false] %s7040_s25 }
  0x36   : > { %p7038_p0 = pnand %p7036_p13, %p7024_p8  ;;  %s7042_s15 = scalar_lea.vmem %s7041_s25, 32 }
  0x37   : > { %p7043_p3 = scmp.lt.s32.totalorder %s658_s12, %s7041_s25  ;;  %p7044_p6 = scmp.lt.s32.totalorder %s7042_s15, %s7035_s1 }
  0x38   : > { %p7039_p2 = pneg %p7038_p0 }
  0x39   : > { %p7045_p9 = por %p7044_p6, %p7043_p3 }
  0x3b   : > { %p7046_p11 = pnand %p7045_p9, %p7039_p2 }
  0x3d   : > { %7049 = shalt.err (!%p7046_p11)
}
  0x3e   : > { %6705 = dma.hbm_to_vmem [thread:$0]  (!%p7331_p7), %s655_s17, 16, %s658_s12, %s648_s16  }
  0x3f   : > { %666 = sbr.rel (%p7294_p5) target bundleno = 5194 (0x144a), region = 92  ;;  %s668_s13 = sand.u32 (!%p7294_p5), 1, %s7116_s28  }
  0x40   : > { %s669_s24 = scalar_lea.sflag (!%p7294_p5), [#allocation5], %s668_s13  ;;  %s7342_s18 = scalar_lea.vmem (!%p7294_p5), [#allocation4], %s668_s13 }
  0x44   : > { %7099 = dma.done.wait (%p7290_p4), %s669_s24, 16  }
  0x45   : > { %7101 = vsyncadd (%p7290_p4), %s669_s24, 4294967280 }
  0x46   : > { %7103 = dma.done.wait (%p7282_p1), [#allocation8], 16  }
  0x47   : > { %7105 = vsyncadd (%p7282_p1), [#allocation8], 4294967280  ;;  %p782_p5 = scmp.lt.s32.totalorder %s7124_s30, 1  ;;  %s8745_s5 = sld [smem:[#allocation22_spill]] }
  0x48   : > { %s8746_s7 = sld [smem:[#allocation23_spill]]  ;;  %p5951_p1 = scmp.ne.s32.totalorder %s7124_s30, 0 }
  0x49   : > { %s7354_s12 = scalar_select %p782_p5, %s7124_s30, 1 }
  0x4a   : > { %s8748_s20 = sld [smem:[#allocation25_spill]] }
  0x4b   : > { %s6066_s2 = sshll.u32 %s7354_s12, 4  ;;  %s806_s27 = scalar_lea.vmem %s8701_s9, %s7354_s12 }
  0x4c   : > { %s809_s26 = scalar_lea.vmem %s8702_s10, %s7354_s12  ;;  %s6069_s28 = sshll.u32 %s7354_s12, 6 }
  0x4d   : > { %s7372_s24 = scalar_lea.vmem %s8745_s5, %s6066_s2  ;;  %s7394_s5 = scalar_lea.vmem %s8703_s11, %s6066_s2 }
  0x4e   : > { %s7377_s14 = scalar_lea.vmem %s8746_s7, %s6066_s2  ;;  %s8747_s7 = sld [smem:[#allocation24_spill]] }
  0x4f   : > { %s8749_s23 = sld [smem:[#allocation19_spill]] (!%p5951_p1) }
  0x50   : > { %s7404_s19 = scalar_lea.vmem %s8748_s20, %s6069_s28  ;;  %827 = sbr.rel (%p5951_p1) target bundleno = 90 (0x5a), region = 104 }
  0x54   : > { %s817_s29 = scalar_lea.vmem %s8747_s7, %s7354_s12 }
  0x55   : > { %v828_v0 = vld [vmem:[%s8749_s23] sm:$0xff]  ;;  %vm836_vm0 = vcmask 261120   ;;  %v829_v1 = vld [vmem:[%s8749_s23 + $0x8] sm:$0xff]  ;;  %v830_v2 = vld [vmem:[%s8749_s23 + $0x10] sm:$0xff] }
  0x56   : > { %837 = vst.msk [vmem:[#allocation2] sm:$0xff] %vm836_vm0, %v828_v0  ;;  %838 = vst.msk [vmem:[#allocation2 + $0x8] sm:$0xff] %vm836_vm0, %v829_v1  ;;  %v831_v3 = vld [vmem:[%s8749_s23 + $0x18] sm:$0xff]  ;;  %v832_v4 = vld [vmem:[%s8749_s23 + $0x20] sm:$0xff] }
  0x57   : > { %839 = vst.msk [vmem:[#allocation2 + $0x10] sm:$0xff] %vm836_vm0, %v830_v2  ;;  %v833_v5 = vld [vmem:[%s8749_s23 + $0x28] sm:$0xff]  ;;  %840 = vst.msk [vmem:[#allocation2 + $0x18] sm:$0xff] %vm836_vm0, %v831_v3  ;;  %v834_v6 = vld [vmem:[%s8749_s23 + $0x30] sm:$0xff] }
  0x58   : > { %841 = vst.msk [vmem:[#allocation2 + $0x20] sm:$0xff] %vm836_vm0, %v832_v4  ;;  %842 = vst.msk [vmem:[#allocation2 + $0x28] sm:$0xff] %vm836_vm0, %v833_v5  ;;  %v835_v7 = vld [vmem:[%s8749_s23 + $0x38] sm:$0xff] }
  0x59   : > { %843 = vst.msk [vmem:[#allocation2 + $0x30] sm:$0xff] %vm836_vm0, %v834_v6  ;;  %844 = vst.msk [vmem:[#allocation2 + $0x38] sm:$0xff] %vm836_vm0, %v835_v7 }
  0x5a PF: > { %vm855_vm1 = vcmask 261120   ;;  %v6779_v0 = vld [vmem:[%s7372_s24 + $0x8] sm:$0xff]   ;;  %v6780_v1 = vld [vmem:[%s7372_s24] sm:$0xff]   ;;  %s8750_s15 = scalar_lea.vmem %s8695_s3, %s7354_s12  ;;  %s8751_s20 = scalar_lea.vmem %s8696_s4, %s7354_s12  ;;  %vm7137_vm2 = vmmov 0   ;;  %vm1121_vm3 = vcmask 64512   ;;  %vm1612_vm4 = vcmask 1043456  }
  0x5b   : > { %6233 = vmatprep.subr.bf16.mxu1 %v6779_v0  ;;  %s8752_s17 = scalar_lea.vmem %s8698_s6, %s7354_s12  ;;  %s7138_s0 = smov 96   ;;  %vm2920_vm5 = vcmask 130112   ;;  %vm3841_vm6 = vcmask 195712   ;;  %vm4762_vm7 = vcmask 261312  }
  0x5c   : > { %6234 = vmatpush3.bf16.msra.mxu1 %v6779_v0  ;;  %s7139_s21 = smov 64   ;;  %s8753_s2 = sld [smem:[#allocation21_spill]] }
  0x5d   : > { %v845_v8 = vld [vmem:[#allocation2] sm:$0xff]  ;;  %v846_v10 = vld [vmem:[#allocation2 + $0x8] sm:$0xff]  ;;  %6235 = vmatprep.subr.bf16.mxu1 %v6780_v1  ;;  %s7140_s24 = smov 88   ;;  %s7141_s1 = smov 120  }
  0x5e   : > { %v847_v9 = vld [vmem:[#allocation2 + $0x10] sm:$0xff]  ;;  %v856_v11 = vsel %vm855_vm1, %v845_v8, 0.0  ;;  %v848_v13 = vld [vmem:[#allocation2 + $0x18] sm:$0xff]  ;;  %v859_v16 = vsel %vm855_vm1, %v846_v10, 0.0  ;;  %s7143_s7 = smov 80   ;;  %s7144_s28 = smov 112  }
  0x5f   : > { %v862_v12 = vsel %vm855_vm1, %v847_v9, 0.0  ;;  %v849_v14 = vld [vmem:[#allocation2 + $0x20] sm:$0xff]  ;;  %v850_v15 = vld [vmem:[#allocation2 + $0x28] sm:$0xff]  ;;  %857 = vadd.xlane.f32.xlu0 %v856_v11  ;;  %v865_v17 = vsel %vm855_vm1, %v848_v13, 0.0  ;;  %s7149_s25 = smov 8   ;;  %s7150_s22 = smov 16  }
  0x60   : > { %863 = vadd.xlane.f32.xlu1 %v862_v12  ;;  %v868_v18 = vsel %vm855_vm1, %v849_v14, 0.0  ;;  %v871_v19 = vsel %vm855_vm1, %v850_v15, 0.0  ;;  %v851_v20 = vld [vmem:[#allocation2 + $0x30] sm:$0xff]  ;;  %v852_v21 = vld [vmem:[#allocation2 + $0x38] sm:$0xff]  ;;  %6236 = vmatpush3.bf16.msra.mxu1 %v6780_v1  ;;  %p6058_p4 = scmp.ne.s32.totalorder %s7124_s30, 1 }
  0x61   : > { %v874_v22 = vsel %vm855_vm1, %v851_v20, 0.0  ;;  %v877_v23 = vsel %vm855_vm1, %v852_v21, 0.0  ;;  %s8757_s16 = sld [smem:[#allocation29_spill]] (!%p6058_p4) }
  0x63   : > { %860 = vadd.xlane.f32.xlu0 %v859_v16 }
  0x64   : > { %866 = vadd.xlane.f32.xlu1 %v865_v17 }
  0x67   : > { %869 = vadd.xlane.f32.xlu0 %v868_v18 }
  0x68   : > { %872 = vadd.xlane.f32.xlu1 %v871_v19 }
  0x6b   : > { %875 = vadd.xlane.f32.xlu0 %v874_v22 }
  0x6c   : > { %878 = vadd.xlane.f32.xlu1 %v877_v23 }
  0xe8   : > { %v858_v24 = vpop.xlane.xlu0 %857 }
  0xe9   : > { %v864_v25 = vpop.xlane.xlu1 %863  ;;  %v881_v26 = vmul.f32 0.03125, %v858_v24 }
  0xea   : > { %v883_v27 = vmul.f32 0.03125, %v864_v25 }
  0xeb   : > { %v7439_v28 = vsub.f32 %v845_v8, %v881_v26 }
  0xec   : > { %v7441_v29 = vsub.f32 %v847_v9, %v883_v27  ;;  %v861_v30 = vpop.xlane.xlu0 %860 }
  0xed   : > { %v867_v31 = vpop.xlane.xlu1 %866  ;;  %v882_v32 = vmul.f32 0.03125, %v861_v30  ;;  %v897_v34 = vmul.f32 %v7439_v28, %v7439_v28  ;;  %v5952_v30 = vld [vmem:[%s8750_s15] ss:$0 sm:$0xff]  ;;  %s7142_s15 = smov 56  }
  0xee   : > { %v884_v33 = vmul.f32 0.03125, %v867_v31  ;;  %v899_v35 = vmul.f32 %v7441_v29, %v7441_v29 }
  0xef   : > { %v7447_v36 = vsub.f32 %v846_v10, %v882_v32  ;;  %v905_v38 = vsel %vm855_vm1, %v897_v34, 0.0 }
  0xf0   : > { %v7449_v37 = vsub.f32 %v848_v13, %v884_v33  ;;  %906 = vadd.xlane.f32.xlu0 %v905_v38  ;;  %v870_v39 = vpop.xlane.xlu0 %869  ;;  %v911_v41 = vsel %vm855_vm1, %v899_v35, 0.0  ;;  %v5953_v35 = vld [vmem:[%s8751_s20] ss:$0 sm:$0xff]  ;;  %s7145_s20 = smov 48  }
  0xf1   : > { %v873_v40 = vpop.xlane.xlu1 %872  ;;  %v885_v42 = vmul.f32 0.03125, %v870_v39  ;;  %v898_v44 = vmul.f32 %v7447_v36, %v7447_v36 }
  0xf2   : > { %v886_v43 = vmul.f32 0.03125, %v873_v40  ;;  %v900_v45 = vmul.f32 %v7449_v37, %v7449_v37 }
  0xf3   : > { %v7457_v46 = vsub.f32 %v849_v14, %v885_v42  ;;  %v908_v48 = vsel %vm855_vm1, %v898_v44, 0.0 }
  0xf4   : > { %v7459_v47 = vsub.f32 %v850_v15, %v886_v43  ;;  %912 = vadd.xlane.f32.xlu0 %v911_v41  ;;  %909 = vadd.xlane.f32.xlu1 %v908_v48  ;;  %v876_v49 = vpop.xlane.xlu0 %875  ;;  %v914_v51 = vsel %vm855_vm1, %v900_v45, 0.0 }
  0xf5   : > { %v879_v50 = vpop.xlane.xlu1 %878  ;;  %v887_v52 = vmul.f32 0.03125, %v876_v49  ;;  %v901_v54 = vmul.f32 %v7457_v46, %v7457_v46 }
  0xf6   : > { %v888_v53 = vmul.f32 0.03125, %v879_v50  ;;  %v902_v55 = vmul.f32 %v7459_v47, %v7459_v47 }
  0xf7   : > { %v7467_v56 = vsub.f32 %v851_v20, %v887_v52  ;;  %v917_v58 = vsel %vm855_vm1, %v901_v54, 0.0 }
  0xf8   : > { %v7469_v57 = vsub.f32 %v852_v21, %v888_v53  ;;  %915 = vadd.xlane.f32.xlu1 %v914_v51  ;;  %918 = vadd.xlane.f32.xlu0 %v917_v58  ;;  %v920_v59 = vsel %vm855_vm1, %v902_v55, 0.0 }
  0xf9   : > { %v903_v60 = vmul.f32 %v7467_v56, %v7467_v56 }
  0xfa   : > { %v904_v61 = vmul.f32 %v7469_v57, %v7469_v57 }
  0xfb   : > { %v923_v62 = vsel %vm855_vm1, %v903_v60, 0.0 }
  0xfc   : > { %921 = vadd.xlane.f32.xlu1 %v920_v59  ;;  %924 = vadd.xlane.f32.xlu0 %v923_v62  ;;  %v926_v63 = vsel %vm855_vm1, %v904_v61, 0.0 }
 0x100   : > { %927 = vadd.xlane.f32.xlu1 %v926_v63 }
 0x179   : > { %v907_v2 = vpop.xlane.xlu0 %906 }
 0x17a   : > { %v929_v3 = vmul.f32 0.03125, %v907_v2 }
 0x17c   : > { %v937_v4 = vadd.f32 1e-05, %v929_v3 }
 0x17d   : > { %v910_v5 = vpop.xlane.xlu1 %909  ;;  %v913_v6 = vpop.xlane.xlu0 %912 }
 0x17e   : > { %6793 = vrsqrt.f32 %v937_v4  ;;  %v930_v7 = vmul.f32 0.03125, %v910_v5  ;;  %v931_v8 = vmul.f32 0.03125, %v913_v6 }
 0x180   : > { %v938_v9 = vadd.f32 1e-05, %v930_v7  ;;  %v939_v10 = vadd.f32 1e-05, %v931_v8 }
 0x181   : > { %v916_v11 = vpop.xlane.xlu1 %915  ;;  %v919_v12 = vpop.xlane.xlu0 %918 }
 0x182   : > { %6795 = vrsqrt.f32 %v938_v9  ;;  %v932_v13 = vmul.f32 0.03125, %v916_v11  ;;  %v933_v14 = vmul.f32 0.03125, %v919_v12 }
 0x183   : > { %6797 = vrsqrt.f32 %v939_v10 }
 0x184   : > { %v940_v15 = vadd.f32 1e-05, %v932_v13  ;;  %v941_v16 = vadd.f32 1e-05, %v933_v14 }
 0x185   : > { %v922_v17 = vpop.xlane.xlu1 %921  ;;  %v925_v18 = vpop.xlane.xlu0 %924 }
 0x186   : > { %6799 = vrsqrt.f32 %v940_v15  ;;  %v934_v19 = vmul.f32 0.03125, %v922_v17  ;;  %v935_v20 = vmul.f32 0.03125, %v925_v18 }
 0x187   : > { %6801 = vrsqrt.f32 %v941_v16 }
 0x188   : > { %v942_v21 = vadd.f32 1e-05, %v934_v19  ;;  %v943_v22 = vadd.f32 1e-05, %v935_v20 }
 0x189   : > { %v928_v23 = vpop.xlane.xlu1 %927 }
 0x18a   : > { %6803 = vrsqrt.f32 %v942_v21  ;;  %v936_v24 = vmul.f32 0.03125, %v928_v23 }
 0x18b   : > { %v6794_v25 = vpop.eup %6793  ;;  %6805 = vrsqrt.f32 %v943_v22 }
 0x18c   : > { %v944_v26 = vadd.f32 1e-05, %v936_v24  ;;  %v953_v27 = vmul.f32 %v6794_v25, %v7439_v28 }
 0x18e   : > { %6807 = vrsqrt.f32 %v944_v26  ;;  %v967_v34 = vmul.f32 %v5952_v30, %v953_v27 }
 0x18f   : > { %v6796_v31 = vpop.eup %6795 }
 0x190   : > { %v6798_v32 = vpop.eup %6797  ;;  %v954_v33 = vmul.f32 %v6796_v31, %v7447_v36  ;;  %v981_v41 = vadd.f32 %v5953_v35, %v967_v34 }
 0x191   : > { %v955_v38 = vmul.f32 %v6798_v32, %v7441_v29 }
 0x192   : > { %v968_v39 = vmul.f32 %v5952_v30, %v954_v33 }
 0x193   : > { %v6800_v28 = vpop.eup %6799  ;;  %v969_v44 = vmul.f32 %v5952_v30, %v955_v38 }
 0x194   : > { %v6802_v40 = vpop.eup %6801  ;;  %v982_v42 = vadd.f32 %v5953_v35, %v968_v39  ;;  %v956_v43 = vmul.f32 %v6800_v28, %v7449_v37 }
 0x195   : > { %v957_v45 = vmul.f32 %v6802_v40, %v7457_v46  ;;  %v983_v51 = vadd.f32 %v5953_v35, %v969_v44 }
 0x196   : > { %v989_v48 = vpack.c.bf16 %v982_v42, %v981_v41  ;;  %v970_v36 = vmul.f32 %v5952_v30, %v956_v43 }
 0x197   : > { %v6804_v49 = vpop.eup %6803  ;;  %v971_v53 = vmul.f32 %v5952_v30, %v957_v45 }
 0x198   : > { %v6806_v50 = vpop.eup %6805  ;;  %6237 = vmatprep.mubr.msk.bf16.mxu1 %vm855_vm1, %v989_v48  ;;  %v984_v52 = vadd.f32 %v5953_v35, %v970_v36  ;;  %v958_v29 = vmul.f32 %v6804_v49, %v7459_v47 }
 0x199   : > { %v959_v54 = vmul.f32 %v6806_v50, %v7467_v56  ;;  %v985_v37 = vadd.f32 %v5953_v35, %v971_v53  ;;  %v7136_v56 = vmov 0.0  }
 0x19a   : > { %v990_v55 = vpack.c.bf16 %v984_v52, %v983_v51  ;;  %v972_v58 = vmul.f32 %v5952_v30, %v958_v29  ;;  %6245 = vmatprep.subr.bf16.mxu1 %v7136_v56  ;;  %6257 = vmatprep.subr.bf16.mxu0 %v7136_v56 }
 0x19b   : > { %v6808_v59 = vpop.eup %6807  ;;  %v973_v61 = vmul.f32 %v5952_v30, %v959_v54  ;;  %6259 = vmatprep.mubr.msk.bf16.mxu0 %vm7137_vm2, %v7136_v56 }
 0x19c   : > { %6238 = vmatmul.mubr.msk.bf16.vlgmr.msra.gmra.mxu1 %vm855_vm1, %v990_v55  ;;  %v986_v46 = vadd.f32 %v5953_v35, %v972_v58  ;;  %v960_v60 = vmul.f32 %v6808_v59, %v7469_v57  ;;  %v5954_v57 = vld [vmem:[%s8752_s17] ss:$0 sm:$0xff]  ;;  %s7146_s17 = smov 72  }
 0x19d   : > { %v987_v0 = vadd.f32 %v5953_v35, %v973_v61 }
 0x19e   : > { %v991_v62 = vpack.c.bf16 %v986_v46, %v985_v37  ;;  %v974_v63 = vmul.f32 %v5952_v30, %v960_v60 }
 0x1a0   : > { %6241 = vmatprep.mubr.msk.bf16.mxu1 %vm855_vm1, %v991_v62  ;;  %v988_v47 = vadd.f32 %v5953_v35, %v974_v63 }
 0x1a2   : > { %v992_v1 = vpack.c.bf16 %v988_v47, %v987_v0 }
 0x1a4   : > { %6242 = vmatmul.mubr.msk.bf16.gmra.mxu1 %vm855_vm1, %v992_v1 }
 0x1a5   : > { %6247 = vmatprep.mubr.msk.bf16.mxu1 %vm7137_vm2, %v7136_v56 }
 0x25c   : > { %v6239_v2 = vpop.f32.mrf.mxu1 }
 0x25d   : > { %v1071_v10 = vadd.f32 %v6239_v2, %v5954_v57 }
 0x25e   : > { %v1062_v3 = vpop.f32.mrf.mxu1 }
 0x25f   : > { %v1063_v4 = vadd.f32 %v5954_v57, %v1062_v3  ;;  %v7520_v15 = vpack.c.bf16 %v1071_v10, %v1071_v10  ;;  %v1095_v38 = vmul.f32 0.35355338, %v1071_v10  ;;  %v7627_v3 = vld [vmem:[%s8753_s2] sm:$0xff] }
 0x260   : > { %v6240_v5 = vpop.f32.mrf.mxu1 }
 0x261   : > { %v7514_v6 = vpack.c.bf16 %v1063_v4, %v1063_v4  ;;  %v1074_v16 = vadd.f32 %v6240_v5, %v5954_v57  ;;  %v1093_v30 = vmul.f32 0.35355338, %v1063_v4  ;;  %v7566_v41 = vpack.c.bf16 %v1095_v38, %v1095_v38 }
 0x262   : > { %v1065_v7 = vpop.f32.mrf.mxu1 }
 0x263   : > { %v1066_v8 = vadd.f32 %v5954_v57, %v1065_v7  ;;  %1119 = vrot.lane.b32.xlu0 %v7514_v6, %s7138_s0  ;;  %v7528_v20 = vpack.c.bf16 %v1074_v16, %v1074_v16  ;;  %v7556_v32 = vpack.c.bf16 %v1093_v30, %v1093_v30  ;;  %v1096_v45 = vmul.f32 0.35355338, %v1074_v16 }
 0x264   : > { %v6243_v9 = vpop.f32.mrf.mxu1 }
 0x265   : > { %v7517_v11 = vpack.c.bf16 %v1066_v8, %v1066_v8  ;;  %v7522_v17 = vadd.f32 %v6243_v9, %v5954_v57  ;;  %v1094_v39 = vmul.f32 0.35355338, %v1066_v8  ;;  %v7582_v50 = vpack.c.bf16 %v1096_v45, %v1096_v45 }
 0x266   : > { %v1078_v12 = vpop.f32.mrf.mxu1 }
 0x267   : > { %v1079_v13 = vadd.f32 %v5954_v57, %v1078_v12  ;;  %1169 = vrot.lane.b32.xlu1 %v7517_v11, %s7138_s0  ;;  %v7532_v21 = vpack.c.bf16 %v7522_v17, %v7522_v17  ;;  %v7568_v42 = vpack.c.bf16 %v1094_v39, %v1094_v39  ;;  %v1099_v53 = vmul.f32 0.35355338, %v7522_v17 }
 0x268   : > { %v6244_v14 = vpop.f32.mrf.mxu1 }
 0x269   : > { %v7524_v18 = vpack.c.bf16 %v1079_v13, %v1079_v13  ;;  %v7536_v23 = vadd.f32 %v6244_v14, %v5954_v57  ;;  %v1097_v48 = vmul.f32 0.35355338, %v1079_v13  ;;  %v7599_v59 = vpack.c.bf16 %v1099_v53, %v1099_v53 }
 0x26a   : > { %v1081_v19 = vpop.f32.mrf.mxu1 }
 0x26b   : > { %1218 = vrot.lane.b32.xlu1 %v7520_v15, %s7138_s0  ;;  %1316 = vrot.lane.b32.xlu0 %v7524_v18, %s7138_s0  ;;  %v1082_v22 = vadd.f32 %v5954_v57, %v1081_v19  ;;  %v7545_v25 = vpack.c.bf16 %v7536_v23, %v7536_v23  ;;  %v7584_v51 = vpack.c.bf16 %v1097_v48, %v1097_v48  ;;  %v1100_v61 = vmul.f32 0.35355338, %v7536_v23 }
 0x26d   : > { %v7538_v24 = vpack.c.bf16 %v1082_v22, %v1082_v22  ;;  %v1098_v54 = vmul.f32 0.35355338, %v1082_v22  ;;  %v7616_v63 = vpack.c.bf16 %v1100_v61, %v1100_v61 }
 0x26f   : > { %1267 = vrot.lane.b32.xlu1 %v7528_v20, %s7138_s0  ;;  %1414 = vrot.lane.b32.xlu0 %v7532_v21, %s7138_s0  ;;  %v7601_v37 = vpack.c.bf16 %v1098_v54, %v1098_v54 }
 0x273   : > { %1365 = vrot.lane.b32.xlu1 %v7538_v24, %s7138_s0  ;;  %1607 = vrot.lane.b32.xlu0 %v7514_v6, %s7139_s21 }
 0x277   : > { %1463 = vrot.lane.b32.xlu1 %v7545_v25, %s7138_s0  ;;  %s7147_s0 = smov 104  }
 0x27b   : > { %1656 = vrot.lane.b32.xlu1 %v7517_v11, %s7139_s21 }
 0x27f   : > { %1704 = vrot.lane.b32.xlu1 %v7520_v15, %s7139_s21 }
 0x283   : > { %1752 = vrot.lane.b32.xlu1 %v7528_v20, %s7139_s21 }
 0x2d5   : > { %v1120_v26 = vpop.permute.xlu0 %1119 }
 0x2d6   : > { %v1126_v27 = vsel %vm1121_vm3, %v1120_v26, 0 }
 0x2d7   : > { %6246 = vmatpush3.bf16.xpose.msra.mxu1 %v1126_v27 }
 0x2d8   : > { %6251 = vmatprep.subr.bf16.mxu1 %v7136_v56 }
 0x2d9   : > { %v1170_v31 = vpop.permute.xlu1 %1169 }
 0x2da   : > { %v1175_v34 = vsel %vm1121_vm3, %v1170_v31, 0 }
 0x2dd   : > { %v1219_v33 = vpop.permute.xlu1 %1218  ;;  %v1317_v28 = vpop.permute.xlu0 %1316 }
 0x2de   : > { %6248 = vmatmul.mubr.msk.bf16.vlgmr.msra.gmra.mxu1 %vm1121_vm3, %v7556_v32  ;;  %v1224_v35 = vsel %vm1121_vm3, %v1219_v33, 0  ;;  %v1322_v43 = vsel %vm1121_vm3, %v1317_v28, 0 }
 0x2df   : > { %6252 = vmatpush3.bf16.xpose.msra.mxu1 %v1175_v34  ;;  %6258 = vmatpush3.bf16.xpose.msra.mxu0 %v1224_v35 }
 0x2e0   : > { %6253 = vmatprep.mubr.msk.bf16.mxu1 %vm7137_vm2, %v7136_v56  ;;  %6263 = vmatprep.subr.bf16.mxu1 %v7136_v56 }
 0x2e1   : > { %6269 = vmatprep.subr.bf16.mxu0 %v7136_v56  ;;  %v1268_v40 = vpop.permute.xlu1 %1267  ;;  %v1415_v36 = vpop.permute.xlu0 %1414 }
 0x2e2   : > { %v1273_v44 = vsel %vm1121_vm3, %v1268_v40, 0  ;;  %v1420_v52 = vsel %vm1121_vm3, %v1415_v36, 0 }
 0x2e5   : > { %v1366_v49 = vpop.permute.xlu1 %1365  ;;  %v1608_v55 = vpop.permute.xlu0 %1607 }
 0x2e6   : > { %6254 = vmatmul.mubr.msk.bf16.vlgmr.msra.gmra.mxu1 %vm1121_vm3, %v7568_v42  ;;  %6260 = vmatmul.mubr.msk.bf16.vlgmr.msra.gmra.mxu0 %vm1121_vm3, %v7566_v41  ;;  %v1371_v29 = vsel %vm1121_vm3, %v1366_v49, 0  ;;  %v1614_v46 = vsel %vm1612_vm4, %v1608_v55, 0 }
 0x2e7   : > { %6264 = vmatpush3.bf16.xpose.msra.mxu1 %v1273_v44  ;;  %6270 = vmatpush3.bf16.xpose.msra.mxu0 %v1322_v43 }
 0x2e8   : > { %6271 = vmatprep.mubr.msk.bf16.mxu0 %vm7137_vm2, %v7136_v56  ;;  %6265 = vmatprep.mubr.msk.bf16.mxu1 %vm7137_vm2, %v7136_v56 }
 0x2e9   : > { %6275 = vmatprep.subr.bf16.mxu1 %v7136_v56  ;;  %6281 = vmatprep.subr.bf16.mxu0 %v7136_v56  ;;  %v1464_v58 = vpop.permute.xlu1 %1463 }
 0x2ea   : > { %v1469_v60 = vsel %vm1121_vm3, %v1464_v58, 0 }
 0x2ed   : > { %v1657_v62 = vpop.permute.xlu1 %1656 }
 0x2ee   : > { %6266 = vmatmul.mubr.msk.bf16.vlgmr.msra.gmra.mxu1 %vm1121_vm3, %v7582_v50  ;;  %6272 = vmatmul.mubr.msk.bf16.vlgmr.msra.gmra.mxu0 %vm1121_vm3, %v7584_v51  ;;  %v1662_v0 = vsel %vm1612_vm4, %v1657_v62, 0 }
 0x2ef   : > { %6276 = vmatpush3.bf16.xpose.msra.mxu1 %v1371_v29  ;;  %6282 = vmatpush3.bf16.xpose.msra.mxu0 %v1420_v52 }
 0x2f0   : > { %6277 = vmatprep.mubr.msk.bf16.mxu1 %vm7137_vm2, %v7136_v56  ;;  %6283 = vmatprep.mubr.msk.bf16.mxu0 %vm7137_vm2, %v7136_v56 }
 0x2f1   : > { %6287 = vmatprep.subr.bf16.mxu1 %v7136_v56  ;;  %6293 = vmatprep.subr.bf16.mxu0 %v7136_v56 }
 0x2f6   : > { %6278 = vmatmul.mubr.msk.bf16.vlgmr.msra.gmra.mxu1 %vm1121_vm3, %v7601_v37  ;;  %6284 = vmatmul.mubr.msk.bf16.vlgmr.msra.gmra.mxu0 %vm1121_vm3, %v7599_v59 }
 0x2f7   : > { %6288 = vmatpush3.bf16.xpose.msra.mxu1 %v1469_v60  ;;  %6294 = vmatpush3.bf16.msra.mxu0 %v1614_v46 }
 0x2f8   : > { %6289 = vmatprep.mubr.msk.bf16.mxu1 %vm7137_vm2, %v7136_v56  ;;  %6299 = vmatprep.subr.bf16.mxu1 %v7136_v56 }
 0x2f9   : > { %6295 = vmatprep.mubr.msk.bf16.mxu0 %vm7137_vm2, %v7136_v56  ;;  %6305 = vmatprep.subr.bf16.mxu0 %v7136_v56 }
 0x2fe   : > { %6290 = vmatmul.mubr.msk.bf16.vlgmr.msra.gmra.mxu1 %vm1121_vm3, %v7616_v63 }
 0x2ff   : > { %6300 = vmatpush3.bf16.msra.mxu1 %v1662_v0  ;;  %6301 = vmatprep.mubr.msk.bf16.mxu1 %vm7137_vm2, %v7136_v56 }
 0x300   : > { %6311 = vmatprep.subr.bf16.mxu1 %v7136_v56 }
 0x39e   : > { %v1162_v47 = vpop.f32.mrf.mxu1 }
 0x39f   : > { %v1163_v12 = vadd.f32 %v1162_v47, %v7627_v3 }
 0x3a0   : > { %v6249_v1 = vpop.f32.mrf.mxu1 }
 0x3a1   : > { %v1511_v23 = vsel %vm1121_vm3, %v1163_v12, -inf }
 0x3a2   : > { %v1165_v2 = vpop.f32.mrf.mxu1 }
 0x3a3   : > { %v7658_v2 = vpop.permute.xlu1 %1704 }
 0x3a4   : > { %v6250_v57 = vpop.f32.mrf.mxu1 }
 0x3a6   : > { %v1211_v4 = vpop.f32.mrf.mxu1  ;;  %v1260_v5 = vpop.f32.mrf.mxu0 }
 0x3a7   : > { %v1212_v7 = vadd.f32 %v1211_v4, %v7627_v3  ;;  %v1261_v8 = vadd.f32 %v1260_v5, %v7627_v3  ;;  %v7660_v57 = vpop.permute.xlu1 %1752 }
 0x3a8   : > { %v6255_v9 = vpop.f32.mrf.mxu1  ;;  %v6261_v10 = vpop.f32.mrf.mxu0 }
 0x3a9   : > { %v1517_v13 = vsel %vm1121_vm3, %v1261_v8, -inf  ;;  %v1514_v14 = vsel %vm1121_vm3, %v1212_v7, -inf }
 0x3aa   : > { %v1263_v16 = vpop.f32.mrf.mxu0  ;;  %1518 = vmax.xlane.f32.xlu0 %v1517_v13  ;;  %1515 = vmax.xlane.f32.xlu1 %v1514_v14  ;;  %v1214_v17 = vpop.f32.mrf.mxu1 }
 0x3ac   : > { %v6256_v19 = vpop.f32.mrf.mxu1  ;;  %v6262_v22 = vpop.f32.mrf.mxu0 }
 0x3ae   : > { %1512 = vmax.xlane.f32.xlu0 %v1511_v23  ;;  %v1309_v26 = vpop.f32.mrf.mxu1  ;;  %v1358_v27 = vpop.f32.mrf.mxu0 }
 0x3af   : > { %v1359_v30 = vadd.f32 %v1358_v27, %v7627_v3  ;;  %v7637_v34 = vadd.f32 %v1309_v26, %v7627_v3 }
 0x3b0   : > { %v6267_v31 = vpop.f32.mrf.mxu1  ;;  %v6273_v33 = vpop.f32.mrf.mxu0 }
 0x3b1   : > { %v1523_v35 = vsel %vm1121_vm3, %v1359_v30, -inf  ;;  %v1520_v43 = vsel %vm1121_vm3, %v7637_v34, -inf }
 0x3b2   : > { %v1312_v38 = vpop.f32.mrf.mxu1  ;;  %1524 = vmax.xlane.f32.xlu0 %v1523_v35  ;;  %v1361_v39 = vpop.f32.mrf.mxu0 }
 0x3b4   : > { %v6268_v28 = vpop.f32.mrf.mxu1  ;;  %v6274_v40 = vpop.f32.mrf.mxu0 }
 0x3b6   : > { %v1407_v44 = vpop.f32.mrf.mxu1  ;;  %1521 = vmax.xlane.f32.xlu0 %v1520_v43  ;;  %v1456_v45 = vpop.f32.mrf.mxu0 }
 0x3b7   : > { %v7643_v48 = vadd.f32 %v1456_v45, %v7627_v3  ;;  %v1408_v62 = vadd.f32 %v1407_v44, %v7627_v3 }
 0x3b8   : > { %v6279_v36 = vpop.f32.mrf.mxu1  ;;  %v6285_v49 = vpop.f32.mrf.mxu0 }
 0x3b9   : > { %v1529_v52 = vsel %vm1121_vm3, %v7643_v48, -inf  ;;  %v1526_v47 = vsel %vm1121_vm3, %v1408_v62, -inf }
 0x3ba   : > { %v1410_v29 = vpop.f32.mrf.mxu1  ;;  %1530 = vmax.xlane.f32.xlu0 %v1529_v52  ;;  %v1459_v53 = vpop.f32.mrf.mxu0 }
 0x3bb   : > { %1848 = vrot.lane.b32.xlu1 %v7538_v24, %s7139_s21 }
 0x3bc   : > { %v6280_v54 = vpop.f32.mrf.mxu1  ;;  %v6286_v55 = vpop.f32.mrf.mxu0 }
 0x3be   : > { %v1505_v58 = vpop.f32.mrf.mxu1 }
 0x3bf   : > { %v7653_v0 = vadd.f32 %v1505_v58, %v7627_v3 }
 0x3c0   : > { %v6291_v46 = vpop.f32.mrf.mxu1 }
 0x3c1   : > { %v1532_v1 = vsel %vm1121_vm3, %v7653_v0, -inf }
 0x3c2   : > { %v1508_v60 = vpop.f32.mrf.mxu1 }
 0x3c4   : > { %v6292_v61 = vpop.f32.mrf.mxu1 }
 0x3d0   : > { %1800 = vrot.lane.b32.xlu0 %v7524_v18, %s7139_s21 }
 0x3df   : > { %1527 = vmax.xlane.f32.xlu1 %v1526_v47 }
 0x3e3   : > { %1533 = vmax.xlane.f32.xlu1 %v1532_v1 }
 0x433   : > { %v1516_v4 = vpop.xlane.xlu1 %1515  ;;  %v1519_v5 = vpop.xlane.xlu0 %1518 }
 0x434   : > { %v1536_v9 = vsub.f32 %v1212_v7, %v1516_v4  ;;  %v1537_v10 = vsub.f32 %v1261_v8, %v1519_v5 }
 0x436   : > { %v1545_v13 = vmul.f32 1.442695, %v1536_v9  ;;  %v1547_v14 = vmul.f32 1.442695, %v1537_v10 }
 0x437   : > { %v1513_v16 = vpop.xlane.xlu0 %1512  ;;  %v7681_v28 = vpop.permute.xlu1 %1848 }
 0x438   : > { %6809 = vpow2.f32 %v1545_v13  ;;  %v1535_v17 = vsub.f32 %v1163_v12, %v1513_v16  ;;  %v1758_v16 = vsel %vm1612_vm4, %v7660_v57, 0 }
 0x439   : > { %6811 = vpow2.f32 %v1547_v14 }
 0x43a   : > { %v1543_v19 = vmul.f32 1.442695, %v1535_v17 }
 0x43b   : > { %v1525_v22 = vpop.xlane.xlu0 %1524 }
 0x43c   : > { %6813 = vpow2.f32 %v1543_v19  ;;  %v1539_v23 = vsub.f32 %v1359_v30, %v1525_v22 }
 0x43e   : > { %v1551_v26 = vmul.f32 1.442695, %v1539_v23  ;;  %v1710_v23 = vsel %vm1612_vm4, %v7658_v2, 0 }
 0x43f   : > { %v1522_v38 = vpop.xlane.xlu0 %1521 }
 0x440   : > { %6815 = vpow2.f32 %v1551_v26  ;;  %v1538_v39 = vsub.f32 %v7637_v34, %v1522_v38 }
 0x442   : > { %v1549_v40 = vmul.f32 1.442695, %v1538_v39 }
 0x443   : > { %v1531_v44 = vpop.xlane.xlu0 %1530 }
 0x444   : > { %6817 = vpow2.f32 %v1549_v40  ;;  %v1541_v49 = vsub.f32 %v7643_v48, %v1531_v44 }
 0x445   : > { %v7662_v27 = vpop.eup %6809 }
 0x446   : > { %v7664_v31 = vpop.eup %6811  ;;  %v1562_v7 = vsel %vm1121_vm3, %v7662_v27, 0.0  ;;  %v1555_v52 = vmul.f32 1.442695, %v1541_v49  ;;  %v1854_v49 = vsel %vm1612_vm4, %v7681_v28, 0 }
 0x447   : > { %1563 = vadd.xlane.f32.xlu1 %v1562_v7  ;;  %v1565_v8 = vsel %vm1121_vm3, %v7664_v31, 0.0 }
 0x448   : > { %1566 = vadd.xlane.f32.xlu0 %v1565_v8 }
 0x449   : > { %v7670_v12 = vpop.eup %6813 }
 0x44a   : > { %v1559_v33 = vsel %vm1121_vm3, %v7670_v12, 0.0 }
 0x44c   : > { %1560 = vadd.xlane.f32.xlu0 %v1559_v33 }
 0x44d   : > { %v7674_v30 = vpop.eup %6815 }
 0x44e   : > { %v1571_v35 = vsel %vm1121_vm3, %v7674_v30, 0.0 }
 0x450   : > { %1572 = vadd.xlane.f32.xlu0 %v1571_v35 }
 0x451   : > { %v7686_v29 = vpop.eup %6817 }
 0x452   : > { %v1568_v34 = vsel %vm1121_vm3, %v7686_v29, 0.0 }
 0x458   : > { %1944 = vrot.lane.b32.xlu1 %v7545_v25, %s7139_s21 }
 0x466   : > { %1896 = vrot.lane.b32.xlu0 %v7532_v21, %s7139_s21  ;;  %s7148_s21 = smov 40  }
 0x468   : > { %v1528_v43 = vpop.xlane.xlu1 %1527 }
 0x469   : > { %v1540_v45 = vsub.f32 %v1408_v62, %v1528_v43 }
 0x46b   : > { %v1553_v36 = vmul.f32 1.442695, %v1540_v45 }
 0x46c   : > { %v1534_v58 = vpop.xlane.xlu1 %1533 }
 0x46d   : > { %6819 = vpow2.f32 %v1553_v36  ;;  %v1542_v46 = vsub.f32 %v7653_v0, %v1534_v58  ;;  %v1801_v0 = vpop.permute.xlu0 %1800 }
 0x46e   : > { %6821 = vpow2.f32 %v1555_v52  ;;  %v1806_v7 = vsel %vm1612_vm4, %v1801_v0, 0 }
 0x46f   : > { %v1557_v60 = vmul.f32 1.442695, %v1542_v46 }
 0x471   : > { %6823 = vpow2.f32 %v1557_v60 }
 0x47a   : > { %v7690_v53 = vpop.eup %6819 }
 0x47b   : > { %v1574_v54 = vsel %vm1121_vm3, %v7690_v53, 0.0  ;;  %v7694_v55 = vpop.eup %6821 }
 0x47c   : > { %1569 = vadd.xlane.f32.xlu1 %v1568_v34  ;;  %v1577_v48 = vsel %vm1121_vm3, %v7694_v55, 0.0 }
 0x47e   : > { %v7710_v61 = vpop.eup %6823 }
 0x47f   : > { %v1580_v62 = vsel %vm1121_vm3, %v7710_v61, 0.0 }
 0x480   : > { %1575 = vadd.xlane.f32.xlu1 %v1574_v54 }
 0x485   : > { %1578 = vadd.xlane.f32.xlu0 %v1577_v48 }
 0x491   : > { %2054 = vrot.lane.b32.xlu1 %v7517_v11, %s7140_s24 }
 0x49b   : > { %2003 = vrot.lane.b32.xlu0 %v7514_v6, %s7140_s24 }
 0x49f   : > { %2001 = vrot.lane.b32.xlu0 %v7556_v32, %s7141_s1 }
 0x4a3   : > { %2105 = vrot.lane.b32.xlu0 %v7520_v15, %s7140_s24 }
 0x4a7   : > { %2103 = vrot.lane.b32.xlu0 %v7566_v41, %s7141_s1 }
 0x4ab   : > { %2207 = vrot.lane.b32.xlu0 %v7524_v18, %s7140_s24 }
 0x4af   : > { %2205 = vrot.lane.b32.xlu0 %v7584_v51, %s7141_s1 }
 0x4b3   : > { %2309 = vrot.lane.b32.xlu0 %v7532_v21, %s7140_s24 }
 0x4b5   : > { %1581 = vadd.xlane.f32.xlu1 %v1580_v62 }
 0x4b7   : > { %2307 = vrot.lane.b32.xlu0 %v7599_v59, %s7141_s1 }
 0x4bb   : > { %2504 = vrot.lane.b32.xlu0 %v7514_v6, %s7142_s15 }
 0x4c6   : > { %2052 = vrot.lane.b32.xlu1 %v7568_v42, %s7141_s1 }
 0x4ca   : > { %2156 = vrot.lane.b32.xlu1 %v7528_v20, %s7140_s24 }
 0x4ce   : > { %2154 = vrot.lane.b32.xlu1 %v7582_v50, %s7141_s1 }
 0x4d0   : > { %v1564_v47 = vpop.xlane.xlu1 %1563 }
 0x4d1   : > { %6825 = vrcp.f32 %v1564_v47  ;;  %v1567_v1 = vpop.xlane.xlu0 %1566 }
 0x4d2   : > { %2258 = vrot.lane.b32.xlu1 %v7538_v24, %s7140_s24 }
 0x4d5   : > { %v1561_v4 = vpop.xlane.xlu0 %1560 }
 0x4d6   : > { %6827 = vrcp.f32 %v1561_v4  ;;  %2256 = vrot.lane.b32.xlu1 %v7601_v37, %s7141_s1 }
 0x4d7   : > { %6829 = vrcp.f32 %v1567_v1 }
 0x4d9   : > { %v1573_v9 = vpop.xlane.xlu0 %1572 }
 0x4da   : > { %2360 = vrot.lane.b32.xlu1 %v7545_v25, %s7140_s24  ;;  %6831 = vrcp.f32 %v1573_v9  ;;  %s7151_s24 = smov 24  }
 0x4dd   : > { %v1897_v8 = vpop.permute.xlu0 %1896 }
 0x4de   : > { %v6826_v5 = vpop.eup %6825  ;;  %2358 = vrot.lane.b32.xlu1 %v7616_v63, %s7141_s1  ;;  %v1902_v33 = vsel %vm1612_vm4, %v1897_v8, 0 }
 0x4df   : > { %v1592_v10 = vmul.f32 %v6826_v5, %v7662_v27 }
 0x4e1   : > { %v1600_v13 = vpack.c.bf16 %v1592_v10, %v1592_v10 }
 0x4e2   : > { %2552 = vrot.lane.b32.xlu1 %v7517_v11, %s7142_s15 }
 0x4e3   : > { %v6828_v14 = vpop.eup %6827  ;;  %6302 = vmatmul.mubr.msk.bf16.vlgmr.msra.gmra.mxu1 %vm1121_vm3, %v1600_v13 }
 0x4e4   : > { %6312 = vmatpush3.bf16.msra.mxu1 %v1758_v16  ;;  %v1591_v17 = vmul.f32 %v6828_v14, %v7670_v12  ;;  %6313 = vmatprep.mubr.msk.bf16.mxu1 %vm7137_vm2, %v7136_v56  ;;  %v6830_v22 = vpop.eup %6829 }
 0x4e5   : > { %6323 = vmatprep.subr.bf16.mxu1 %v7136_v56  ;;  %v1593_v57 = vmul.f32 %v6830_v22, %v7664_v31  ;;  %v1945_v31 = vpop.permute.xlu1 %1944 }
 0x4e6   : > { %2600 = vrot.lane.b32.xlu1 %v7520_v15, %s7142_s15  ;;  %v1599_v19 = vpack.c.bf16 %v1591_v17, %v1591_v17  ;;  %v1950_v46 = vsel %vm1612_vm4, %v1945_v31, 0 }
 0x4e7   : > { %v1601_v26 = vpack.c.bf16 %v1593_v57, %v1593_v57  ;;  %v6832_v27 = vpop.eup %6831 }
 0x4e8   : > { %6296 = vmatmul.mubr.msk.bf16.vlgmr.msra.gmra.mxu0 %vm1121_vm3, %v1599_v19  ;;  %v1595_v2 = vmul.f32 %v6832_v27, %v7674_v30 }
 0x4e9   : > { %6306 = vmatpush3.bf16.msra.mxu0 %v1710_v23  ;;  %6307 = vmatprep.mubr.msk.bf16.mxu0 %vm7137_vm2, %v7136_v56 }
 0x4ea   : > { %2648 = vrot.lane.b32.xlu1 %v7528_v20, %s7142_s15  ;;  %6317 = vmatprep.subr.bf16.mxu0 %v7136_v56  ;;  %v1603_v12 = vpack.c.bf16 %v1595_v2, %v1595_v2 }
 0x4f0   : > { %6308 = vmatmul.mubr.msk.bf16.vlgmr.msra.gmra.mxu0 %vm1121_vm3, %v1601_v26 }
 0x4f1   : > { %6318 = vmatpush3.bf16.msra.mxu0 %v1806_v7  ;;  %6319 = vmatprep.mubr.msk.bf16.mxu0 %vm7137_vm2, %v7136_v56 }
 0x4f2   : > { %6329 = vmatprep.subr.bf16.mxu0 %v7136_v56 }
 0x4f8   : > { %6320 = vmatmul.mubr.msk.bf16.vlgmr.msra.gmra.mxu0 %vm1121_vm3, %v1603_v12 }
 0x4f9   : > { %6330 = vmatpush3.bf16.msra.mxu0 %v1902_v33  ;;  %6331 = vmatprep.mubr.msk.bf16.mxu0 %vm7137_vm2, %v7136_v56 }
 0x4fa   : > { %6341 = vmatprep.subr.bf16.mxu0 %v7136_v56 }
 0x505   : > { %v1570_v35 = vpop.xlane.xlu1 %1569 }
 0x506   : > { %6833 = vrcp.f32 %v1570_v35 }
 0x509   : > { %v1576_v38 = vpop.xlane.xlu1 %1575 }
 0x50a   : > { %6835 = vrcp.f32 %v1576_v38 }
 0x50d   : > { %v2055_v5 = vpop.permute.xlu1 %2054 }
 0x50e   : > { %v1579_v39 = vpop.xlane.xlu0 %1578  ;;  %v2060_v57 = vsel %vm1121_vm3, %v2055_v5, 0 }
 0x50f   : > { %6837 = vrcp.f32 %v1579_v39 }
 0x512   : > { %v2004_v30 = vpop.permute.xlu0 %2003 }
 0x513   : > { %v6834_v40 = vpop.eup %6833  ;;  %v2009_v28 = vsel %vm1121_vm3, %v2004_v30, 0 }
 0x514   : > { %v1594_v43 = vmul.f32 %v6834_v40, %v7686_v29 }
 0x516   : > { %v2002_v44 = vpop.permute.xlu0 %2001  ;;  %v1602_v45 = vpack.c.bf16 %v1594_v43, %v1594_v43 }
 0x517   : > { %v6836_v36 = vpop.eup %6835 }
 0x518   : > { %6314 = vmatmul.mubr.msk.bf16.vlgmr.msra.gmra.mxu1 %vm1121_vm3, %v1602_v45  ;;  %v1596_v34 = vmul.f32 %v6836_v36, %v7690_v53 }
 0x519   : > { %6324 = vmatpush3.bf16.msra.mxu1 %v1854_v49  ;;  %6325 = vmatprep.mubr.msk.bf16.mxu1 %vm7137_vm2, %v7136_v56 }
 0x51a   : > { %v2106_v52 = vpop.permute.xlu0 %2105  ;;  %6335 = vmatprep.subr.bf16.mxu1 %v7136_v56  ;;  %v1604_v48 = vpack.c.bf16 %v1596_v34, %v1596_v34 }
 0x51c   : > { %v6838_v54 = vpop.eup %6837 }
 0x51d   : > { %v1597_v29 = vmul.f32 %v6838_v54, %v7694_v55  ;;  %v2111_v55 = vsel %vm1121_vm3, %v2106_v52, 0 }
 0x51e   : > { %v2104_v60 = vpop.permute.xlu0 %2103 }
 0x51f   : > { %v1605_v58 = vpack.c.bf16 %v1597_v29, %v1597_v29 }
 0x520   : > { %6326 = vmatmul.mubr.msk.bf16.vlgmr.msra.gmra.mxu1 %vm1121_vm3, %v1604_v48 }
 0x521   : > { %6332 = vmatmul.mubr.msk.bf16.vlgmr.msra.gmra.mxu0 %vm1121_vm3, %v1605_v58  ;;  %6336 = vmatpush3.bf16.msra.mxu1 %v1950_v46 }
 0x522   : > { %6342 = vmatpush3.bf16.xpose.msra.mxu0 %v2009_v28  ;;  %6343 = vmatprep.mubr.msk.bf16.mxu0 %vm7137_vm2, %v7136_v56  ;;  %v2208_v53 = vpop.permute.xlu0 %2207 }
 0x523   : > { %6353 = vmatprep.subr.bf16.mxu0 %v7136_v56  ;;  %6337 = vmatprep.mubr.msk.bf16.mxu1 %vm7137_vm2, %v7136_v56  ;;  %v2213_v0 = vsel %vm1121_vm3, %v2208_v53, 0 }
 0x524   : > { %6347 = vmatprep.subr.bf16.mxu1 %v7136_v56 }
 0x526   : > { %v2206_v62 = vpop.permute.xlu0 %2205 }
 0x529   : > { %6344 = vmatmul.mubr.msk.bf16.vlgmr.msra.gmra.mxu0 %vm1121_vm3, %v2002_v44 }
 0x52a   : > { %6354 = vmatpush3.bf16.xpose.msra.mxu0 %v2111_v55  ;;  %6355 = vmatprep.mubr.msk.bf16.mxu0 %vm7137_vm2, %v7136_v56  ;;  %v2310_v47 = vpop.permute.xlu0 %2309 }
 0x52b   : > { %6365 = vmatprep.subr.bf16.mxu0 %v7136_v56  ;;  %v2315_v4 = vsel %vm1121_vm3, %v2310_v47, 0 }
 0x52e   : > { %v2308_v1 = vpop.permute.xlu0 %2307 }
 0x531   : > { %6356 = vmatmul.mubr.msk.bf16.vlgmr.msra.gmra.mxu0 %vm1121_vm3, %v2104_v60 }
 0x532   : > { %6366 = vmatpush3.bf16.xpose.msra.mxu0 %v2213_v0  ;;  %6367 = vmatprep.mubr.msk.bf16.mxu0 %vm7137_vm2, %v7136_v56  ;;  %v2505_v9 = vpop.permute.xlu0 %2504 }
 0x533   : > { %6377 = vmatprep.subr.bf16.mxu0 %v7136_v56  ;;  %v2510_v13 = vsel %vm1612_vm4, %v2505_v9, 0 }
 0x539   : > { %6368 = vmatmul.mubr.msk.bf16.vlgmr.msra.gmra.mxu0 %vm1121_vm3, %v2206_v62 }
 0x53a   : > { %6378 = vmatpush3.bf16.xpose.msra.mxu0 %v2315_v4  ;;  %6379 = vmatprep.mubr.msk.bf16.mxu0 %vm7137_vm2, %v7136_v56 }
 0x53b   : > { %6389 = vmatprep.subr.bf16.mxu0 %v7136_v56 }
 0x53e   : > { %v1582_v10 = vpop.xlane.xlu1 %1581 }
 0x53f   : > { %6839 = vrcp.f32 %v1582_v10 }
 0x541   : > { %6380 = vmatmul.mubr.msk.bf16.vlgmr.msra.gmra.mxu0 %vm1121_vm3, %v2308_v1 }
 0x542   : > { %6390 = vmatpush3.bf16.msra.mxu0 %v2510_v13  ;;  %6391 = vmatprep.mubr.msk.bf16.mxu0 %vm7137_vm2, %v7136_v56  ;;  %v2053_v14 = vpop.permute.xlu1 %2052 }
 0x543   : > { %6401 = vmatprep.subr.bf16.mxu0 %v7136_v56 }
 0x546   : > { %v2157_v16 = vpop.permute.xlu1 %2156 }
 0x547   : > { %v2162_v27 = vsel %vm1121_vm3, %v2157_v16, 0 }
 0x54a   : > { %v2155_v23 = vpop.permute.xlu1 %2154 }
 0x54c   : > { %v6840_v17 = vpop.eup %6839 }
 0x54d   : > { %v1598_v19 = vmul.f32 %v6840_v17, %v7710_v61 }
 0x54e   : > { %v2259_v26 = vpop.permute.xlu1 %2258 }
 0x54f   : > { %v1606_v22 = vpack.c.bf16 %v1598_v19, %v1598_v19  ;;  %v2264_v7 = vsel %vm1121_vm3, %v2259_v26, 0 }
 0x551   : > { %6338 = vmatmul.mubr.msk.bf16.vlgmr.msra.gmra.mxu1 %vm1121_vm3, %v1606_v22 }
 0x552   : > { %6348 = vmatpush3.bf16.xpose.msra.mxu1 %v2060_v57  ;;  %6349 = vmatprep.mubr.msk.bf16.mxu1 %vm7137_vm2, %v7136_v56  ;;  %v2257_v61 = vpop.permute.xlu1 %2256 }
 0x553   : > { %6359 = vmatprep.subr.bf16.mxu1 %v7136_v56 }
 0x556   : > { %v2361_v2 = vpop.permute.xlu1 %2360 }
 0x557   : > { %v2366_v12 = vsel %vm1121_vm3, %v2361_v2, 0 }
 0x559   : > { %6350 = vmatmul.mubr.msk.bf16.vlgmr.msra.gmra.mxu1 %vm1121_vm3, %v2053_v14 }
 0x55a   : > { %6360 = vmatpush3.bf16.xpose.msra.mxu1 %v2162_v27  ;;  %6361 = vmatprep.mubr.msk.bf16.mxu1 %vm7137_vm2, %v7136_v56  ;;  %v2359_v8 = vpop.permute.xlu1 %2358 }
 0x55b   : > { %6371 = vmatprep.subr.bf16.mxu1 %v7136_v56 }
 0x55e   : > { %v2553_v33 = vpop.permute.xlu1 %2552 }
 0x55f   : > { %v2558_v31 = vsel %vm1612_vm4, %v2553_v33, 0 }
 0x561   : > { %6362 = vmatmul.mubr.msk.bf16.vlgmr.msra.gmra.mxu1 %vm1121_vm3, %v2155_v23 }
 0x562   : > { %6372 = vmatpush3.bf16.xpose.msra.mxu1 %v2264_v7  ;;  %6373 = vmatprep.mubr.msk.bf16.mxu1 %vm7137_vm2, %v7136_v56 }
 0x563   : > { %6383 = vmatprep.subr.bf16.mxu1 %v7136_v56 }
 0x569   : > { %6374 = vmatmul.mubr.msk.bf16.vlgmr.msra.gmra.mxu1 %vm1121_vm3, %v2257_v61 }
 0x56a   : > { %6384 = vmatpush3.bf16.xpose.msra.mxu1 %v2366_v12  ;;  %6385 = vmatprep.mubr.msk.bf16.mxu1 %vm7137_vm2, %v7136_v56 }
 0x56b   : > { %6395 = vmatprep.subr.bf16.mxu1 %v7136_v56 }
 0x571   : > { %6386 = vmatmul.mubr.msk.bf16.vlgmr.msra.gmra.mxu1 %vm1121_vm3, %v2359_v8 }
 0x572   : > { %6396 = vmatpush3.bf16.msra.mxu1 %v2558_v31  ;;  %6397 = vmatprep.mubr.msk.bf16.mxu1 %vm7137_vm2, %v7136_v56 }
 0x573   : > { %6407 = vmatprep.subr.bf16.mxu1 %v7136_v56 }
 0x5a3   : > { %v1698_v35 = vpop.f32.mrf.mxu1 }
 0x5a4   : > { %1993 = vst.msk [vmem:[#allocation3 + $0x8] sm:$0xff] %vm1121_vm3, %v1698_v35 }
 0x5a5   : > { %v6303_v38 = vpop.f32.mrf.mxu1 }
 0x5a7   : > { %v1701_v39 = vpop.f32.mrf.mxu1 }
 0x5a8   : > { %v1650_v30 = vpop.f32.mrf.mxu0 }
 0x5a9   : > { %1992 = vst.msk [vmem:[#allocation3] sm:$0xff] %vm1121_vm3, %v1650_v30  ;;  %v6304_v40 = vpop.f32.mrf.mxu1 }
 0x5aa   : > { %v6297_v43 = vpop.f32.mrf.mxu0 }
 0x5ac   : > { %v1653_v44 = vpop.f32.mrf.mxu0 }
 0x5ae   : > { %v6298_v45 = vpop.f32.mrf.mxu0 }
 0x5b0   : > { %v1746_v36 = vpop.f32.mrf.mxu0 }
 0x5b1   : > { %1994 = vst.msk [vmem:[#allocation3 + $0x10] sm:$0xff] %vm1121_vm3, %v1746_v36 }
 0x5b2   : > { %v6309_v49 = vpop.f32.mrf.mxu0 }
 0x5b4   : > { %v1749_v52 = vpop.f32.mrf.mxu0 }
 0x5b6   : > { %v6310_v34 = vpop.f32.mrf.mxu0 }
 0x5b8   : > { %v1842_v54 = vpop.f32.mrf.mxu0 }
 0x5b9   : > { %1996 = vst.msk [vmem:[#allocation3 + $0x20] sm:$0xff] %vm1121_vm3, %v1842_v54 }
 0x5ba   : > { %v6321_v29 = vpop.f32.mrf.mxu0 }
 0x5bc   : > { %v1845_v48 = vpop.f32.mrf.mxu0 }
 0x5be   : > { %v6322_v58 = vpop.f32.mrf.mxu0 }
 0x5d8   : > { %v1794_v46 = vpop.f32.mrf.mxu1 }
 0x5d9   : > { %1995 = vst.msk [vmem:[#allocation3 + $0x18] sm:$0xff] %vm1121_vm3, %v1794_v46 }
 0x5da   : > { %v6315_v60 = vpop.f32.mrf.mxu1 }
 0x5dc   : > { %v1797_v28 = vpop.f32.mrf.mxu1 }
 0x5de   : > { %v6316_v53 = vpop.f32.mrf.mxu1 }
 0x5e0   : > { %v1890_v55 = vpop.f32.mrf.mxu1 }
 0x5e1   : > { %1997 = vst.msk [vmem:[#allocation3 + $0x28] sm:$0xff] %vm1121_vm3, %v1890_v55  ;;  %v1938_v62 = vpop.f32.mrf.mxu0 }
 0x5e2   : > { %1998 = vst.msk [vmem:[#allocation3 + $0x30] sm:$0xff] %vm1121_vm3, %v1938_v62  ;;  %v6327_v0 = vpop.f32.mrf.mxu1 }
 0x5e3   : > { %v6333_v47 = vpop.f32.mrf.mxu0 }
 0x5e4   : > { %v1893_v1 = vpop.f32.mrf.mxu1 }
 0x5e5   : > { %v1941_v4 = vpop.f32.mrf.mxu0 }
 0x5e6   : > { %v6328_v5 = vpop.f32.mrf.mxu1 }
 0x5e7   : > { %v6334_v9 = vpop.f32.mrf.mxu0 }
 0x5e9   : > { %v2045_v10 = vpop.f32.mrf.mxu0 }
 0x5ea   : > { %v7834_v13 = vadd.f32 %v2045_v10, %v7627_v3 }
 0x5eb   : > { %v6345_v14 = vpop.f32.mrf.mxu0 }
 0x5ec   : > { %v2408_v16 = vsel %vm1121_vm3, %v7834_v13, -inf }
 0x5ed   : > { %2409 = vmax.xlane.f32.xlu0 %v2408_v16  ;;  %v2048_v17 = vpop.f32.mrf.mxu0 }
 0x5ef   : > { %v6346_v19 = vpop.f32.mrf.mxu0 }
 0x5f1   : > { %v2147_v22 = vpop.f32.mrf.mxu0 }
 0x5f2   : > { %v2148_v23 = vadd.f32 %v2147_v22, %v7627_v3 }
 0x5f3   : > { %v6357_v57 = vpop.f32.mrf.mxu0 }
 0x5f4   : > { %v2414_v26 = vsel %vm1121_vm3, %v2148_v23, -inf }
 0x5f5   : > { %2415 = vmax.xlane.f32.xlu0 %v2414_v26  ;;  %v2150_v27 = vpop.f32.mrf.mxu0 }
 0x5f7   : > { %v6358_v61 = vpop.f32.mrf.mxu0 }
 0x5f9   : > { %v2249_v7 = vpop.f32.mrf.mxu0 }
 0x5fa   : > { %v2250_v58 = vadd.f32 %v2249_v7, %v7627_v3 }
 0x5fb   : > { %v6369_v2 = vpop.f32.mrf.mxu0 }
 0x5fc   : > { %v2420_v55 = vsel %vm1121_vm3, %v2250_v58, -inf }
 0x5fd   : > { %v2252_v8 = vpop.f32.mrf.mxu0 }
 0x5ff   : > { %v6370_v12 = vpop.f32.mrf.mxu0 }
 0x601   : > { %v2351_v33 = vpop.f32.mrf.mxu0 }
 0x602   : > { %v7847_v53 = vadd.f32 %v2351_v33, %v7627_v3 }
 0x603   : > { %v6381_v31 = vpop.f32.mrf.mxu0 }
 0x604   : > { %v2426_v4 = vsel %vm1121_vm3, %v7847_v53, -inf  ;;  %v2601_v31 = vpop.permute.xlu1 %2600 }
 0x605   : > { %v2354_v35 = vpop.f32.mrf.mxu0 }
 0x607   : > { %v6382_v38 = vpop.f32.mrf.mxu0 }
 0x611   : > { %v1986_v39 = vpop.f32.mrf.mxu1 }
 0x612   : > { %1999 = vst.msk [vmem:[#allocation3 + $0x38] sm:$0xff] %vm1121_vm3, %v1986_v39 }
 0x613   : > { %v6339_v30 = vpop.f32.mrf.mxu1 }
 0x615   : > { %v1989_v40 = vpop.f32.mrf.mxu1 }
 0x617   : > { %v6340_v43 = vpop.f32.mrf.mxu1 }
 0x619   : > { %v2096_v44 = vpop.f32.mrf.mxu1 }
 0x61a   : > { %v2097_v45 = vadd.f32 %v2096_v44, %v7627_v3 }
 0x61b   : > { %v6351_v36 = vpop.f32.mrf.mxu1 }
 0x61c   : > { %v2411_v49 = vsel %vm1121_vm3, %v2097_v45, -inf }
 0x61d   : > { %2412 = vmax.xlane.f32.xlu1 %v2411_v49  ;;  %v2099_v52 = vpop.f32.mrf.mxu1 }
 0x61f   : > { %v6352_v34 = vpop.f32.mrf.mxu1 }
 0x621   : > { %v2198_v54 = vpop.f32.mrf.mxu1 }
 0x622   : > { %v2199_v29 = vadd.f32 %v2198_v54, %v7627_v3 }
 0x623   : > { %v6363_v48 = vpop.f32.mrf.mxu1 }
 0x624   : > { %v2417_v46 = vsel %vm1121_vm3, %v2199_v29, -inf }
 0x625   : > { %v2201_v60 = vpop.f32.mrf.mxu1  ;;  %2418 = vmax.xlane.f32.xlu0 %v2417_v46 }
 0x627   : > { %v6364_v28 = vpop.f32.mrf.mxu1 }
 0x629   : > { %v2300_v62 = vpop.f32.mrf.mxu1  ;;  %2421 = vmax.xlane.f32.xlu0 %v2420_v55 }
 0x62a   : > { %v2301_v0 = vadd.f32 %v2300_v62, %v7627_v3 }
 0x62b   : > { %v6375_v47 = vpop.f32.mrf.mxu1 }
 0x62c   : > { %v2423_v1 = vsel %vm1121_vm3, %v2301_v0, -inf }
 0x62d   : > { %2424 = vmax.xlane.f32.xlu1 %v2423_v1  ;;  %v2303_v5 = vpop.f32.mrf.mxu1  ;;  %2427 = vmax.xlane.f32.xlu0 %v2426_v4 }
 0x62f   : > { %v6376_v9 = vpop.f32.mrf.mxu1 }
 0x631   : > { %v2402_v10 = vpop.f32.mrf.mxu1 }
 0x632   : > { %v7859_v19 = vadd.f32 %v2402_v10, %v7627_v3 }
 0x633   : > { %v6387_v14 = vpop.f32.mrf.mxu1 }
 0x634   : > { %v2429_v22 = vsel %vm1121_vm3, %v7859_v19, -inf }
 0x635   : > { %v2405_v16 = vpop.f32.mrf.mxu1 }
 0x637   : > { %v6388_v17 = vpop.f32.mrf.mxu1 }
 0x63e   : > { %2744 = vrot.lane.b32.xlu1 %v7538_v24, %s7142_s15 }
 0x643   : > { %2696 = vrot.lane.b32.xlu0 %v7524_v18, %s7142_s15 }
 0x662   : > { %2430 = vmax.xlane.f32.xlu1 %v2429_v22 }
 0x676   : > { %v2410_v57 = vpop.xlane.xlu0 %2409 }
 0x677   : > { %v2432_v26 = vsub.f32 %v7834_v13, %v2410_v57  ;;  %v7872_v13 = vpop.permute.xlu1 %2648  ;;  %v2606_v57 = vsel %vm1612_vm4, %v2601_v31, 0 }
 0x679   : > { %v2440_v27 = vmul.f32 1.442695, %v2432_v26 }
 0x67b   : > { %6841 = vpow2.f32 %v2440_v27 }
 0x67e   : > { %v2416_v61 = vpop.xlane.xlu0 %2415 }
 0x67f   : > { %v2434_v7 = vsub.f32 %v2148_v23, %v2416_v61 }
 0x681   : > { %v2444_v2 = vmul.f32 1.442695, %v2434_v7 }
 0x683   : > { %6843 = vpow2.f32 %v2444_v2 }
 0x688   : > { %v7864_v8 = vpop.eup %6841 }
 0x689   : > { %v2456_v12 = vsel %vm1121_vm3, %v7864_v8, 0.0 }
 0x68a   : > { %2457 = vadd.xlane.f32.xlu0 %v2456_v12 }
 0x690   : > { %v7868_v3 = vpop.eup %6843 }
 0x691   : > { %v2462_v33 = vsel %vm1121_vm3, %v7868_v3, 0.0 }
 0x692   : > { %2463 = vadd.xlane.f32.xlu0 %v2462_v33 }
 0x6a6   : > { %v2413_v35 = vpop.xlane.xlu1 %2412 }
 0x6a7   : > { %v2433_v38 = vsub.f32 %v2097_v45, %v2413_v35 }
 0x6a9   : > { %v2442_v23 = vmul.f32 1.442695, %v2433_v38 }
 0x6ab   : > { %6845 = vpow2.f32 %v2442_v23  ;;  %v2654_v23 = vsel %vm1612_vm4, %v7872_v13, 0 }
 0x6ae   : > { %v2419_v39 = vpop.xlane.xlu0 %2418 }
 0x6af   : > { %v2435_v30 = vsub.f32 %v2199_v29, %v2419_v39 }
 0x6b1   : > { %v2446_v40 = vmul.f32 1.442695, %v2435_v30 }
 0x6b2   : > { %v2422_v43 = vpop.xlane.xlu0 %2421 }
 0x6b3   : > { %6847 = vpow2.f32 %v2446_v40  ;;  %v2436_v44 = vsub.f32 %v2250_v58, %v2422_v43 }
 0x6b5   : > { %v2448_v36 = vmul.f32 1.442695, %v2436_v44 }
 0x6b6   : > { %v2425_v48 = vpop.xlane.xlu1 %2424  ;;  %v2428_v46 = vpop.xlane.xlu0 %2427 }
 0x6b7   : > { %6849 = vpow2.f32 %v2448_v36  ;;  %v2437_v58 = vsub.f32 %v2301_v0, %v2425_v48  ;;  %v2438_v28 = vsub.f32 %v7847_v53, %v2428_v46 }
 0x6b8   : > { %v7874_v49 = vpop.eup %6845 }
 0x6b9   : > { %v2459_v52 = vsel %vm1121_vm3, %v7874_v49, 0.0  ;;  %v2450_v60 = vmul.f32 1.442695, %v2437_v58  ;;  %v2452_v55 = vmul.f32 1.442695, %v2438_v28 }
 0x6ba   : > { %2460 = vadd.xlane.f32.xlu1 %v2459_v52  ;;  %v7901_v53 = vpop.permute.xlu1 %2744  ;;  %v2697_v0 = vpop.permute.xlu0 %2696 }
 0x6bb   : > { %6851 = vpow2.f32 %v2450_v60  ;;  %v2750_v13 = vsel %vm1612_vm4, %v7901_v53, 0 }
 0x6bc   : > { %6853 = vpow2.f32 %v2452_v55 }
 0x6c0   : > { %v7878_v34 = vpop.eup %6847 }
 0x6c1   : > { %v2465_v45 = vsel %vm1121_vm3, %v7878_v34, 0.0 }
 0x6c2   : > { %2466 = vadd.xlane.f32.xlu1 %v2465_v45 }
 0x6c4   : > { %v7882_v54 = vpop.eup %6849 }
 0x6c5   : > { %v2468_v29 = vsel %vm1121_vm3, %v7882_v54, 0.0 }
 0x6c6   : > { %2469 = vadd.xlane.f32.xlu0 %v2468_v29 }
 0x6c8   : > { %v7891_v62 = vpop.eup %6851 }
 0x6c9   : > { %v2471_v47 = vsel %vm1121_vm3, %v7891_v62, 0.0  ;;  %v7895_v1 = vpop.eup %6853 }
 0x6ca   : > { %v2474_v4 = vsel %vm1121_vm3, %v7895_v1, 0.0 }
 0x6d3   : > { %2840 = vrot.lane.b32.xlu1 %v7545_v25, %s7142_s15 }
 0x6dc   : > { %2792 = vrot.lane.b32.xlu0 %v7532_v21, %s7142_s15  ;;  %s8754_s15 = scalar_lea.vmem %s8700_s8, %s7354_s12 }
 0x6eb   : > { %v2431_v5 = vpop.xlane.xlu1 %2430 }
 0x6ec   : > { %v2439_v9 = vsub.f32 %v7859_v19, %v2431_v5 }
 0x6ee   : > { %v2454_v14 = vmul.f32 1.442695, %v2439_v9 }
 0x6f7   : > { %2472 = vadd.xlane.f32.xlu1 %v2471_v47 }
 0x6fb   : > { %2475 = vadd.xlane.f32.xlu0 %v2474_v4 }
 0x708   : > { %2981 = vrot.lane.b32.xlu1 %v7517_v11, %s7143_s7 }
 0x711   : > { %2931 = vrot.lane.b32.xlu0 %v7514_v6, %s7143_s7 }
 0x713   : > { %v2458_v10 = vpop.xlane.xlu0 %2457 }
 0x714   : > { %6855 = vrcp.f32 %v2458_v10 }
 0x715   : > { %2929 = vrot.lane.b32.xlu0 %v7556_v32, %s7144_s28  ;;  %6857 = vpow2.f32 %v2454_v14 }
 0x719   : > { %3031 = vrot.lane.b32.xlu0 %v7520_v15, %s7143_s7 }
 0x71b   : > { %v2464_v16 = vpop.xlane.xlu0 %2463 }
 0x71c   : > { %6859 = vrcp.f32 %v2464_v16 }
 0x71d   : > { %3029 = vrot.lane.b32.xlu0 %v7566_v41, %s7144_s28 }
 0x721   : > { %v6856_v17 = vpop.eup %6855  ;;  %3131 = vrot.lane.b32.xlu0 %v7524_v18, %s7143_s7 }
 0x722   : > { %v2488_v19 = vmul.f32 %v6856_v17, %v7864_v8  ;;  %v7921_v26 = vpop.eup %6857  ;;  %v2702_v8 = vsel %vm1612_vm4, %v2697_v0, 0 }
 0x723   : > { %v2477_v7 = vsel %vm1121_vm3, %v7921_v26, 0.0 }
 0x724   : > { %v2496_v22 = vpack.c.bf16 %v2488_v19, %v2488_v19 }
 0x725   : > { %3129 = vrot.lane.b32.xlu0 %v7584_v51, %s7144_s28 }
 0x726   : > { %6392 = vmatmul.mubr.msk.bf16.vlgmr.msra.gmra.mxu0 %vm1121_vm3, %v2496_v22 }
 0x727   : > { %6402 = vmatpush3.bf16.msra.mxu0 %v2606_v57  ;;  %6403 = vmatprep.mubr.msk.bf16.mxu0 %vm7137_vm2, %v7136_v56 }
 0x728   : > { %6413 = vmatprep.subr.bf16.mxu0 %v7136_v56 }
 0x729   : > { %v6860_v27 = vpop.eup %6859  ;;  %3231 = vrot.lane.b32.xlu0 %v7532_v21, %s7143_s7 }
 0x72a   : > { %v2490_v61 = vmul.f32 %v6860_v27, %v7868_v3 }
 0x72c   : > { %2478 = vadd.xlane.f32.xlu1 %v2477_v7  ;;  %v2498_v2 = vpack.c.bf16 %v2490_v61, %v2490_v61 }
 0x72d   : > { %3229 = vrot.lane.b32.xlu0 %v7599_v59, %s7144_s28 }
 0x72e   : > { %6404 = vmatmul.mubr.msk.bf16.vlgmr.msra.gmra.mxu0 %vm1121_vm3, %v2498_v2 }
 0x72f   : > { %6414 = vmatpush3.bf16.msra.mxu0 %v2702_v8  ;;  %6415 = vmatprep.mubr.msk.bf16.mxu0 %vm7137_vm2, %v7136_v56 }
 0x730   : > { %6425 = vmatprep.subr.bf16.mxu0 %v7136_v56 }
 0x731   : > { %3425 = vrot.lane.b32.xlu0 %v7514_v6, %s7145_s20 }
 0x73d   : > { %2979 = vrot.lane.b32.xlu1 %v7568_v42, %s7144_s28 }
 0x741   : > { %3081 = vrot.lane.b32.xlu1 %v7528_v20, %s7143_s7 }
 0x743   : > { %v2461_v12 = vpop.xlane.xlu1 %2460 }
 0x744   : > { %6861 = vrcp.f32 %v2461_v12 }
 0x745   : > { %3079 = vrot.lane.b32.xlu1 %v7582_v50, %s7144_s28 }
 0x749   : > { %3181 = vrot.lane.b32.xlu1 %v7538_v24, %s7143_s7 }
 0x74b   : > { %v2467_v3 = vpop.xlane.xlu1 %2466 }
 0x74c   : > { %6863 = vrcp.f32 %v2467_v3 }
 0x74d   : > { %3179 = vrot.lane.b32.xlu1 %v7601_v37, %s7144_s28 }
 0x74f   : > { %v2470_v33 = vpop.xlane.xlu0 %2469 }
 0x750   : > { %6865 = vrcp.f32 %v2470_v33 }
 0x751   : > { %v6862_v31 = vpop.eup %6861  ;;  %3281 = vrot.lane.b32.xlu1 %v7545_v25, %s7143_s7 }
 0x752   : > { %v2489_v35 = vmul.f32 %v6862_v31, %v7874_v49 }
 0x753   : > { %v2793_v36 = vpop.permute.xlu0 %2792 }
 0x754   : > { %v2497_v38 = vpack.c.bf16 %v2489_v35, %v2489_v35  ;;  %v2798_v52 = vsel %vm1612_vm4, %v2793_v36, 0 }
 0x755   : > { %3279 = vrot.lane.b32.xlu1 %v7616_v63, %s7144_s28 }
 0x756   : > { %6398 = vmatmul.mubr.msk.bf16.vlgmr.msra.gmra.mxu1 %vm1121_vm3, %v2497_v38 }
 0x757   : > { %6408 = vmatpush3.bf16.msra.mxu1 %v2654_v23  ;;  %6409 = vmatprep.mubr.msk.bf16.mxu1 %vm7137_vm2, %v7136_v56 }
 0x758   : > { %6419 = vmatprep.subr.bf16.mxu1 %v7136_v56 }
 0x759   : > { %v6864_v39 = vpop.eup %6863  ;;  %3473 = vrot.lane.b32.xlu1 %v7517_v11, %s7145_s20 }
 0x75a   : > { %v2491_v30 = vmul.f32 %v6864_v39, %v7878_v34  ;;  %v2841_v34 = vpop.permute.xlu1 %2840 }
 0x75b   : > { %v2846_v47 = vsel %vm1612_vm4, %v2841_v34, 0 }
 0x75c   : > { %v2499_v40 = vpack.c.bf16 %v2491_v30, %v2491_v30 }
 0x75d   : > { %v6866_v43 = vpop.eup %6865  ;;  %3521 = vrot.lane.b32.xlu1 %v7520_v15, %s7145_s20 }
 0x75e   : > { %6410 = vmatmul.mubr.msk.bf16.vlgmr.msra.gmra.mxu1 %vm1121_vm3, %v2499_v40  ;;  %v2492_v44 = vmul.f32 %v6866_v43, %v7882_v54 }
 0x75f   : > { %6420 = vmatpush3.bf16.msra.mxu1 %v2750_v13  ;;  %6421 = vmatprep.mubr.msk.bf16.mxu1 %vm7137_vm2, %v7136_v56 }
 0x760   : > { %v2500_v49 = vpack.c.bf16 %v2492_v44, %v2492_v44  ;;  %6431 = vmatprep.subr.bf16.mxu1 %v7136_v56 }
 0x761   : > { %3569 = vrot.lane.b32.xlu1 %v7528_v20, %s7145_s20 }
 0x762   : > { %6416 = vmatmul.mubr.msk.bf16.vlgmr.msra.gmra.mxu0 %vm1121_vm3, %v2500_v49 }
 0x763   : > { %6426 = vmatpush3.bf16.msra.mxu0 %v2798_v52  ;;  %6427 = vmatprep.mubr.msk.bf16.mxu0 %vm7137_vm2, %v7136_v56 }
 0x764   : > { %6437 = vmatprep.subr.bf16.mxu0 %v7136_v56 }
 0x780   : > { %v2473_v45 = vpop.xlane.xlu1 %2472 }
 0x781   : > { %6867 = vrcp.f32 %v2473_v45 }
 0x784   : > { %v2476_v54 = vpop.xlane.xlu0 %2475  ;;  %v2982_v19 = vpop.permute.xlu1 %2981 }
 0x785   : > { %6869 = vrcp.f32 %v2476_v54  ;;  %v2987_v33 = vsel %vm1121_vm3, %v2982_v19, 0 }
 0x788   : > { %v2932_v29 = vpop.permute.xlu0 %2931 }
 0x789   : > { %v2937_v5 = vsel %vm1121_vm3, %v2932_v29, 0 }
 0x78c   : > { %v2930_v48 = vpop.permute.xlu0 %2929 }
 0x78e   : > { %v6868_v58 = vpop.eup %6867 }
 0x78f   : > { %v2493_v46 = vmul.f32 %v6868_v58, %v7891_v62 }
 0x790   : > { %v3032_v60 = vpop.permute.xlu0 %3031 }
 0x791   : > { %v2501_v28 = vpack.c.bf16 %v2493_v46, %v2493_v46 }
 0x792   : > { %v6870_v55 = vpop.eup %6869 }
 0x793   : > { %6422 = vmatmul.mubr.msk.bf16.vlgmr.msra.gmra.mxu1 %vm1121_vm3, %v2501_v28  ;;  %v2494_v4 = vmul.f32 %v6870_v55, %v7895_v1  ;;  %v3037_v1 = vsel %vm1121_vm3, %v3032_v60, 0 }
 0x794   : > { %6432 = vmatpush3.bf16.msra.mxu1 %v2846_v47  ;;  %6433 = vmatprep.mubr.msk.bf16.mxu1 %vm7137_vm2, %v7136_v56  ;;  %v3030_v0 = vpop.permute.xlu0 %3029 }
 0x795   : > { %v2502_v53 = vpack.c.bf16 %v2494_v4, %v2494_v4  ;;  %6443 = vmatprep.subr.bf16.mxu1 %v7136_v56 }
 0x797   : > { %6428 = vmatmul.mubr.msk.bf16.vlgmr.msra.gmra.mxu0 %vm1121_vm3, %v2502_v53 }
 0x798   : > { %6438 = vmatpush3.bf16.xpose.msra.mxu0 %v2937_v5  ;;  %6439 = vmatprep.mubr.msk.bf16.mxu0 %vm7137_vm2, %v7136_v56  ;;  %v3132_v62 = vpop.permute.xlu0 %3131 }
 0x799   : > { %6449 = vmatprep.subr.bf16.mxu0 %v7136_v56  ;;  %v3137_v10 = vsel %vm1121_vm3, %v3132_v62, 0 }
 0x79c   : > { %v3130_v9 = vpop.permute.xlu0 %3129 }
 0x79f   : > { %6440 = vmatmul.mubr.msk.bf16.vlgmr.msra.gmra.mxu0 %vm1121_vm3, %v2930_v48 }
 0x7a0   : > { %6450 = vmatpush3.bf16.xpose.msra.mxu0 %v3037_v1  ;;  %6451 = vmatprep.mubr.msk.bf16.mxu0 %vm7137_vm2, %v7136_v56  ;;  %v3232_v14 = vpop.permute.xlu0 %3231 }
 0x7a1   : > { %6461 = vmatprep.subr.bf16.mxu0 %v7136_v56  ;;  %v3237_v17 = vsel %vm1121_vm3, %v3232_v14, 0 }
 0x7a4   : > { %v3230_v16 = vpop.permute.xlu0 %3229 }
 0x7a7   : > { %6452 = vmatmul.mubr.msk.bf16.vlgmr.msra.gmra.mxu0 %vm1121_vm3, %v3030_v0 }
 0x7a8   : > { %6462 = vmatpush3.bf16.xpose.msra.mxu0 %v3137_v10  ;;  %6463 = vmatprep.mubr.msk.bf16.mxu0 %vm7137_vm2, %v7136_v56  ;;  %v3426_v22 = vpop.permute.xlu0 %3425 }
 0x7a9   : > { %6473 = vmatprep.subr.bf16.mxu0 %v7136_v56  ;;  %v3431_v27 = vsel %vm1612_vm4, %v3426_v22, 0 }
 0x7af   : > { %6464 = vmatmul.mubr.msk.bf16.vlgmr.msra.gmra.mxu0 %vm1121_vm3, %v3130_v9 }
 0x7b0   : > { %6474 = vmatpush3.bf16.xpose.msra.mxu0 %v3237_v17  ;;  %6475 = vmatprep.mubr.msk.bf16.mxu0 %vm7137_vm2, %v7136_v56 }
 0x7b1   : > { %6485 = vmatprep.subr.bf16.mxu0 %v7136_v56 }
 0x7b5   : > { %v2479_v57 = vpop.xlane.xlu1 %2478 }
 0x7b6   : > { %6871 = vrcp.f32 %v2479_v57  ;;  %v8053_v57 = vld [vmem:[%s8753_s2] sm:$0xff] }
 0x7b7   : > { %6476 = vmatmul.mubr.msk.bf16.vlgmr.msra.gmra.mxu0 %vm1121_vm3, %v3230_v16 }
 0x7b8   : > { %6486 = vmatpush3.bf16.msra.mxu0 %v3431_v27  ;;  %6487 = vmatprep.mubr.msk.bf16.mxu0 %vm7137_vm2, %v7136_v56 }
 0x7b9   : > { %6497 = vmatprep.subr.bf16.mxu0 %v7136_v56  ;;  %v2980_v61 = vpop.permute.xlu1 %2979 }
 0x7bd   : > { %v3082_v7 = vpop.permute.xlu1 %3081 }
 0x7be   : > { %v3087_v35 = vsel %vm1121_vm3, %v3082_v7, 0 }
 0x7c1   : > { %v3080_v3 = vpop.permute.xlu1 %3079 }
 0x7c3   : > { %v6872_v2 = vpop.eup %6871 }
 0x7c4   : > { %v2495_v8 = vmul.f32 %v6872_v2, %v7921_v26 }
 0x7c5   : > { %v3182_v31 = vpop.permute.xlu1 %3181 }
 0x7c6   : > { %v2503_v12 = vpack.c.bf16 %v2495_v8, %v2495_v8  ;;  %v3187_v38 = vsel %vm1121_vm3, %v3182_v31, 0 }
 0x7c8   : > { %6434 = vmatmul.mubr.msk.bf16.vlgmr.msra.gmra.mxu1 %vm1121_vm3, %v2503_v12 }
 0x7c9   : > { %6444 = vmatpush3.bf16.xpose.msra.mxu1 %v2987_v33  ;;  %6445 = vmatprep.mubr.msk.bf16.mxu1 %vm7137_vm2, %v7136_v56  ;;  %v3180_v26 = vpop.permute.xlu1 %3179 }
 0x7ca   : > { %6455 = vmatprep.subr.bf16.mxu1 %v7136_v56 }
 0x7cd   : > { %v3282_v23 = vpop.permute.xlu1 %3281 }
 0x7ce   : > { %v3287_v30 = vsel %vm1121_vm3, %v3282_v23, 0 }
 0x7d0   : > { %6446 = vmatmul.mubr.msk.bf16.vlgmr.msra.gmra.mxu1 %vm1121_vm3, %v2980_v61 }
 0x7d1   : > { %6456 = vmatpush3.bf16.xpose.msra.mxu1 %v3087_v35  ;;  %6457 = vmatprep.mubr.msk.bf16.mxu1 %vm7137_vm2, %v7136_v56  ;;  %v3280_v39 = vpop.permute.xlu1 %3279 }
 0x7d2   : > { %6467 = vmatprep.subr.bf16.mxu1 %v7136_v56 }
 0x7d5   : > { %v3474_v40 = vpop.permute.xlu1 %3473 }
 0x7d6   : > { %v3479_v13 = vsel %vm1612_vm4, %v3474_v40, 0 }
 0x7d8   : > { %6458 = vmatmul.mubr.msk.bf16.vlgmr.msra.gmra.mxu1 %vm1121_vm3, %v3080_v3 }
 0x7d9   : > { %6468 = vmatpush3.bf16.xpose.msra.mxu1 %v3187_v38  ;;  %6469 = vmatprep.mubr.msk.bf16.mxu1 %vm7137_vm2, %v7136_v56 }
 0x7da   : > { %6479 = vmatprep.subr.bf16.mxu1 %v7136_v56 }
 0x7e0   : > { %6470 = vmatmul.mubr.msk.bf16.vlgmr.msra.gmra.mxu1 %vm1121_vm3, %v3180_v26 }
 0x7e1   : > { %6480 = vmatpush3.bf16.xpose.msra.mxu1 %v3287_v30  ;;  %6481 = vmatprep.mubr.msk.bf16.mxu1 %vm7137_vm2, %v7136_v56 }
 0x7e2   : > { %6491 = vmatprep.subr.bf16.mxu1 %v7136_v56 }
 0x7e6   : > { %v8031_v43 = vpop.f32.mrf.mxu0 }
 0x7e8   : > { %v6393_v44 = vpop.f32.mrf.mxu0  ;;  %6482 = vmatmul.mubr.msk.bf16.vlgmr.msra.gmra.mxu1 %vm1121_vm3, %v3280_v39 }
 0x7e9   : > { %6492 = vmatpush3.bf16.msra.mxu1 %v3479_v13  ;;  %6493 = vmatprep.mubr.msk.bf16.mxu1 %vm7137_vm2, %v7136_v56 }
 0x7ea   : > { %v2549_v36 = vpop.f32.mrf.mxu0  ;;  %6503 = vmatprep.subr.bf16.mxu1 %v7136_v56 }
 0x7ec   : > { %v6394_v49 = vpop.f32.mrf.mxu0 }
 0x7ee   : > { %v8038_v52 = vpop.f32.mrf.mxu0 }
 0x7f0   : > { %v6405_v34 = vpop.f32.mrf.mxu0 }
 0x7f2   : > { %v2645_v45 = vpop.f32.mrf.mxu0 }
 0x7f4   : > { %v6406_v54 = vpop.f32.mrf.mxu0 }
 0x816   : > { %v8040_v29 = vpop.f32.mrf.mxu1 }
 0x818   : > { %v6399_v48 = vpop.f32.mrf.mxu1 }
 0x81a   : > { %v2597_v58 = vpop.f32.mrf.mxu1 }
 0x81c   : > { %v6400_v46 = vpop.f32.mrf.mxu1 }
 0x81e   : > { %v8042_v60 = vpop.f32.mrf.mxu1 }
 0x820   : > { %v6411_v28 = vpop.f32.mrf.mxu1 }
 0x822   : > { %v2693_v55 = vpop.f32.mrf.mxu1  ;;  %v8044_v47 = vpop.f32.mrf.mxu0 }
 0x824   : > { %v6412_v4 = vpop.f32.mrf.mxu1  ;;  %v6417_v53 = vpop.f32.mrf.mxu0 }
 0x826   : > { %v2741_v0 = vpop.f32.mrf.mxu0 }
 0x828   : > { %v6418_v5 = vpop.f32.mrf.mxu0 }
 0x853   : > { %v8046_v62 = vpop.f32.mrf.mxu1 }
 0x855   : > { %v6423_v1 = vpop.f32.mrf.mxu1 }
 0x857   : > { %v2789_v9 = vpop.f32.mrf.mxu1  ;;  %v8048_v10 = vpop.f32.mrf.mxu0 }
 0x859   : > { %v6424_v14 = vpop.f32.mrf.mxu1  ;;  %v6429_v16 = vpop.f32.mrf.mxu0 }
 0x85b   : > { %v2837_v17 = vpop.f32.mrf.mxu0 }
 0x85d   : > { %v6430_v19 = vpop.f32.mrf.mxu0 }
 0x85f   : > { %v2973_v22 = vpop.f32.mrf.mxu0 }
 0x860   : > { %v8056_v27 = vadd.f32 %v8053_v57, %v2973_v22 }
 0x861   : > { %v6441_v61 = vpop.f32.mrf.mxu0 }
 0x862   : > { %v3329_v7 = vsel %vm1121_vm3, %v8056_v27, -inf }
 0x863   : > { %3330 = vmax.xlane.f32.xlu0 %v3329_v7  ;;  %v2976_v2 = vpop.f32.mrf.mxu0 }
 0x865   : > { %v6442_v8 = vpop.f32.mrf.mxu0 }
 0x867   : > { %v3073_v12 = vpop.f32.mrf.mxu0 }
 0x868   : > { %v3074_v3 = vadd.f32 %v8053_v57, %v3073_v12 }
 0x869   : > { %v6453_v33 = vpop.f32.mrf.mxu0 }
 0x86a   : > { %v3335_v31 = vsel %vm1121_vm3, %v3074_v3, -inf }
 0x86b   : > { %3336 = vmax.xlane.f32.xlu0 %v3335_v31  ;;  %v3076_v35 = vpop.f32.mrf.mxu0 }
 0x86d   : > { %v6454_v26 = vpop.f32.mrf.mxu0 }
 0x86f   : > { %v3173_v38 = vpop.f32.mrf.mxu0 }
 0x870   : > { %v3174_v1 = vadd.f32 %v8053_v57, %v3173_v38 }
 0x871   : > { %v6465_v23 = vpop.f32.mrf.mxu0 }
 0x872   : > { %v3341_v19 = vsel %vm1121_vm3, %v3174_v1, -inf }
 0x873   : > { %v3176_v39 = vpop.f32.mrf.mxu0 }
 0x875   : > { %v6466_v30 = vpop.f32.mrf.mxu0 }
 0x877   : > { %v3273_v40 = vpop.f32.mrf.mxu0 }
 0x878   : > { %v8070_v17 = vadd.f32 %v8053_v57, %v3273_v40 }
 0x879   : > { %v6477_v13 = vpop.f32.mrf.mxu0 }
 0x87a   : > { %v3347_v8 = vsel %vm1121_vm3, %v8070_v17, -inf }
 0x87b   : > { %v3276_v44 = vpop.f32.mrf.mxu0 }
 0x87d   : > { %v6478_v36 = vpop.f32.mrf.mxu0 }
 0x888   : > { %v8062_v49 = vpop.f32.mrf.mxu1 }
 0x88a   : > { %v6435_v34 = vpop.f32.mrf.mxu1 }
 0x88c   : > { %v2885_v45 = vpop.f32.mrf.mxu1 }
 0x88e   : > { %v6436_v54 = vpop.f32.mrf.mxu1 }
 0x890   : > { %v3023_v48 = vpop.f32.mrf.mxu1 }
 0x891   : > { %v3024_v58 = vadd.f32 %v8053_v57, %v3023_v48 }
 0x892   : > { %v6447_v46 = vpop.f32.mrf.mxu1 }
 0x893   : > { %v3332_v28 = vsel %vm1121_vm3, %v3024_v58, -inf }
 0x894   : > { %3333 = vmax.xlane.f32.xlu1 %v3332_v28  ;;  %v3026_v55 = vpop.f32.mrf.mxu1  ;;  %v3522_v28 = vpop.permute.xlu1 %3521 }
 0x896   : > { %v6448_v4 = vpop.f32.mrf.mxu1 }
 0x898   : > { %v3123_v53 = vpop.f32.mrf.mxu1 }
 0x899   : > { %v3124_v0 = vadd.f32 %v8053_v57, %v3123_v53 }
 0x89a   : > { %v6459_v5 = vpop.f32.mrf.mxu1 }
 0x89b   : > { %v3338_v9 = vsel %vm1121_vm3, %v3124_v0, -inf }
 0x89c   : > { %v3126_v14 = vpop.f32.mrf.mxu1  ;;  %3339 = vmax.xlane.f32.xlu0 %v3338_v9 }
 0x89e   : > { %v6460_v16 = vpop.f32.mrf.mxu1 }
 0x8a0   : > { %v3223_v22 = vpop.f32.mrf.mxu1  ;;  %3342 = vmax.xlane.f32.xlu0 %v3341_v19 }
 0x8a1   : > { %v3224_v61 = vadd.f32 %v8053_v57, %v3223_v22 }
 0x8a2   : > { %v6471_v7 = vpop.f32.mrf.mxu1 }
 0x8a3   : > { %v3344_v2 = vsel %vm1121_vm3, %v3224_v61, -inf }
 0x8a4   : > { %3345 = vmax.xlane.f32.xlu1 %v3344_v2  ;;  %v3226_v12 = vpop.f32.mrf.mxu1  ;;  %3348 = vmax.xlane.f32.xlu0 %v3347_v8 }
 0x8a6   : > { %v6472_v33 = vpop.f32.mrf.mxu1 }
 0x8a8   : > { %v3323_v31 = vpop.f32.mrf.mxu1 }
 0x8a9   : > { %v8082_v23 = vadd.f32 %v8053_v57, %v3323_v31 }
 0x8aa   : > { %v6483_v35 = vpop.f32.mrf.mxu1 }
 0x8ab   : > { %v3350_v39 = vsel %vm1121_vm3, %v8082_v23, -inf }
 0x8ac   : > { %v3326_v26 = vpop.f32.mrf.mxu1 }
 0x8ae   : > { %v6484_v38 = vpop.f32.mrf.mxu1 }
 0x8b5   : > { %3665 = vrot.lane.b32.xlu1 %v7538_v24, %s7145_s20 }
 0x8ba   : > { %3617 = vrot.lane.b32.xlu0 %v7524_v18, %s7145_s20 }
 0x8d9   : > { %3351 = vmax.xlane.f32.xlu1 %v3350_v39 }
 0x8ec   : > { %v3331_v30 = vpop.xlane.xlu0 %3330 }
 0x8ed   : > { %v3353_v40 = vsub.f32 %v8056_v27, %v3331_v30  ;;  %v8095_v27 = vpop.permute.xlu1 %3569 }
 0x8ef   : > { %v3361_v13 = vmul.f32 1.442695, %v3353_v40 }
 0x8f1   : > { %6873 = vpow2.f32 %v3361_v13 }
 0x8f4   : > { %v3337_v44 = vpop.xlane.xlu0 %3336 }
 0x8f5   : > { %v3355_v36 = vsub.f32 %v3074_v3, %v3337_v44 }
 0x8f7   : > { %v3365_v34 = vmul.f32 1.442695, %v3355_v36 }
 0x8f9   : > { %6875 = vpow2.f32 %v3365_v34 }
 0x8fe   : > { %v8087_v45 = vpop.eup %6873 }
 0x8ff   : > { %v3377_v54 = vsel %vm1121_vm3, %v8087_v45, 0.0 }
 0x900   : > { %3378 = vadd.xlane.f32.xlu0 %v3377_v54 }
 0x906   : > { %v8091_v48 = vpop.eup %6875 }
 0x907   : > { %v3383_v46 = vsel %vm1121_vm3, %v8091_v48, 0.0 }
 0x908   : > { %3384 = vadd.xlane.f32.xlu0 %v3383_v46 }
 0x91d   : > { %v3334_v55 = vpop.xlane.xlu1 %3333 }
 0x91e   : > { %v3354_v4 = vsub.f32 %v3024_v58, %v3334_v55 }
 0x920   : > { %v3363_v3 = vmul.f32 1.442695, %v3354_v4  ;;  %v3527_v4 = vsel %vm1612_vm4, %v3522_v28, 0 }
 0x922   : > { %6877 = vpow2.f32 %v3363_v3 }
 0x925   : > { %v3340_v53 = vpop.xlane.xlu0 %3339 }
 0x926   : > { %v3356_v5 = vsub.f32 %v3124_v0, %v3340_v53 }
 0x928   : > { %v3367_v9 = vmul.f32 1.442695, %v3356_v5 }
 0x929   : > { %v3343_v14 = vpop.xlane.xlu0 %3342 }
 0x92a   : > { %6879 = vpow2.f32 %v3367_v9  ;;  %v3357_v16 = vsub.f32 %v3174_v1, %v3343_v14 }
 0x92c   : > { %v3369_v19 = vmul.f32 1.442695, %v3357_v16 }
 0x92d   : > { %v3346_v1 = vpop.xlane.xlu1 %3345  ;;  %v3349_v33 = vpop.xlane.xlu0 %3348 }
 0x92e   : > { %6881 = vpow2.f32 %v3369_v19  ;;  %v3358_v12 = vsub.f32 %v3224_v61, %v3346_v1  ;;  %v3359_v35 = vsub.f32 %v8070_v17, %v3349_v33 }
 0x92f   : > { %v8097_v22 = vpop.eup %6877 }
 0x930   : > { %v3380_v7 = vsel %vm1121_vm3, %v8097_v22, 0.0  ;;  %v3371_v31 = vmul.f32 1.442695, %v3358_v12  ;;  %v3373_v26 = vmul.f32 1.442695, %v3359_v35 }
 0x931   : > { %3381 = vadd.xlane.f32.xlu1 %v3380_v7  ;;  %v8124_v17 = vpop.permute.xlu1 %3665  ;;  %v3618_v61 = vpop.permute.xlu0 %3617 }
 0x932   : > { %6883 = vpow2.f32 %v3371_v31  ;;  %v3623_v3 = vsel %vm1612_vm4, %v3618_v61, 0 }
 0x933   : > { %6885 = vpow2.f32 %v3373_v26 }
 0x937   : > { %v8101_v2 = vpop.eup %6879 }
 0x938   : > { %v3386_v58 = vsel %vm1121_vm3, %v8101_v2, 0.0 }
 0x939   : > { %3387 = vadd.xlane.f32.xlu1 %v3386_v58 }
 0x93b   : > { %v8105_v8 = vpop.eup %6881 }
 0x93c   : > { %v3389_v0 = vsel %vm1121_vm3, %v8105_v8, 0.0 }
 0x93d   : > { %3390 = vadd.xlane.f32.xlu0 %v3389_v0 }
 0x93f   : > { %v8114_v38 = vpop.eup %6883 }
 0x940   : > { %v3392_v39 = vsel %vm1121_vm3, %v8114_v38, 0.0  ;;  %v8118_v30 = vpop.eup %6885 }
 0x941   : > { %v3395_v40 = vsel %vm1121_vm3, %v8118_v30, 0.0 }
 0x94a   : > { %3761 = vrot.lane.b32.xlu1 %v7545_v25, %s7145_s20 }
 0x953   : > { %3713 = vrot.lane.b32.xlu0 %v7532_v21, %s7145_s20 }
 0x962   : > { %v3352_v13 = vpop.xlane.xlu1 %3351 }
 0x963   : > { %v3360_v44 = vsub.f32 %v8082_v23, %v3352_v13 }
 0x965   : > { %v3375_v34 = vmul.f32 1.442695, %v3360_v44 }
 0x96e   : > { %3393 = vadd.xlane.f32.xlu1 %v3392_v39 }
 0x972   : > { %3396 = vadd.xlane.f32.xlu0 %v3395_v40 }
 0x97f   : > { %3902 = vrot.lane.b32.xlu1 %v7517_v11, %s7146_s17 }
 0x988   : > { %3852 = vrot.lane.b32.xlu0 %v7514_v6, %s7146_s17 }
 0x989   : > { %v3379_v36 = vpop.xlane.xlu0 %3378 }
 0x98a   : > { %6887 = vrcp.f32 %v3379_v36 }
 0x98b   : > { %6889 = vpow2.f32 %v3375_v34 }
 0x98c   : > { %3850 = vrot.lane.b32.xlu0 %v7556_v32, %s7147_s0 }
 0x990   : > { %3952 = vrot.lane.b32.xlu0 %v7520_v15, %s7146_s17 }
 0x991   : > { %v3385_v54 = vpop.xlane.xlu0 %3384 }
 0x992   : > { %6891 = vrcp.f32 %v3385_v54 }
 0x994   : > { %3950 = vrot.lane.b32.xlu0 %v7566_v41, %s7147_s0 }
 0x997   : > { %v6888_v46 = vpop.eup %6887 }
 0x998   : > { %4052 = vrot.lane.b32.xlu0 %v7524_v18, %s7146_s17  ;;  %v3409_v23 = vmul.f32 %v6888_v46, %v8087_v45  ;;  %v8144_v32 = vpop.eup %6889 }
 0x999   : > { %v3398_v28 = vsel %vm1121_vm3, %v8144_v32, 0.0 }
 0x99a   : > { %v3417_v55 = vpack.c.bf16 %v3409_v23, %v3409_v23 }
 0x99c   : > { %4050 = vrot.lane.b32.xlu0 %v7584_v51, %s7147_s0  ;;  %6488 = vmatmul.mubr.msk.bf16.vlgmr.msra.gmra.mxu0 %vm1121_vm3, %v3417_v55 }
 0x99d   : > { %6498 = vmatpush3.bf16.msra.mxu0 %v3527_v4  ;;  %6499 = vmatprep.mubr.msk.bf16.mxu0 %vm7137_vm2, %v7136_v56 }
 0x99e   : > { %6509 = vmatprep.subr.bf16.mxu0 %v7136_v56 }
 0x99f   : > { %v6892_v41 = vpop.eup %6891 }
 0x9a0   : > { %4152 = vrot.lane.b32.xlu0 %v7532_v21, %s7146_s17  ;;  %v3411_v45 = vmul.f32 %v6892_v41, %v8091_v48 }
 0x9a2   : > { %v3419_v51 = vpack.c.bf16 %v3411_v45, %v3411_v45 }
 0x9a3   : > { %3399 = vadd.xlane.f32.xlu1 %v3398_v28 }
 0x9a4   : > { %4150 = vrot.lane.b32.xlu0 %v7599_v59, %s7147_s0  ;;  %6500 = vmatmul.mubr.msk.bf16.vlgmr.msra.gmra.mxu0 %vm1121_vm3, %v3419_v51 }
 0x9a5   : > { %6510 = vmatpush3.bf16.msra.mxu0 %v3623_v3  ;;  %6511 = vmatprep.mubr.msk.bf16.mxu0 %vm7137_vm2, %v7136_v56 }
 0x9a6   : > { %6521 = vmatprep.subr.bf16.mxu0 %v7136_v56 }
 0x9b4   : > { %3900 = vrot.lane.b32.xlu1 %v7568_v42, %s7147_s0 }
 0x9b8   : > { %4002 = vrot.lane.b32.xlu1 %v7528_v20, %s7146_s17 }
 0x9ba   : > { %v3382_v48 = vpop.xlane.xlu1 %3381 }
 0x9bb   : > { %6893 = vrcp.f32 %v3382_v48 }
 0x9bc   : > { %4000 = vrot.lane.b32.xlu1 %v7582_v50, %s7147_s0  ;;  %v3575_v50 = vsel %vm1612_vm4, %v8095_v27, 0 }
 0x9c0   : > { %4102 = vrot.lane.b32.xlu1 %v7538_v24, %s7146_s17 }
 0x9c2   : > { %v3388_v59 = vpop.xlane.xlu1 %3387 }
 0x9c3   : > { %6895 = vrcp.f32 %v3388_v59 }
 0x9c4   : > { %4100 = vrot.lane.b32.xlu1 %v7601_v37, %s7147_s0 }
 0x9c6   : > { %v3391_v53 = vpop.xlane.xlu0 %3390 }
 0x9c7   : > { %6897 = vrcp.f32 %v3391_v53 }
 0x9c8   : > { %v6894_v5 = vpop.eup %6893  ;;  %4202 = vrot.lane.b32.xlu1 %v7545_v25, %s7146_s17 }
 0x9c9   : > { %v3410_v42 = vmul.f32 %v6894_v5, %v8097_v22  ;;  %v3671_v22 = vsel %vm1612_vm4, %v8124_v17, 0 }
 0x9ca   : > { %v3714_v27 = vpop.permute.xlu0 %3713 }
 0x9cb   : > { %v3418_v9 = vpack.c.bf16 %v3410_v42, %v3410_v42  ;;  %v3719_v58 = vsel %vm1612_vm4, %v3714_v27, 0 }
 0x9cc   : > { %4200 = vrot.lane.b32.xlu1 %v7616_v63, %s7147_s0 }
 0x9cd   : > { %6494 = vmatmul.mubr.msk.bf16.vlgmr.msra.gmra.mxu1 %vm1121_vm3, %v3418_v9 }
 0x9ce   : > { %6504 = vmatpush3.bf16.msra.mxu1 %v3575_v50  ;;  %6505 = vmatprep.mubr.msk.bf16.mxu1 %vm7137_vm2, %v7136_v56 }
 0x9cf   : > { %6515 = vmatprep.subr.bf16.mxu1 %v7136_v56 }
 0x9d0   : > { %v6896_v37 = vpop.eup %6895 }
 0x9d1   : > { %v3412_v14 = vmul.f32 %v6896_v37, %v8101_v2  ;;  %v3762_v2 = vpop.permute.xlu1 %3761 }
 0x9d2   : > { %v3767_v39 = vsel %vm1612_vm4, %v3762_v2, 0 }
 0x9d3   : > { %v3420_v16 = vpack.c.bf16 %v3412_v14, %v3412_v14 }
 0x9d4   : > { %v6898_v19 = vpop.eup %6897 }
 0x9d5   : > { %6506 = vmatmul.mubr.msk.bf16.vlgmr.msra.gmra.mxu1 %vm1121_vm3, %v3420_v16  ;;  %v3413_v63 = vmul.f32 %v6898_v19, %v8105_v8 }
 0x9d6   : > { %6516 = vmatpush3.bf16.msra.mxu1 %v3671_v22  ;;  %6517 = vmatprep.mubr.msk.bf16.mxu1 %vm7137_vm2, %v7136_v56 }
 0x9d7   : > { %v3421_v7 = vpack.c.bf16 %v3413_v63, %v3413_v63  ;;  %6527 = vmatprep.subr.bf16.mxu1 %v7136_v56 }
 0x9d9   : > { %6512 = vmatmul.mubr.msk.bf16.vlgmr.msra.gmra.mxu0 %vm1121_vm3, %v3421_v7 }
 0x9da   : > { %6522 = vmatpush3.bf16.msra.mxu0 %v3719_v58  ;;  %6523 = vmatprep.mubr.msk.bf16.mxu0 %vm7137_vm2, %v7136_v56 }
 0x9db   : > { %6533 = vmatprep.subr.bf16.mxu0 %v7136_v56 }
 0x9f7   : > { %v3394_v8 = vpop.xlane.xlu1 %3393 }
 0x9f8   : > { %6899 = vrcp.f32 %v3394_v8 }
 0x9fb   : > { %v3397_v0 = vpop.xlane.xlu0 %3396  ;;  %v3903_v23 = vpop.permute.xlu1 %3902 }
 0x9fc   : > { %6901 = vrcp.f32 %v3397_v0  ;;  %v3908_v48 = vsel %vm1121_vm3, %v3903_v23, 0 }
 0x9ff   : > { %v3853_v1 = vpop.permute.xlu0 %3852 }
 0xa00   : > { %v3858_v13 = vsel %vm1121_vm3, %v3853_v1, 0 }
 0xa03   : > { %v3851_v33 = vpop.permute.xlu0 %3850 }
 0xa05   : > { %v6900_v12 = vpop.eup %6899 }
 0xa06   : > { %v3414_v31 = vmul.f32 %v6900_v12, %v8114_v38 }
 0xa07   : > { %v3953_v17 = vpop.permute.xlu0 %3952 }
 0xa08   : > { %v3422_v35 = vpack.c.bf16 %v3414_v31, %v3414_v31 }
 0xa09   : > { %v6902_v26 = vpop.eup %6901 }
 0xa0a   : > { %6518 = vmatmul.mubr.msk.bf16.vlgmr.msra.gmra.mxu1 %vm1121_vm3, %v3422_v35  ;;  %v3415_v40 = vmul.f32 %v6902_v26, %v8118_v30  ;;  %v3958_v30 = vsel %vm1121_vm3, %v3953_v17, 0 }
 0xa0b   : > { %6528 = vmatpush3.bf16.msra.mxu1 %v3767_v39  ;;  %6529 = vmatprep.mubr.msk.bf16.mxu1 %vm7137_vm2, %v7136_v56  ;;  %v3951_v38 = vpop.permute.xlu0 %3950 }
 0xa0c   : > { %v3423_v61 = vpack.c.bf16 %v3415_v40, %v3415_v40  ;;  %6539 = vmatprep.subr.bf16.mxu1 %v7136_v56 }
 0xa0e   : > { %6524 = vmatmul.mubr.msk.bf16.vlgmr.msra.gmra.mxu0 %vm1121_vm3, %v3423_v61 }
 0xa0f   : > { %6534 = vmatpush3.bf16.xpose.msra.mxu0 %v3858_v13  ;;  %6535 = vmatprep.mubr.msk.bf16.mxu0 %vm7137_vm2, %v7136_v56  ;;  %v4053_v44 = vpop.permute.xlu0 %4052 }
 0xa10   : > { %6545 = vmatprep.subr.bf16.mxu0 %v7136_v56  ;;  %v4058_v34 = vsel %vm1121_vm3, %v4053_v44, 0 }
 0xa13   : > { %v4051_v36 = vpop.permute.xlu0 %4050 }
 0xa16   : > { %6536 = vmatmul.mubr.msk.bf16.vlgmr.msra.gmra.mxu0 %vm1121_vm3, %v3851_v33 }
 0xa17   : > { %6546 = vmatpush3.bf16.xpose.msra.mxu0 %v3958_v30  ;;  %6547 = vmatprep.mubr.msk.bf16.mxu0 %vm7137_vm2, %v7136_v56  ;;  %v4153_v54 = vpop.permute.xlu0 %4152 }
 0xa18   : > { %6557 = vmatprep.subr.bf16.mxu0 %v7136_v56  ;;  %v4158_v46 = vsel %vm1121_vm3, %v4153_v54, 0 }
 0xa1b   : > { %v4151_v4 = vpop.permute.xlu0 %4150 }
 0xa1e   : > { %6548 = vmatmul.mubr.msk.bf16.vlgmr.msra.gmra.mxu0 %vm1121_vm3, %v3951_v38 }
 0xa1f   : > { %6558 = vmatpush3.bf16.xpose.msra.mxu0 %v4058_v34  ;;  %6559 = vmatprep.mubr.msk.bf16.mxu0 %vm7137_vm2, %v7136_v56 }
 0xa20   : > { %6569 = vmatprep.subr.bf16.mxu0 %v7136_v56 }
 0xa26   : > { %6560 = vmatmul.mubr.msk.bf16.vlgmr.msra.gmra.mxu0 %vm1121_vm3, %v4051_v36 }
 0xa27   : > { %6570 = vmatpush3.bf16.xpose.msra.mxu0 %v4158_v46  ;;  %6571 = vmatprep.mubr.msk.bf16.mxu0 %vm7137_vm2, %v7136_v56 }
 0xa28   : > { %6581 = vmatprep.subr.bf16.mxu0 %v7136_v56 }
 0xa2c   : > { %v3400_v55 = vpop.xlane.xlu1 %3399 }
 0xa2d   : > { %6903 = vrcp.f32 %v3400_v55 }
 0xa2e   : > { %6572 = vmatmul.mubr.msk.bf16.vlgmr.msra.gmra.mxu0 %vm1121_vm3, %v4151_v4 }
 0xa2f   : > { %6583 = vmatprep.mubr.msk.bf16.mxu0 %vm7137_vm2, %v7136_v56 }
 0xa30   : > { %v3901_v41 = vpop.permute.xlu1 %3900 }
 0xa34   : > { %v4003_v51 = vpop.permute.xlu1 %4002 }
 0xa35   : > { %v4008_v53 = vsel %vm1121_vm3, %v4003_v51, 0 }
 0xa38   : > { %v4001_v59 = vpop.permute.xlu1 %4000 }
 0xa3a   : > { %v6904_v45 = vpop.eup %6903 }
 0xa3b   : > { %v3416_v28 = vmul.f32 %v6904_v45, %v8144_v32 }
 0xa3c   : > { %v4103_v5 = vpop.permute.xlu1 %4102 }
 0xa3d   : > { %v3424_v3 = vpack.c.bf16 %v3416_v28, %v3416_v28  ;;  %v4108_v42 = vsel %vm1121_vm3, %v4103_v5, 0 }
 0xa3f   : > { %6530 = vmatmul.mubr.msk.bf16.vlgmr.msra.gmra.mxu1 %vm1121_vm3, %v3424_v3 }
 0xa40   : > { %6540 = vmatpush3.bf16.xpose.msra.mxu1 %v3908_v48  ;;  %6541 = vmatprep.mubr.msk.bf16.mxu1 %vm7137_vm2, %v7136_v56  ;;  %v4101_v32 = vpop.permute.xlu1 %4100 }
 0xa41   : > { %6551 = vmatprep.subr.bf16.mxu1 %v7136_v56 }
 0xa44   : > { %v4203_v9 = vpop.permute.xlu1 %4202 }
 0xa45   : > { %v4208_v50 = vsel %vm1121_vm3, %v4203_v9, 0 }
 0xa47   : > { %6542 = vmatmul.mubr.msk.bf16.vlgmr.msra.gmra.mxu1 %vm1121_vm3, %v3901_v41 }
 0xa48   : > { %6552 = vmatpush3.bf16.xpose.msra.mxu1 %v4008_v53  ;;  %6553 = vmatprep.mubr.msk.bf16.mxu1 %vm7137_vm2, %v7136_v56  ;;  %v4201_v14 = vpop.permute.xlu1 %4200 }
 0xa49   : > { %6563 = vmatprep.subr.bf16.mxu1 %v7136_v56 }
 0xa4f   : > { %6554 = vmatmul.mubr.msk.bf16.vlgmr.msra.gmra.mxu1 %vm1121_vm3, %v4001_v59 }
 0xa50   : > { %6564 = vmatpush3.bf16.xpose.msra.mxu1 %v4108_v42  ;;  %6565 = vmatprep.mubr.msk.bf16.mxu1 %vm7137_vm2, %v7136_v56 }
 0xa51   : > { %6575 = vmatprep.subr.bf16.mxu1 %v7136_v56 }
 0xa57   : > { %6566 = vmatmul.mubr.msk.bf16.vlgmr.msra.gmra.mxu1 %vm1121_vm3, %v4101_v32 }
 0xa58   : > { %6576 = vmatpush3.bf16.xpose.msra.mxu1 %v4208_v50  ;;  %6577 = vmatprep.mubr.msk.bf16.mxu1 %vm7137_vm2, %v7136_v56 }
 0xa59   : > { %6587 = vmatprep.subr.bf16.mxu1 %v7136_v56 }
 0xa5c   : > { %v8244_v37 = vpop.f32.mrf.mxu0 }
 0xa5e   : > { %v6489_v16 = vpop.f32.mrf.mxu0 }
 0xa5f   : > { %6578 = vmatmul.mubr.msk.bf16.vlgmr.msra.gmra.mxu1 %vm1121_vm3, %v4201_v14 }
 0xa60   : > { %v3470_v19 = vpop.f32.mrf.mxu0  ;;  %6589 = vmatprep.mubr.msk.bf16.mxu1 %vm7137_vm2, %v7136_v56 }
 0xa62   : > { %v6490_v22 = vpop.f32.mrf.mxu0 }
 0xa64   : > { %v8249_v63 = vpop.f32.mrf.mxu0 }
 0xa66   : > { %v6501_v27 = vpop.f32.mrf.mxu0 }
 0xa68   : > { %v3566_v7 = vpop.f32.mrf.mxu0 }
 0xa6a   : > { %v6502_v58 = vpop.f32.mrf.mxu0 }
 0xa8d   : > { %v8251_v2 = vpop.f32.mrf.mxu1 }
 0xa8f   : > { %v6495_v8 = vpop.f32.mrf.mxu1 }
 0xa91   : > { %v3518_v0 = vpop.f32.mrf.mxu1 }
 0xa93   : > { %v6496_v1 = vpop.f32.mrf.mxu1 }
 0xa95   : > { %v8253_v12 = vpop.f32.mrf.mxu1 }
 0xa97   : > { %v6507_v33 = vpop.f32.mrf.mxu1 }
 0xa99   : > { %v3614_v31 = vpop.f32.mrf.mxu1  ;;  %v8255_v35 = vpop.f32.mrf.mxu0 }
 0xa9b   : > { %v6508_v26 = vpop.f32.mrf.mxu1  ;;  %v6513_v39 = vpop.f32.mrf.mxu0 }
 0xa9d   : > { %v3662_v40 = vpop.f32.mrf.mxu0 }
 0xa9f   : > { %v6514_v17 = vpop.f32.mrf.mxu0 }
 0xaca   : > { %v8257_v61 = vpop.f32.mrf.mxu1 }
 0xacc   : > { %v6519_v13 = vpop.f32.mrf.mxu1 }
 0xace   : > { %v3710_v38 = vpop.f32.mrf.mxu1  ;;  %v8259_v30 = vpop.f32.mrf.mxu0 }
 0xad0   : > { %v6520_v44 = vpop.f32.mrf.mxu1  ;;  %v6525_v36 = vpop.f32.mrf.mxu0 }
 0xad2   : > { %v3758_v34 = vpop.f32.mrf.mxu0 }
 0xad4   : > { %v6526_v54 = vpop.f32.mrf.mxu0 }
 0xad6   : > { %v3894_v46 = vpop.f32.mrf.mxu0 }
 0xad7   : > { %v8262_v23 = vadd.f32 %v8053_v57, %v3894_v46 }
 0xad8   : > { %v6537_v55 = vpop.f32.mrf.mxu0 }
 0xad9   : > { %v4250_v4 = vsel %vm1121_vm3, %v8262_v23, -inf }
 0xada   : > { %4251 = vmax.xlane.f32.xlu0 %v4250_v4  ;;  %v3897_v41 = vpop.f32.mrf.mxu0 }
 0xadc   : > { %v6538_v45 = vpop.f32.mrf.mxu0 }
 0xade   : > { %v3994_v28 = vpop.f32.mrf.mxu0 }
 0xadf   : > { %v8267_v51 = vadd.f32 %v8053_v57, %v3994_v28 }
 0xae0   : > { %v6549_v3 = vpop.f32.mrf.mxu0 }
 0xae1   : > { %v4256_v48 = vsel %vm1121_vm3, %v8267_v51, -inf }
 0xae2   : > { %4257 = vmax.xlane.f32.xlu0 %v4256_v48  ;;  %v3997_v59 = vpop.f32.mrf.mxu0 }
 0xae4   : > { %v6550_v53 = vpop.f32.mrf.mxu0 }
 0xae6   : > { %v4094_v5 = vpop.f32.mrf.mxu0 }
 0xae7   : > { %v4095_v13 = vadd.f32 %v8053_v57, %v4094_v5 }
 0xae8   : > { %v6561_v32 = vpop.f32.mrf.mxu0 }
 0xae9   : > { %v4262_v54 = vsel %vm1121_vm3, %v4095_v13, -inf }
 0xaea   : > { %v4097_v42 = vpop.f32.mrf.mxu0 }
 0xaec   : > { %v6562_v9 = vpop.f32.mrf.mxu0 }
 0xaee   : > { %v4194_v50 = vpop.f32.mrf.mxu0 }
 0xaef   : > { %v4195_v34 = vadd.f32 %v8053_v57, %v4194_v50 }
 0xaf0   : > { %v6573_v14 = vpop.f32.mrf.mxu0 }
 0xaf1   : > { %v4268_v45 = vsel %vm1121_vm3, %v4195_v34, -inf }
 0xaf2   : > { %v4197_v16 = vpop.f32.mrf.mxu0 }
 0xaf4   : > { %v6574_v19 = vpop.f32.mrf.mxu0 }
 0xaff   : > { %v8271_v22 = vpop.f32.mrf.mxu1 }
 0xb01   : > { %v6531_v27 = vpop.f32.mrf.mxu1 }
 0xb03   : > { %v3806_v7 = vpop.f32.mrf.mxu1 }
 0xb05   : > { %v6532_v58 = vpop.f32.mrf.mxu1 }
 0xb07   : > { %v3944_v8 = vpop.f32.mrf.mxu1 }
 0xb08   : > { %v3945_v0 = vadd.f32 %v8053_v57, %v3944_v8 }
 0xb09   : > { %v6543_v1 = vpop.f32.mrf.mxu1 }
 0xb0a   : > { %v4253_v33 = vsel %vm1121_vm3, %v3945_v0, -inf }
 0xb0b   : > { %4254 = vmax.xlane.f32.xlu1 %v4253_v33  ;;  %v3947_v31 = vpop.f32.mrf.mxu1 }
 0xb0d   : > { %v6544_v26 = vpop.f32.mrf.mxu1 }
 0xb0f   : > { %v4044_v39 = vpop.f32.mrf.mxu1 }
 0xb10   : > { %v8276_v40 = vadd.f32 %v8053_v57, %v4044_v39 }
 0xb11   : > { %v6555_v17 = vpop.f32.mrf.mxu1 }
 0xb12   : > { %v4259_v38 = vsel %vm1121_vm3, %v8276_v40, -inf }
 0xb13   : > { %v4047_v44 = vpop.f32.mrf.mxu1  ;;  %4260 = vmax.xlane.f32.xlu0 %v4259_v38 }
 0xb15   : > { %v6556_v36 = vpop.f32.mrf.mxu1 }
 0xb17   : > { %v4144_v46 = vpop.f32.mrf.mxu1  ;;  %4263 = vmax.xlane.f32.xlu0 %v4262_v54 }
 0xb18   : > { %v8284_v55 = vadd.f32 %v8053_v57, %v4144_v46 }
 0xb19   : > { %v6567_v4 = vpop.f32.mrf.mxu1 }
 0xb1a   : > { %v4265_v41 = vsel %vm1121_vm3, %v8284_v55, -inf }
 0xb1b   : > { %4266 = vmax.xlane.f32.xlu1 %v4265_v41  ;;  %v4147_v28 = vpop.f32.mrf.mxu1  ;;  %4269 = vmax.xlane.f32.xlu0 %v4268_v45 }
 0xb1d   : > { %v6568_v3 = vpop.f32.mrf.mxu1 }
 0xb1f   : > { %v4244_v48 = vpop.f32.mrf.mxu1 }
 0xb20   : > { %v8296_v32 = vadd.f32 %v8053_v57, %v4244_v48 }
 0xb21   : > { %v6579_v59 = vpop.f32.mrf.mxu1 }
 0xb22   : > { %v4271_v42 = vsel %vm1121_vm3, %v8296_v32, -inf }
 0xb23   : > { %v4247_v53 = vpop.f32.mrf.mxu1 }
 0xb25   : > { %v6580_v5 = vpop.f32.mrf.mxu1 }
 0xb2c   : > { %4394 = vrot.lane.b32.xlu1 %v7517_v11, %s7148_s21 }
 0xb30   : > { %4442 = vrot.lane.b32.xlu1 %v7520_v15, %s7148_s21 }
 0xb31   : > { %4346 = vrot.lane.b32.xlu0 %v7514_v6, %s7148_s21 }
 0xb54   : > { %4272 = vmax.xlane.f32.xlu1 %v4271_v42 }
 0xb63   : > { %v4252_v9 = vpop.xlane.xlu0 %4251 }
 0xb64   : > { %v4274_v50 = vsub.f32 %v8262_v23, %v4252_v9 }
 0xb65   : > { %4490 = vrot.lane.b32.xlu1 %v7528_v20, %s7148_s21 }
 0xb66   : > { %v4282_v11 = vmul.f32 1.442695, %v4274_v50 }
 0xb68   : > { %6905 = vpow2.f32 %v4282_v11 }
 0xb6b   : > { %v4258_v14 = vpop.xlane.xlu0 %4257 }
 0xb6c   : > { %v4276_v15 = vsub.f32 %v8267_v51, %v4258_v14 }
 0xb6e   : > { %v4286_v16 = vmul.f32 1.442695, %v4276_v15 }
 0xb70   : > { %6907 = vpow2.f32 %v4286_v16 }
 0xb75   : > { %v8304_v6 = vpop.eup %6905 }
 0xb76   : > { %v4298_v57 = vsel %vm1121_vm3, %v8304_v6, 0.0 }
 0xb77   : > { %4299 = vadd.xlane.f32.xlu0 %v4298_v57 }
 0xb7d   : > { %v8308_v19 = vpop.eup %6907 }
 0xb7e   : > { %v4304_v23 = vsel %vm1121_vm3, %v8308_v19, 0.0 }
 0xb7f   : > { %4305 = vadd.xlane.f32.xlu0 %v4304_v23 }
 0xb94   : > { %v4255_v20 = vpop.xlane.xlu1 %4254 }
 0xb95   : > { %v4275_v27 = vsub.f32 %v3945_v0, %v4255_v20  ;;  %4538 = vrot.lane.b32.xlu0 %v7524_v18, %s7148_s21 }
 0xb97   : > { %v4284_v51 = vmul.f32 1.442695, %v4275_v27 }
 0xb99   : > { %6909 = vpow2.f32 %v4284_v51 }
 0xb9c   : > { %v4261_v7 = vpop.xlane.xlu0 %4260 }
 0xb9d   : > { %v4277_v4 = vsub.f32 %v8276_v40, %v4261_v7 }
 0xb9f   : > { %v4288_v41 = vmul.f32 1.442695, %v4277_v4 }
 0xba0   : > { %v4264_v58 = vpop.xlane.xlu0 %4263 }
 0xba1   : > { %v4278_v8 = vsub.f32 %v4095_v13, %v4264_v58 }
 0xba3   : > { %v4290_v1 = vmul.f32 1.442695, %v4278_v8 }
 0xba4   : > { %v4267_v33 = vpop.xlane.xlu1 %4266  ;;  %v4270_v31 = vpop.xlane.xlu0 %4269 }
 0xba5   : > { %6911 = vpow2.f32 %v4290_v1  ;;  %v4280_v26 = vsub.f32 %v4195_v34, %v4270_v31  ;;  %v4279_v45 = vsub.f32 %v8284_v55, %v4267_v33 }
 0xba6   : > { %v8314_v39 = vpop.eup %6909 }
 0xba7   : > { %v4294_v17 = vmul.f32 1.442695, %v4280_v26  ;;  %v4301_v38 = vsel %vm1121_vm3, %v8314_v39, 0.0  ;;  %v4292_v28 = vmul.f32 1.442695, %v4279_v45 }
 0xba8   : > { %4302 = vadd.xlane.f32.xlu1 %v4301_v38  ;;  %v4395_v0 = vpop.permute.xlu1 %4394  ;;  %v4347_v44 = vpop.permute.xlu0 %4346 }
 0xba9   : > { %v4400_v18 = vsel %vm1612_vm4, %v4395_v0, 0  ;;  %v4352_v36 = vsel %vm1612_vm4, %v4347_v44, 0  ;;  %6913 = vpow2.f32 %v4294_v17 }
 0xbaa   : > { %6582 = vmatpush3.bf16.msra.mxu0 %v4352_v36  ;;  %6588 = vmatpush3.bf16.msra.mxu1 %v4400_v18  ;;  %6915 = vpow2.f32 %v4288_v41 }
 0xbab   : > { %6593 = vmatprep.subr.bf16.mxu0 %v7136_v56  ;;  %6599 = vmatprep.subr.bf16.mxu1 %v7136_v56  ;;  %6917 = vpow2.f32 %v4292_v28 }
 0xbb2   : > { %v8322_v13 = vpop.eup %6911 }
 0xbb3   : > { %v4310_v34 = vsel %vm1121_vm3, %v8322_v13, 0.0 }
 0xbb4   : > { %4311 = vadd.xlane.f32.xlu0 %v4310_v34 }
 0xbb6   : > { %v8326_v54 = vpop.eup %6913 }
 0xbb7   : > { %v4316_v46 = vsel %vm1121_vm3, %v8326_v54, 0.0  ;;  %v8340_v3 = vpop.eup %6915 }
 0xbb8   : > { %4317 = vadd.xlane.f32.xlu0 %v4316_v46  ;;  %v4307_v40 = vsel %vm1121_vm3, %v8340_v3, 0.0  ;;  %v8346_v55 = vpop.eup %6917 }
 0xbb9   : > { %4586 = vrot.lane.b32.xlu1 %v7538_v24, %s7148_s21  ;;  %v4443_v24 = vpop.permute.xlu1 %4442 }
 0xbce   : > { %4634 = vrot.lane.b32.xlu0 %v7532_v21, %s7148_s21 }
 0xbd2   : > { %2896 = vrot.lane.b32.xlu0 %v8031_v43, %s7149_s25 }
 0xbd6   : > { %2900 = vrot.lane.b32.xlu0 %v8038_v52, %s7149_s25  ;;  %v4313_v52 = vsel %vm1121_vm3, %v8346_v55, 0.0 }
 0xbda   : > { %3817 = vrot.lane.b32.xlu0 %v8244_v37, %s7150_s22 }
 0xbdd   : > { %v4273_v21 = vpop.xlane.xlu1 %4272  ;;  %4308 = vadd.xlane.f32.xlu1 %v4307_v40 }
 0xbde   : > { %v4281_v48 = vsub.f32 %v8296_v32, %v4273_v21  ;;  %3821 = vrot.lane.b32.xlu0 %v8249_v63, %s7150_s22 }
 0xbe0   : > { %v4296_v43 = vmul.f32 1.442695, %v4281_v48 }
 0xbe1   : > { %4314 = vadd.xlane.f32.xlu1 %v4313_v52 }
 0xbe2   : > { %6919 = vpow2.f32 %v4296_v43  ;;  %2904 = vrot.lane.b32.xlu0 %v8044_v47, %s7149_s25 }
 0xbe6   : > { %2908 = vrot.lane.b32.xlu0 %v8048_v10, %s7149_s25 }
 0xbea   : > { %3825 = vrot.lane.b32.xlu0 %v8255_v35, %s7150_s22 }
 0xbee   : > { %3829 = vrot.lane.b32.xlu0 %v8259_v30, %s7150_s22 }
 0xbef   : > { %v8359_v37 = vpop.eup %6919 }
 0xbf0   : > { %v4319_v63 = vsel %vm1121_vm3, %v8359_v37, 0.0 }
 0xbf1   : > { %4320 = vadd.xlane.f32.xlu1 %v4319_v63 }
 0xc00   : > { %v4300_v59 = vpop.xlane.xlu0 %4299 }
 0xc01   : > { %6921 = vrcp.f32 %v4300_v59 }
 0xc02   : > { %4682 = vrot.lane.b32.xlu1 %v7545_v25, %s7148_s21  ;;  %v4448_v25 = vsel %vm1612_vm4, %v4443_v24, 0 }
 0xc06   : > { %2898 = vrot.lane.b32.xlu1 %v8040_v29, %s7149_s25 }
 0xc08   : > { %v4306_v47 = vpop.xlane.xlu0 %4305 }
 0xc09   : > { %6923 = vrcp.f32 %v4306_v47 }
 0xc0a   : > { %2902 = vrot.lane.b32.xlu1 %v8042_v60, %s7149_s25 }
 0xc0e   : > { %v6922_v10 = vpop.eup %6921  ;;  %3819 = vrot.lane.b32.xlu1 %v8251_v2, %s7150_s22  ;;  %v4539_v2 = vpop.permute.xlu0 %4538 }
 0xc0f   : > { %v4330_v35 = vmul.f32 %v6922_v10, %v8304_v6 }
 0xc11   : > { %v4338_v30 = vpack.c.bf16 %v4330_v35, %v4330_v35 }
 0xc12   : > { %3823 = vrot.lane.b32.xlu1 %v8253_v12, %s7150_s22  ;;  %v4544_v12 = vsel %vm1612_vm4, %v4539_v2, 0 }
 0xc13   : > { %6584 = vmatmul.mubr.msk.bf16.vlgmr.msra.gmra.mxu0 %vm1121_vm3, %v4338_v30 }
 0xc14   : > { %6594 = vmatpush3.bf16.msra.mxu0 %v4448_v25  ;;  %6595 = vmatprep.mubr.msk.bf16.mxu0 %vm7137_vm2, %v7136_v56 }
 0xc15   : > { %6605 = vmatprep.subr.bf16.mxu0 %v7136_v56 }
 0xc16   : > { %v6924_v29 = vpop.eup %6923  ;;  %2906 = vrot.lane.b32.xlu1 %v8046_v62, %s7149_s25  ;;  %v4491_v62 = vpop.permute.xlu1 %4490 }
 0xc17   : > { %v4332_v60 = vmul.f32 %v6924_v29, %v8308_v19  ;;  %v4496_v11 = vsel %vm1612_vm4, %v4491_v62, 0 }
 0xc19   : > { %v4340_v53 = vpack.c.bf16 %v4332_v60, %v4332_v60 }
 0xc1a   : > { %2910 = vrot.lane.b32.xlu1 %v8062_v49, %s7149_s25 }
 0xc1b   : > { %6596 = vmatmul.mubr.msk.bf16.vlgmr.msra.gmra.mxu0 %vm1121_vm3, %v4340_v53 }
 0xc1c   : > { %6606 = vmatpush3.bf16.msra.mxu0 %v4544_v12  ;;  %6607 = vmatprep.mubr.msk.bf16.mxu0 %vm7137_vm2, %v7136_v56 }
 0xc1d   : > { %6617 = vmatprep.subr.bf16.mxu0 %v7136_v56 }
 0xc1e   : > { %3827 = vrot.lane.b32.xlu1 %v8257_v61, %s7150_s22 }
 0xc22   : > { %3831 = vrot.lane.b32.xlu1 %v8271_v22, %s7150_s22 }
 0xc31   : > { %v4303_v5 = vpop.xlane.xlu1 %4302 }
 0xc32   : > { %6925 = vrcp.f32 %v4303_v5 }
 0xc35   : > { %v4587_v8 = vpop.permute.xlu1 %4586 }
 0xc36   : > { %v4592_v44 = vsel %vm1612_vm4, %v4587_v8, 0 }
 0xc3d   : > { %v4312_v49 = vpop.xlane.xlu0 %4311 }
 0xc3e   : > { %6927 = vrcp.f32 %v4312_v49 }
 0xc3f   : > { %v6926_v32 = vpop.eup %6925 }
 0xc40   : > { %v4331_v42 = vmul.f32 %v6926_v32, %v8314_v39 }
 0xc41   : > { %v4318_v50 = vpop.xlane.xlu0 %4317 }
 0xc42   : > { %v4339_v9 = vpack.c.bf16 %v4331_v42, %v4331_v42  ;;  %6929 = vrcp.f32 %v4318_v50  ;;  %v6781_v42 = vld [vmem:[%s7377_s14 + $0x8] sm:$0xff]  }
 0xc44   : > { %6590 = vmatmul.mubr.msk.bf16.vlgmr.msra.gmra.mxu1 %vm1121_vm3, %v4339_v9  ;;  %v6782_v9 = vld [vmem:[%s7377_s14] sm:$0xff]  }
 0xc45   : > { %6600 = vmatpush3.bf16.msra.mxu1 %v4496_v11  ;;  %6601 = vmatprep.mubr.msk.bf16.mxu1 %vm7137_vm2, %v7136_v56  ;;  %v4635_v61 = vpop.permute.xlu0 %4634 }
 0xc46   : > { %6611 = vmatprep.subr.bf16.mxu1 %v7136_v56  ;;  %v4640_v19 = vsel %vm1612_vm4, %v4635_v61, 0 }
 0xc49   : > { %v2897_v22 = vpop.permute.xlu0 %2896 }
 0xc4a   : > { %2921 = vst.msk [vmem:[#allocation3] sm:$0xff] %vm2920_vm5, %v2897_v22 }
 0xc4b   : > { %v6928_v14 = vpop.eup %6927 }
 0xc4c   : > { %v4334_v15 = vmul.f32 %v6928_v14, %v8322_v13 }
 0xc4d   : > { %v2901_v6 = vpop.permute.xlu0 %2900 }
 0xc4e   : > { %v4342_v16 = vpack.c.bf16 %v4334_v15, %v4334_v15  ;;  %2923 = vst.msk [vmem:[#allocation3 + $0x10] sm:$0xff] %vm2920_vm5, %v2901_v6 }
 0xc4f   : > { %v6930_v57 = vpop.eup %6929 }
 0xc50   : > { %6608 = vmatmul.mubr.msk.bf16.vlgmr.msra.gmra.mxu0 %vm1121_vm3, %v4342_v16  ;;  %v4336_v23 = vmul.f32 %v6930_v57, %v8326_v54 }
 0xc51   : > { %6618 = vmatpush3.bf16.msra.mxu0 %v4640_v19  ;;  %6619 = vmatprep.mubr.msk.bf16.mxu0 %vm7137_vm2, %v7136_v56  ;;  %v3818_v20 = vpop.permute.xlu0 %3817 }
 0xc52   : > { %3842 = vst.msk [vmem:[#allocation3] sm:$0xff] %vm3841_vm6, %v3818_v20  ;;  %v4344_v27 = vpack.c.bf16 %v4336_v23, %v4336_v23  ;;  %6629 = vmatprep.subr.bf16.mxu0 %v6781_v42 }
 0xc55   : > { %v3822_v51 = vpop.permute.xlu0 %3821 }
 0xc56   : > { %3844 = vst.msk [vmem:[#allocation3 + $0x10] sm:$0xff] %vm3841_vm6, %v3822_v51 }
 0xc58   : > { %6620 = vmatmul.mubr.msk.bf16.vlgmr.msra.gmra.mxu0 %vm1121_vm3, %v4344_v27 }
 0xc59   : > { %v2905_v7 = vpop.permute.xlu0 %2904  ;;  %6630 = vmatpush3.bf16.msra.mxu0 %v6781_v42 }
 0xc5a   : > { %2925 = vst.msk [vmem:[#allocation3 + $0x20] sm:$0xff] %vm2920_vm5, %v2905_v7  ;;  %6631 = vmatprep.subr.bf16.mxu0 %v6782_v9 }
 0xc5d   : > { %v2909_v58 = vpop.permute.xlu0 %2908  ;;  %6632 = vmatpush3.bf16.msra.mxu0 %v6782_v9 }
 0xc5e   : > { %2927 = vst.msk [vmem:[#allocation3 + $0x30] sm:$0xff] %vm2920_vm5, %v2909_v58 }
 0xc61   : > { %v3826_v1 = vpop.permute.xlu0 %3825 }
 0xc62   : > { %3846 = vst.msk [vmem:[#allocation3 + $0x20] sm:$0xff] %vm3841_vm6, %v3826_v1 }
 0xc65   : > { %v3830_v33 = vpop.permute.xlu0 %3829 }
 0xc66   : > { %v4309_v31 = vpop.xlane.xlu1 %4308  ;;  %3848 = vst.msk [vmem:[#allocation3 + $0x30] sm:$0xff] %vm3841_vm6, %v3830_v33 }
 0xc67   : > { %6931 = vrcp.f32 %v4309_v31 }
 0xc6a   : > { %v4315_v26 = vpop.xlane.xlu1 %4314 }
 0xc6b   : > { %6933 = vrcp.f32 %v4315_v26 }
 0xc74   : > { %v6932_v39 = vpop.eup %6931 }
 0xc75   : > { %v4333_v17 = vmul.f32 %v6932_v39, %v8340_v3 }
 0xc77   : > { %v4341_v38 = vpack.c.bf16 %v4333_v17, %v4333_v17 }
 0xc78   : > { %v6934_v0 = vpop.eup %6933 }
 0xc79   : > { %6602 = vmatmul.mubr.msk.bf16.vlgmr.msra.gmra.mxu1 %vm1121_vm3, %v4341_v38  ;;  %v4335_v36 = vmul.f32 %v6934_v0, %v8346_v55 }
 0xc7a   : > { %6612 = vmatpush3.bf16.msra.mxu1 %v4592_v44  ;;  %v4321_v18 = vpop.xlane.xlu1 %4320  ;;  %6613 = vmatprep.mubr.msk.bf16.mxu1 %vm7137_vm2, %v7136_v56 }
 0xc7b   : > { %6935 = vrcp.f32 %v4321_v18  ;;  %6623 = vmatprep.subr.bf16.mxu1 %v7136_v56  ;;  %v4343_v34 = vpack.c.bf16 %v4335_v36, %v4335_v36 }
 0xc7e   : > { %v4683_v13 = vpop.permute.xlu1 %4682 }
 0xc7f   : > { %v4688_v54 = vsel %vm1612_vm4, %v4683_v13, 0 }
 0xc81   : > { %6614 = vmatmul.mubr.msk.bf16.vlgmr.msra.gmra.mxu1 %vm1121_vm3, %v4343_v34 }
 0xc82   : > { %6624 = vmatpush3.bf16.msra.mxu1 %v4688_v54  ;;  %v2899_v46 = vpop.permute.xlu1 %2898  ;;  %6625 = vmatprep.mubr.msk.bf16.mxu1 %vm7137_vm2, %v7136_v56 }
 0xc83   : > { %2922 = vst.msk [vmem:[#allocation3 + $0x8] sm:$0xff] %vm2920_vm5, %v2899_v46 }
 0xc86   : > { %v2903_v4 = vpop.permute.xlu1 %2902 }
 0xc87   : > { %2924 = vst.msk [vmem:[#allocation3 + $0x18] sm:$0xff] %vm2920_vm5, %v2903_v4 }
 0xc88   : > { %v6936_v41 = vpop.eup %6935 }
 0xc89   : > { %v4337_v45 = vmul.f32 %v6936_v41, %v8359_v37  ;;  %v6025_v41 = vld [vmem:[%s8754_s15] ss:$0 sm:$0xff]  ;;  %s8758_s15 = sld [smem:[#allocation27_spill]] (!%p6058_p4) }
 0xc8a   : > { %v3820_v28 = vpop.permute.xlu1 %3819 }
 0xc8b   : > { %v4345_v3 = vpack.c.bf16 %v4337_v45, %v4337_v45  ;;  %3843 = vst.msk [vmem:[#allocation3 + $0x8] sm:$0xff] %vm3841_vm6, %v3820_v28 }
 0xc8d   : > { %6626 = vmatmul.mubr.msk.bf16.vlgmr.msra.gmra.mxu1 %vm1121_vm3, %v4345_v3 }
 0xc8e   : > { %v3824_v24 = vpop.permute.xlu1 %3823 }
 0xc8f   : > { %3845 = vst.msk [vmem:[#allocation3 + $0x18] sm:$0xff] %vm3841_vm6, %v3824_v24 }
 0xc92   : > { %v2907_v40 = vpop.permute.xlu1 %2906 }
 0xc93   : > { %2926 = vst.msk [vmem:[#allocation3 + $0x28] sm:$0xff] %vm2920_vm5, %v2907_v40  ;;  %v6986_v40 = vld [vmem:[#allocation2] sm:$0xff] }
 0xc96   : > { %v2911_v56 = vpop.permute.xlu1 %2910 }
 0xc97   : > { %2928 = vst.msk [vmem:[#allocation3 + $0x38] sm:$0xff] %vm2920_vm5, %v2911_v56 }
 0xc9a   : > { %v3828_v55 = vpop.permute.xlu1 %3827 }
 0xc9b   : > { %3847 = vst.msk [vmem:[#allocation3 + $0x28] sm:$0xff] %vm3841_vm6, %v3828_v55 }
 0xc9e   : > { %v3832_v21 = vpop.permute.xlu1 %3831 }
 0xc9f   : > { %3849 = vst.msk [vmem:[#allocation3 + $0x38] sm:$0xff] %vm3841_vm6, %v3832_v21  ;;  %v6987_v21 = vld [vmem:[#allocation2 + $0x10] sm:$0xff] }
 0xcd3   : > { %v4388_v48 = vpop.f32.mrf.mxu0 }
 0xcd4   : > { %4738 = vrot.lane.b32.xlu0 %v4388_v48, %s7151_s24 }
 0xcd5   : > { %v6585_v43 = vpop.f32.mrf.mxu0 }
 0xcd7   : > { %v4391_v52 = vpop.f32.mrf.mxu0 }
 0xcd9   : > { %v6586_v37 = vpop.f32.mrf.mxu0 }
 0xcdb   : > { %v4484_v63 = vpop.f32.mrf.mxu0 }
 0xcdc   : > { %4742 = vrot.lane.b32.xlu0 %v4484_v63, %s7151_s24  ;;  %v6988_v63 = vld [vmem:[#allocation2 + $0x8] sm:$0xff] }
 0xcdd   : > { %v6597_v59 = vpop.f32.mrf.mxu0 }
 0xcdf   : > { %v4487_v47 = vpop.f32.mrf.mxu0 }
 0xce0   : > { %v6989_v47 = vld [vmem:[#allocation2 + $0x18] sm:$0xff] }
 0xce1   : > { %v6598_v10 = vpop.f32.mrf.mxu0 }
 0xd04   : > { %v4436_v35 = vpop.f32.mrf.mxu1 }
 0xd05   : > { %4740 = vrot.lane.b32.xlu1 %v4436_v35, %s7151_s24 }
 0xd06   : > { %v6591_v30 = vpop.f32.mrf.mxu1 }
 0xd08   : > { %v4439_v25 = vpop.f32.mrf.mxu1 }
 0xd0a   : > { %v6592_v29 = vpop.f32.mrf.mxu1 }
 0xd10   : > { %v4580_v60 = vpop.f32.mrf.mxu0 }
 0xd11   : > { %4746 = vrot.lane.b32.xlu0 %v4580_v60, %s7151_s24 }
 0xd12   : > { %v6609_v2 = vpop.f32.mrf.mxu0 }
 0xd14   : > { %v4583_v53 = vpop.f32.mrf.mxu0 }
 0xd16   : > { %v6610_v12 = vpop.f32.mrf.mxu0 }
 0xd18   : > { %v4676_v62 = vpop.f32.mrf.mxu0 }
 0xd19   : > { %4750 = vrot.lane.b32.xlu0 %v4676_v62, %s7151_s24  ;;  %v6990_v62 = vld [vmem:[#allocation2 + $0x20] sm:$0xff] }
 0xd1a   : > { %v6621_v5 = vpop.f32.mrf.mxu0 }
 0xd1c   : > { %v4679_v49 = vpop.f32.mrf.mxu0 }
 0xd1e   : > { %v6622_v32 = vpop.f32.mrf.mxu0 }
 0xd1f   : > { %v6991_v32 = vld [vmem:[#allocation2 + $0x30] sm:$0xff] }
 0xd39   : > { %v4532_v50 = vpop.f32.mrf.mxu1 }
 0xd3a   : > { %4744 = vrot.lane.b32.xlu1 %v4532_v50, %s7151_s24 }
 0xd3b   : > { %v6603_v11 = vpop.f32.mrf.mxu1 }
 0xd3d   : > { %v4535_v61 = vpop.f32.mrf.mxu1 }
 0xd3e   : > { %v6992_v61 = vld [vmem:[#allocation2 + $0x28] sm:$0xff] }
 0xd3f   : > { %v6604_v22 = vpop.f32.mrf.mxu1 }
 0xd41   : > { %v4628_v14 = vpop.f32.mrf.mxu1 }
 0xd42   : > { %4748 = vrot.lane.b32.xlu1 %v4628_v14, %s7151_s24  ;;  %v6993_v14 = vld [vmem:[#allocation2 + $0x38] sm:$0xff] }
 0xd43   : > { %v6615_v15 = vpop.f32.mrf.mxu1 }
 0xd45   : > { %v4631_v16 = vpop.f32.mrf.mxu1 }
 0xd46   : > { %v4739_v6 = vpop.permute.xlu0 %4738 }
 0xd47   : > { %4763 = vst.msk [vmem:[#allocation3] sm:$0xff] %vm4762_vm7, %v4739_v6  ;;  %v6616_v57 = vpop.f32.mrf.mxu1 }
 0xd4d   : > { %v4724_v19 = vpop.f32.mrf.mxu1 }
 0xd4e   : > { %4752 = vrot.lane.b32.xlu1 %v4724_v19, %s7151_s24  ;;  %v4743_v23 = vpop.permute.xlu0 %4742  ;;  %v4771_v58 = vld [vmem:[#allocation3] sm:$0xff] }
 0xd4f   : > { %4765 = vst.msk [vmem:[#allocation3 + $0x10] sm:$0xff] %vm4762_vm7, %v4743_v23  ;;  %v6627_v20 = vpop.f32.mrf.mxu1 }
 0xd51   : > { %v4727_v27 = vpop.f32.mrf.mxu1 }
 0xd53   : > { %v6628_v51 = vpop.f32.mrf.mxu1 }
 0xd56   : > { %v4773_v17 = vld [vmem:[#allocation3 + $0x10] sm:$0xff] }
 0xd77   : > { %v4741_v7 = vpop.permute.xlu1 %4740 }
 0xd78   : > { %4764 = vst.msk [vmem:[#allocation3 + $0x8] sm:$0xff] %vm4762_vm7, %v4741_v7 }
 0xd7f   : > { %v4772_v8 = vld [vmem:[#allocation3 + $0x8] sm:$0xff] }
 0xd80   : > { %v4779_v1 = vpack.c.bf16 %v4772_v8, %v4771_v58 }
 0xd82   : > { %6633 = vmatprep.mubr.msk.bf16.mxu0 %vm855_vm1, %v4779_v1 }
 0xd83   : > { %v4747_v33 = vpop.permute.xlu0 %4746 }
 0xd84   : > { %4767 = vst.msk [vmem:[#allocation3 + $0x20] sm:$0xff] %vm4762_vm7, %v4747_v33 }
 0xd8b   : > { %v4751_v31 = vpop.permute.xlu0 %4750  ;;  %v4775_v44 = vld [vmem:[#allocation3 + $0x20] sm:$0xff] }
 0xd8c   : > { %4769 = vst.msk [vmem:[#allocation3 + $0x30] sm:$0xff] %vm4762_vm7, %v4751_v31 }
 0xd93   : > { %v4777_v34 = vld [vmem:[#allocation3 + $0x30] sm:$0xff] }
 0xdac   : > { %v4745_v26 = vpop.permute.xlu1 %4744 }
 0xdad   : > { %4766 = vst.msk [vmem:[#allocation3 + $0x18] sm:$0xff] %vm4762_vm7, %v4745_v26 }
 0xdb4   : > { %v4749_v39 = vpop.permute.xlu1 %4748  ;;  %v4774_v38 = vld [vmem:[#allocation3 + $0x18] sm:$0xff] }
 0xdb5   : > { %4768 = vst.msk [vmem:[#allocation3 + $0x28] sm:$0xff] %vm4762_vm7, %v4749_v39  ;;  %v4780_v0 = vpack.c.bf16 %v4774_v38, %v4773_v17 }
 0xdb7   : > { %6634 = vmatmul.mubr.msk.bf16.vlgmr.msra.gmra.mxu0 %vm855_vm1, %v4780_v0 }
 0xdbc   : > { %v4776_v18 = vld [vmem:[#allocation3 + $0x28] sm:$0xff] }
 0xdbd   : > { %v4781_v36 = vpack.c.bf16 %v4776_v18, %v4775_v44 }
 0xdbf   : > { %6637 = vmatprep.mubr.msk.bf16.mxu0 %vm855_vm1, %v4781_v36 }
 0xdc0   : > { %v4753_v13 = vpop.permute.xlu1 %4752 }
 0xdc1   : > { %4770 = vst.msk [vmem:[#allocation3 + $0x38] sm:$0xff] %vm4762_vm7, %v4753_v13 }
 0xdc8   : > { %v4778_v54 = vld [vmem:[#allocation3 + $0x38] sm:$0xff] }
 0xdc9   : > { %v4782_v46 = vpack.c.bf16 %v4778_v54, %v4777_v34 }
 0xdcb   : > { %6638 = vmatmul.mubr.msk.bf16.gmra.mxu0 %vm855_vm1, %v4782_v46 }
 0xe77   : > { %v6635_v4 = vpop.f32.mrf.mxu0 }
 0xe78   : > { %v4861_v28 = vadd.f32 %v6635_v4, %v6025_v41 }
 0xe79   : > { %v4852_v45 = vpop.f32.mrf.mxu0 }
 0xe7a   : > { %v4853_v3 = vadd.f32 %v6025_v41, %v4852_v45  ;;  %v8466_v48 = vadd.f32 %v6987_v21, %v4861_v28 }
 0xe7b   : > { %v6636_v24 = vpop.f32.mrf.mxu0 }
 0xe7c   : > { %v8464_v56 = vadd.f32 %v6986_v40, %v4853_v3  ;;  %v4864_v43 = vadd.f32 %v6636_v24, %v6025_v41  ;;  %v4899_v30 = vsel %vm855_vm1, %v8466_v48, 0.0 }
 0xe7d   : > { %v4855_v55 = vpop.f32.mrf.mxu0 }
 0xe7e   : > { %v4856_v52 = vadd.f32 %v6025_v41, %v4855_v55  ;;  %v4893_v37 = vsel %vm855_vm1, %v8464_v56, 0.0  ;;  %v8472_v10 = vadd.f32 %v6989_v47, %v4864_v43 }
 0xe7f   : > { %4894 = vadd.xlane.f32.xlu0 %v4893_v37 }
 0xe80   : > { %v8470_v59 = vadd.f32 %v6988_v63, %v4856_v52  ;;  %v4902_v25 = vsel %vm855_vm1, %v8472_v10, 0.0 }
 0xe82   : > { %v4896_v35 = vsel %vm855_vm1, %v8470_v59, 0.0 }
 0xe83   : > { %4897 = vadd.xlane.f32.xlu1 %v4896_v35  ;;  %4900 = vadd.xlane.f32.xlu0 %v4899_v30 }
 0xe87   : > { %4903 = vadd.xlane.f32.xlu0 %v4902_v25 }
 0xe8b   : > { %v6639_v29 = vpop.f32.mrf.mxu0 }
 0xe8c   : > { %v4877_v2 = vadd.f32 %v6639_v29, %v6025_v41  ;;  %v6783_v29 = vld [vmem:[%s7394_s5 + $0x8] sm:$0xff]  }
 0xe8d   : > { %v4868_v60 = vpop.f32.mrf.mxu0  ;;  %6641 = vmatprep.subr.bf16.mxu1 %v6783_v29 }
 0xe8e   : > { %v4869_v53 = vadd.f32 %v6025_v41, %v4868_v60  ;;  %v8482_v42 = vadd.f32 %v6991_v32, %v4877_v2  ;;  %6642 = vmatpush3.bf16.msra.mxu1 %v6783_v29  ;;  %v6784_v60 = vld [vmem:[%s7394_s5] sm:$0xff]  }
 0xe8f   : > { %v6640_v12 = vpop.f32.mrf.mxu0  ;;  %6643 = vmatprep.subr.bf16.mxu1 %v6784_v60 }
 0xe90   : > { %v8480_v5 = vadd.f32 %v6990_v62, %v4869_v53  ;;  %v4880_v9 = vadd.f32 %v6640_v12, %v6025_v41  ;;  %v4911_v6 = vsel %vm855_vm1, %v8482_v42, 0.0 }
 0xe91   : > { %v4871_v49 = vpop.f32.mrf.mxu0 }
 0xe92   : > { %v4872_v50 = vadd.f32 %v6025_v41, %v4871_v49  ;;  %v4905_v11 = vsel %vm855_vm1, %v8480_v5, 0.0  ;;  %v8488_v15 = vadd.f32 %v6993_v14, %v4880_v9  ;;  %6644 = vmatpush3.bf16.msra.mxu1 %v6784_v60 }
 0xe93   : > { %4906 = vadd.xlane.f32.xlu0 %v4905_v11 }
 0xe94   : > { %v8486_v22 = vadd.f32 %v6992_v61, %v4872_v50  ;;  %v4914_v57 = vsel %vm855_vm1, %v8488_v15, 0.0 }
 0xe96   : > { %v4908_v16 = vsel %vm855_vm1, %v8486_v22, 0.0 }
 0xe97   : > { %4909 = vadd.xlane.f32.xlu1 %v4908_v16  ;;  %4912 = vadd.xlane.f32.xlu0 %v4911_v6 }
 0xe9b   : > { %4915 = vadd.xlane.f32.xlu1 %v4914_v57  ;;  %v6032_v57 = vld [vmem:[%s806_s27] ss:$0 sm:$0xff] }
 0xf08   : > { %v4895_v19 = vpop.xlane.xlu0 %4894 }
 0xf09   : > { %v4917_v23 = vmul.f32 0.03125, %v4895_v19 }
 0xf0b   : > { %v8497_v20 = vsub.f32 %v8464_v56, %v4917_v23 }
 0xf0c   : > { %v4898_v27 = vpop.xlane.xlu1 %4897  ;;  %v4901_v51 = vpop.xlane.xlu0 %4900 }
 0xf0d   : > { %v4918_v7 = vmul.f32 0.03125, %v4898_v27  ;;  %v4919_v58 = vmul.f32 0.03125, %v4901_v51  ;;  %v4933_v8 = vmul.f32 %v8497_v20, %v8497_v20 }
 0xf0f   : > { %v8502_v1 = vsub.f32 %v8470_v59, %v4918_v7  ;;  %v8505_v33 = vsub.f32 %v8466_v48, %v4919_v58  ;;  %v4941_v31 = vsel %vm855_vm1, %v4933_v8, 0.0 }
 0xf10   : > { %4942 = vadd.xlane.f32.xlu0 %v4941_v31  ;;  %v4904_v26 = vpop.xlane.xlu0 %4903  ;;  %v6033_v31 = vld [vmem:[%s809_s26] ss:$0 sm:$0xff] }
 0xf11   : > { %v4920_v39 = vmul.f32 0.03125, %v4904_v26  ;;  %v4934_v17 = vmul.f32 %v8502_v1, %v8502_v1  ;;  %v4935_v38 = vmul.f32 %v8505_v33, %v8505_v33 }
 0xf13   : > { %v8513_v0 = vsub.f32 %v8472_v10, %v4920_v39  ;;  %v4944_v44 = vsel %vm855_vm1, %v4934_v17, 0.0  ;;  %v4947_v18 = vsel %vm855_vm1, %v4935_v38, 0.0 }
 0xf14   : > { %4945 = vadd.xlane.f32.xlu1 %v4944_v44  ;;  %4948 = vadd.xlane.f32.xlu0 %v4947_v18 }
 0xf15   : > { %v4936_v36 = vmul.f32 %v8513_v0, %v8513_v0 }
 0xf17   : > { %v4950_v13 = vsel %vm855_vm1, %v4936_v36, 0.0 }
 0xf18   : > { %4951 = vadd.xlane.f32.xlu1 %v4950_v13 }
 0xf1c   : > { %v4907_v34 = vpop.xlane.xlu0 %4906 }
 0xf1d   : > { %v4921_v54 = vmul.f32 0.03125, %v4907_v34 }
 0xf1f   : > { %v8521_v46 = vsub.f32 %v8480_v5, %v4921_v54 }
 0xf20   : > { %v4910_v4 = vpop.xlane.xlu1 %4909  ;;  %v4913_v41 = vpop.xlane.xlu0 %4912 }
 0xf21   : > { %v4922_v45 = vmul.f32 0.03125, %v4910_v4  ;;  %v4923_v28 = vmul.f32 0.03125, %v4913_v41  ;;  %v4937_v3 = vmul.f32 %v8521_v46, %v8521_v46 }
 0xf23   : > { %v8526_v24 = vsub.f32 %v8486_v22, %v4922_v45  ;;  %v8529_v40 = vsub.f32 %v8482_v42, %v4923_v28  ;;  %v4953_v55 = vsel %vm855_vm1, %v4937_v3, 0.0 }
 0xf24   : > { %v4916_v21 = vpop.xlane.xlu1 %4915  ;;  %4954 = vadd.xlane.f32.xlu0 %v4953_v55 }
 0xf25   : > { %v4924_v43 = vmul.f32 0.03125, %v4916_v21  ;;  %v4938_v52 = vmul.f32 %v8526_v24, %v8526_v24  ;;  %v4939_v37 = vmul.f32 %v8529_v40, %v8529_v40 }
 0xf27   : > { %v8537_v63 = vsub.f32 %v8488_v15, %v4924_v43  ;;  %v4956_v47 = vsel %vm855_vm1, %v4938_v52, 0.0  ;;  %v4959_v35 = vsel %vm855_vm1, %v4939_v37, 0.0 }
 0xf28   : > { %4957 = vadd.xlane.f32.xlu1 %v4956_v47  ;;  %4960 = vadd.xlane.f32.xlu0 %v4959_v35 }
 0xf29   : > { %v4940_v30 = vmul.f32 %v8537_v63, %v8537_v63 }
 0xf2b   : > { %v4962_v25 = vsel %vm855_vm1, %v4940_v30, 0.0 }
 0xf2c   : > { %4963 = vadd.xlane.f32.xlu1 %v4962_v25 }
 0xf99   : > { %v4943_v2 = vpop.xlane.xlu0 %4942 }
 0xf9a   : > { %v4965_v53 = vmul.f32 0.03125, %v4943_v2 }
 0xf9c   : > { %v4973_v12 = vadd.f32 1e-05, %v4965_v53 }
 0xf9d   : > { %v4946_v62 = vpop.xlane.xlu1 %4945  ;;  %v4949_v49 = vpop.xlane.xlu0 %4948 }
 0xf9e   : > { %6937 = vrsqrt.f32 %v4973_v12  ;;  %v4966_v32 = vmul.f32 0.03125, %v4946_v62  ;;  %v4967_v9 = vmul.f32 0.03125, %v4949_v49 }
 0xfa0   : > { %v4974_v50 = vadd.f32 1e-05, %v4966_v32  ;;  %v4975_v11 = vadd.f32 1e-05, %v4967_v9 }
 0xfa1   : > { %v4952_v61 = vpop.xlane.xlu1 %4951 }
 0xfa2   : > { %6939 = vrsqrt.f32 %v4974_v50  ;;  %v4968_v14 = vmul.f32 0.03125, %v4952_v61  ;;  %v6788_v61 = vld [vmem:[%s7404_s19 + $0x20] sm:$0xff]  }
 0xfa3   : > { %6941 = vrsqrt.f32 %v4975_v11  ;;  %v6787_v11 = vld [vmem:[%s7404_s19 + $0x28] sm:$0xff]  }
 0xfa4   : > { %v4976_v16 = vadd.f32 1e-05, %v4968_v14  ;;  %v6789_v14 = vld [vmem:[%s7404_s19 + $0x18] sm:$0xff]  }
 0xfa6   : > { %6943 = vrsqrt.f32 %v4976_v16  ;;  %v6790_v16 = vld [vmem:[%s7404_s19 + $0x10] sm:$0xff]  }
 0xfab   : > { %v6938_v6 = vpop.eup %6937 }
 0xfac   : > { %v4989_v19 = vmul.f32 %v6938_v6, %v8497_v20  ;;  %v6791_v6 = vld [vmem:[%s7404_s19 + $0x8] sm:$0xff]  }
 0xfad   : > { %v4955_v23 = vpop.xlane.xlu0 %4954 }
 0xfae   : > { %v4969_v27 = vmul.f32 0.03125, %v4955_v23  ;;  %v5003_v7 = vmul.f32 %v6032_v57, %v4989_v19  ;;  %v6034_v19 = vld [vmem:[%s817_s29] ss:$0 sm:$0xff] }
 0xfaf   : > { %v6940_v51 = vpop.eup %6939 }
 0xfb0   : > { %v6942_v58 = vpop.eup %6941  ;;  %v4977_v8 = vadd.f32 1e-05, %v4969_v27  ;;  %v4990_v26 = vmul.f32 %v6940_v51, %v8502_v1  ;;  %v5017_v34 = vadd.f32 %v6033_v31, %v5003_v7 }
 0xfb1   : > { %v4991_v39 = vmul.f32 %v6942_v58, %v8505_v33  ;;  %v4958_v17 = vpop.xlane.xlu1 %4957  ;;  %v4961_v38 = vpop.xlane.xlu0 %4960 }
 0xfb2   : > { %6945 = vrsqrt.f32 %v4977_v8  ;;  %v4970_v44 = vmul.f32 0.03125, %v4958_v17  ;;  %v4971_v20 = vmul.f32 0.03125, %v4961_v38  ;;  %v5004_v18 = vmul.f32 %v6032_v57, %v4990_v26 }
 0xfb3   : > { %v6944_v36 = vpop.eup %6943  ;;  %v5005_v13 = vmul.f32 %v6032_v57, %v4991_v39 }
 0xfb4   : > { %v4992_v54 = vmul.f32 %v6944_v36, %v8513_v0  ;;  %v4978_v4 = vadd.f32 1e-05, %v4970_v44  ;;  %v4979_v41 = vadd.f32 1e-05, %v4971_v20  ;;  %v5018_v45 = vadd.f32 %v6033_v31, %v5004_v18 }
 0xfb5   : > { %v4964_v28 = vpop.xlane.xlu1 %4963  ;;  %v5019_v21 = vadd.f32 %v6033_v31, %v5005_v13 }
 0xfb6   : > { %v5006_v3 = vmul.f32 %v6032_v57, %v4992_v54  ;;  %6947 = vrsqrt.f32 %v4978_v4  ;;  %v4972_v1 = vmul.f32 0.03125, %v4964_v28  ;;  %v5025_v55 = vpack.c.bf16 %v5018_v45, %v5017_v34 }
 0xfb7   : > { %6949 = vrsqrt.f32 %v4979_v41 }
 0xfb8   : > { %v4980_v33 = vadd.f32 1e-05, %v4972_v1  ;;  %6645 = vmatprep.mubr.msk.bf16.mxu1 %vm855_vm1, %v5025_v55  ;;  %v5020_v43 = vadd.f32 %v6033_v31, %v5006_v3 }
 0xfba   : > { %6951 = vrsqrt.f32 %v4980_v33  ;;  %v5026_v52 = vpack.c.bf16 %v5020_v43, %v5019_v21 }
 0xfbc   : > { %6646 = vmatmul.mubr.msk.bf16.vlgmr.msra.gmra.mxu1 %vm855_vm1, %v5026_v52 }
 0xfbf   : > { %v6946_v37 = vpop.eup %6945 }
 0xfc0   : > { %v4993_v0 = vmul.f32 %v6946_v37, %v8521_v46 }
 0xfc2   : > { %v5007_v25 = vmul.f32 %v6032_v57, %v4993_v0 }
 0xfc3   : > { %v6948_v47 = vpop.eup %6947 }
 0xfc4   : > { %v6950_v35 = vpop.eup %6949  ;;  %v4994_v30 = vmul.f32 %v6948_v47, %v8526_v24  ;;  %v5021_v12 = vadd.f32 %v6033_v31, %v5007_v25 }
 0xfc5   : > { %v4995_v29 = vmul.f32 %v6950_v35, %v8529_v40  ;;  %v6785_v40 = vld [vmem:[%s7404_s19 + $0x38] sm:$0xff]  }
 0xfc6   : > { %v5008_v60 = vmul.f32 %v6032_v57, %v4994_v30  ;;  %6653 = vmatprep.subr.bf16.mxu0 %v6785_v40 }
 0xfc7   : > { %v6952_v2 = vpop.eup %6951  ;;  %v5009_v49 = vmul.f32 %v6032_v57, %v4995_v29  ;;  %6654 = vmatpush3.bf16.msra.mxu0 %v6785_v40 }
 0xfc8   : > { %v4996_v53 = vmul.f32 %v6952_v2, %v8537_v63  ;;  %v5022_v62 = vadd.f32 %v6033_v31, %v5008_v60  ;;  %v6786_v63 = vld [vmem:[%s7404_s19 + $0x30] sm:$0xff]  }
 0xfc9   : > { %v5023_v9 = vadd.f32 %v6033_v31, %v5009_v49  ;;  %6655 = vmatprep.subr.bf16.mxu0 %v6786_v63 }
 0xfca   : > { %v5027_v32 = vpack.c.bf16 %v5022_v62, %v5021_v12  ;;  %v5010_v46 = vmul.f32 %v6032_v57, %v4996_v53  ;;  %v6792_v57 = vld [vmem:[%s7404_s19] sm:$0xff]  }
 0xfcb   : > { %6656 = vmatpush3.bf16.msra.mxu0 %v6786_v63 }
 0xfcc   : > { %6649 = vmatprep.mubr.msk.bf16.mxu1 %vm855_vm1, %v5027_v32  ;;  %v5024_v24 = vadd.f32 %v6033_v31, %v5010_v46  ;;  %6657 = vmatprep.subr.bf16.mxu0 %v6787_v11 }
 0xfce   : > { %v5028_v50 = vpack.c.bf16 %v5024_v24, %v5023_v9 }
 0xfcf   : > { %6658 = vmatpush3.bf16.msra.mxu0 %v6787_v11 }
 0xfd0   : > { %6650 = vmatmul.mubr.msk.bf16.gmra.mxu1 %vm855_vm1, %v5028_v50  ;;  %6659 = vmatprep.subr.bf16.mxu0 %v6788_v61 }
 0xfd3   : > { %6660 = vmatpush3.bf16.msra.mxu0 %v6788_v61 }
 0xfd4   : > { %6661 = vmatprep.subr.bf16.mxu0 %v6789_v14 }
 0xfd7   : > { %6662 = vmatpush3.bf16.msra.mxu0 %v6789_v14 }
 0xfd8   : > { %6663 = vmatprep.subr.bf16.mxu0 %v6790_v16 }
 0xfdb   : > { %6664 = vmatpush3.bf16.msra.mxu0 %v6790_v16 }
 0xfdc   : > { %6665 = vmatprep.subr.bf16.mxu0 %v6791_v6 }
 0xfdf   : > { %6666 = vmatpush3.bf16.msra.mxu0 %v6791_v6 }
 0xfe0   : > { %6667 = vmatprep.subr.bf16.mxu0 %v6792_v57 }
 0xfe3   : > { %6668 = vmatpush3.bf16.msra.mxu0 %v6792_v57 }
0x107c   : > { %v6647_v23 = vpop.f32.mrf.mxu1 }
0x107d   : > { %v5107_v27 = vadd.f32 %v6647_v23, %v6034_v19 }
0x107e   : > { %v5098_v51 = vpop.f32.mrf.mxu1 }
0x107f   : > { %v6043_v7 = vmul.f32 -1.702, %v5107_v27  ;;  %v5099_v58 = vadd.f32 %v6034_v19, %v5098_v51 }
0x1080   : > { %v6648_v8 = vpop.f32.mrf.mxu1 }
0x1081   : > { %v5149_v31 = vmul.f32 1.442695, %v6043_v7  ;;  %v6041_v26 = vmul.f32 -1.702, %v5099_v58  ;;  %v5110_v39 = vadd.f32 %v6648_v8, %v6034_v19 }
0x1082   : > { %v5101_v17 = vpop.f32.mrf.mxu1 }
0x1083   : > { %6953 = vpow2.f32 %v5149_v31  ;;  %v5145_v38 = vmul.f32 1.442695, %v6041_v26  ;;  %v6044_v44 = vmul.f32 -1.702, %v5110_v39  ;;  %v5102_v20 = vadd.f32 %v6034_v19, %v5101_v17 }
0x1085   : > { %6955 = vpow2.f32 %v5145_v38  ;;  %v5151_v18 = vmul.f32 1.442695, %v6044_v44  ;;  %v6042_v36 = vmul.f32 -1.702, %v5102_v20 }
0x1087   : > { %6957 = vpow2.f32 %v5151_v18  ;;  %v5147_v13 = vmul.f32 1.442695, %v6042_v36 }
0x1089   : > { %6959 = vpow2.f32 %v5147_v13 }
0x1090   : > { %v6954_v34 = vpop.eup %6953  ;;  %v6651_v54 = vpop.f32.mrf.mxu1 }
0x1091   : > { %v5163_v4 = vadd.f32 1.0, %v6954_v34  ;;  %v5123_v41 = vadd.f32 %v6651_v54, %v6034_v19 }
0x1092   : > { %v6956_v45 = vpop.eup %6955  ;;  %v5114_v28 = vpop.f32.mrf.mxu1 }
0x1093   : > { %v5161_v3 = vadd.f32 1.0, %v6956_v45  ;;  %v6047_v1 = vmul.f32 -1.702, %v5123_v41  ;;  %v5115_v55 = vadd.f32 %v6034_v19, %v5114_v28  ;;  %6961 = vrcp.f32 %v5163_v4 }
0x1094   : > { %v6958_v33 = vpop.eup %6957  ;;  %v6652_v21 = vpop.f32.mrf.mxu1 }
0x1095   : > { %v5164_v43 = vadd.f32 1.0, %v6958_v33  ;;  %v5157_v52 = vmul.f32 1.442695, %v6047_v1  ;;  %v6045_v37 = vmul.f32 -1.702, %v5115_v55  ;;  %6963 = vrcp.f32 %v5161_v3 }
0x1096   : > { %v6960_v0 = vpop.eup %6959  ;;  %v5126_v47 = vadd.f32 %v6652_v21, %v6034_v19  ;;  %v5117_v35 = vpop.f32.mrf.mxu1 }
0x1097   : > { %6965 = vrcp.f32 %v5164_v43  ;;  %v5162_v30 = vadd.f32 1.0, %v6960_v0  ;;  %v5153_v25 = vmul.f32 1.442695, %v6045_v37  ;;  %v5118_v29 = vadd.f32 %v6034_v19, %v5117_v35 }
0x1098   : > { %6967 = vpow2.f32 %v5157_v52  ;;  %v6048_v60 = vmul.f32 -1.702, %v5126_v47 }
0x1099   : > { %6969 = vrcp.f32 %v5162_v30  ;;  %v6046_v2 = vmul.f32 -1.702, %v5118_v29 }
0x109a   : > { %6971 = vpow2.f32 %v5153_v25  ;;  %v5159_v53 = vmul.f32 1.442695, %v6048_v60 }
0x109b   : > { %v5155_v12 = vmul.f32 1.442695, %v6046_v2 }
0x109c   : > { %6973 = vpow2.f32 %v5159_v53 }
0x109d   : > { %6975 = vpow2.f32 %v5155_v12 }
0x10a0   : > { %v6962_v62 = vpop.eup %6961 }
0x10a1   : > { %v5187_v61 = vmul.f32 %v6962_v62, %v5107_v27 }
0x10a2   : > { %v6964_v49 = vpop.eup %6963 }
0x10a3   : > { %v5185_v63 = vmul.f32 %v6964_v49, %v5099_v58 }
0x10a4   : > { %v6966_v32 = vpop.eup %6965 }
0x10a5   : > { %v6968_v46 = vpop.eup %6967  ;;  %v5188_v24 = vmul.f32 %v6966_v32, %v5110_v39 }
0x10a6   : > { %v6970_v9 = vpop.eup %6969  ;;  %v5167_v50 = vadd.f32 1.0, %v6968_v46 }
0x10a7   : > { %v6972_v40 = vpop.eup %6971  ;;  %v5186_v11 = vmul.f32 %v6970_v9, %v5102_v20  ;;  %v5194_v19 = vpack.c.bf16 %v5188_v24, %v5187_v61  ;;  %v6049_v20 = vld [vmem:[%s7342_s18] ss:$0 sm:$0xff]  ;;  %s8756_s18 = sld [smem:[#allocation20_spill]] (!%p6058_p4) }
0x10a8   : > { %v5165_v14 = vadd.f32 1.0, %v6972_v40  ;;  %6977 = vrcp.f32 %v5167_v50 }
0x10a9   : > { %v6974_v16 = vpop.eup %6973  ;;  %v5193_v6 = vpack.c.bf16 %v5186_v11, %v5185_v63 }
0x10aa   : > { %v6976_v57 = vpop.eup %6975  ;;  %v5168_v23 = vadd.f32 1.0, %v6974_v16  ;;  %6979 = vrcp.f32 %v5165_v14 }
0x10ab   : > { %v5166_v51 = vadd.f32 1.0, %v6976_v57  ;;  %6669 = vmatprep.mubr.bf16.mxu0 %v5193_v6 }
0x10ac   : > { %6981 = vrcp.f32 %v5168_v23  ;;  %6670 = vmatmul.mubr.bf16.vlgmr.msra.gmra.mxu0 %v5194_v19 }
0x10ad   : > { %6983 = vrcp.f32 %v5166_v51 }
0x10b5   : > { %v6978_v7 = vpop.eup %6977 }
0x10b6   : > { %v5191_v17 = vmul.f32 %v6978_v7, %v5123_v41 }
0x10b7   : > { %v6980_v8 = vpop.eup %6979 }
0x10b8   : > { %v5189_v27 = vmul.f32 %v6980_v8, %v5115_v55 }
0x10b9   : > { %v6982_v31 = vpop.eup %6981 }
0x10ba   : > { %v6984_v58 = vpop.eup %6983  ;;  %v5192_v26 = vmul.f32 %v6982_v31, %v5126_v47 }
0x10bb   : > { %v5190_v39 = vmul.f32 %v6984_v58, %v5118_v29 }
0x10bc   : > { %v5196_v44 = vpack.c.bf16 %v5192_v26, %v5191_v17 }
0x10bd   : > { %v5195_v38 = vpack.c.bf16 %v5190_v39, %v5189_v27 }
0x10bf   : > { %6673 = vmatprep.mubr.bf16.mxu0 %v5195_v38 }
0x10c0   : > { %6674 = vmatmul.mubr.bf16.gmra.mxu0 %v5196_v44 }
0x116c   : > { %v6671_v18 = vpop.f32.mrf.mxu0 }
0x116d   : > { %v5311_v36 = vadd.f32 %v6671_v18, %v6049_v20 }
0x116e   : > { %v5302_v13 = vpop.f32.mrf.mxu0 }
0x116f   : > { %v5335_v34 = vadd.f32 %v5311_v36, %v8466_v48  ;;  %v5303_v54 = vadd.f32 %v6049_v20, %v5302_v13 }
0x1170   : > { %v6672_v4 = vpop.f32.mrf.mxu0 }
0x1171   : > { %5343 = vst.msk [vmem:[#allocation2 + $0x10] sm:$0xff] %vm855_vm1, %v5335_v34  ;;  %v5333_v45 = vadd.f32 %v5303_v54, %v8464_v56  ;;  %v5314_v28 = vadd.f32 %v6672_v4, %v6049_v20 }
0x1172   : > { %v5305_v3 = vpop.f32.mrf.mxu0 }
0x1173   : > { %5341 = vst.msk [vmem:[#allocation2] sm:$0xff] %vm855_vm1, %v5333_v45  ;;  %v5336_v41 = vadd.f32 %v5314_v28, %v8472_v10  ;;  %v5306_v1 = vadd.f32 %v6049_v20, %v5305_v3 }
0x1175   : > { %5344 = vst.msk [vmem:[#allocation2 + $0x18] sm:$0xff] %vm855_vm1, %v5336_v41  ;;  %v5334_v55 = vadd.f32 %v5306_v1, %v8470_v59 }
0x1177   : > { %5342 = vst.msk [vmem:[#allocation2 + $0x8] sm:$0xff] %vm855_vm1, %v5334_v55 }
0x1180   : > { %v6675_v48 = vpop.f32.mrf.mxu0 }
0x1181   : > { %v5327_v33 = vadd.f32 %v6675_v48, %v6049_v20 }
0x1182   : > { %v5318_v21 = vpop.f32.mrf.mxu0 }
0x1183   : > { %v8591_v43 = vadd.f32 %v5327_v33, %v8482_v42  ;;  %v5319_v56 = vadd.f32 %v6049_v20, %v5318_v21 }
0x1184   : > { %v6676_v52 = vpop.f32.mrf.mxu0 }
0x1185   : > { %5347 = vst.msk [vmem:[#allocation2 + $0x30] sm:$0xff] %vm855_vm1, %v8591_v43  ;;  %v5337_v10 = vadd.f32 %v5319_v56, %v8480_v5  ;;  %v5330_v37 = vadd.f32 %v6676_v52, %v6049_v20 }
0x1186   : > { %v5321_v0 = vpop.f32.mrf.mxu0 }
0x1187   : > { %5345 = vst.msk [vmem:[#allocation2 + $0x20] sm:$0xff] %vm855_vm1, %v5337_v10  ;;  %v8598_v59 = vadd.f32 %v5330_v37, %v8488_v15  ;;  %v5322_v47 = vadd.f32 %v6049_v20, %v5321_v0  ;;  %5352 = sbr.rel (%p6058_p4) target bundleno = 5169 (0x1431), region = 108 }
0x1189   : > { %5348 = vst.msk [vmem:[#allocation2 + $0x38] sm:$0xff] %vm855_vm1, %v8598_v59  ;;  %v5338_v42 = vadd.f32 %v5322_v47, %v8486_v22 }
0x118b   : > { %5346 = vst.msk [vmem:[#allocation2 + $0x28] sm:$0xff] %vm855_vm1, %v5338_v42 }
0x118c   : > { %v5354_v35 = vlaneseq  ;;  %v5353_v30 = vld [vmem:[%s8756_s18] sm:$0xff]  ;;  %vm5484_vm8 = vcmask 1041409   ;;  %vm5486_vm9 = vcmask 1042434   ;;  %vm5488_vm10 = vcmask 1043459  }
0x118d   : > { %vm5490_vm11 = vcmask 1044484   ;;  %vm5492_vm12 = vcmask 1045509   ;;  %vm5494_vm13 = vcmask 1046534   ;;  %vm5496_vm14 = vcmask 1047559  }
0x118e   : > { %v5355_v5 = vshrl.u32 %v5354_v35, 7  ;;  %vm7153_vm15 = vmmov 0   ;;  %vm5714_vm0 = vcmask 130048  }
0x1190   : > { %v5370_v25 = vsub.s32 2, %v5355_v5  ;;  %v5356_v15 = vsub.s32 0, %v5355_v5  ;;  %v5377_v29 = vsub.s32 3, %v5355_v5  ;;  %v5363_v60 = vsub.s32 1, %v5355_v5 }
0x1191   : > { %v5391_v62 = vsub.s32 5, %v5355_v5  ;;  %v5384_v49 = vsub.s32 4, %v5355_v5  ;;  %v5405_v9 = vsub.s32 7, %v5355_v5  ;;  %v5398_v24 = vsub.s32 6, %v5355_v5 }
0x1192   : > { %v5371_v2 = vrot.slane %v5353_v30, %v5370_v25  ;;  %v5357_v53 = vrot.slane %v5353_v30, %v5356_v15  ;;  %v5378_v22 = vrot.slane %v5353_v30, %v5377_v29  ;;  %v5364_v12 = vrot.slane %v5353_v30, %v5363_v60 }
0x1193   : > { %v5392_v32 = vrot.slane %v5353_v30, %v5391_v62  ;;  %v5385_v46 = vrot.slane %v5353_v30, %v5384_v49  ;;  %v5406_v50 = vrot.slane %v5353_v30, %v5405_v9  ;;  %v5399_v40 = vrot.slane %v5353_v30, %v5398_v24 }
0x1194   : > { %5373 = vbcast.lane.b32.xlu1 %v5371_v2, 256  ;;  %5359 = vbcast.lane.b32.xlu0 %v5357_v53, 256 }
0x1198   : > { %5380 = vbcast.lane.b32.xlu1 %v5378_v22, 256  ;;  %5366 = vbcast.lane.b32.xlu0 %v5364_v12, 256 }
0x119c   : > { %5394 = vbcast.lane.b32.xlu1 %v5392_v32, 256  ;;  %5387 = vbcast.lane.b32.xlu0 %v5385_v46, 256 }
0x11a0   : > { %5408 = vbcast.lane.b32.xlu1 %v5406_v50, 256  ;;  %5401 = vbcast.lane.b32.xlu0 %v5399_v40, 256 }
0x1206   : > { %v5374_v63 = vpop.permute.xlu1 %5373  ;;  %v5360_v11 = vpop.permute.xlu0 %5359 }
0x1207   : > { %v5412_v61 = vmul.f32 %v5374_v63, %v5335_v34  ;;  %v5410_v14 = vmul.f32 %v5360_v11, %v5333_v45 }
0x1209   : > { %v5432_v16 = vsel %vm855_vm1, %v5412_v61, 0.0  ;;  %v5418_v6 = vsel %vm855_vm1, %v5410_v14, 0.0 }
0x120a   : > { %v5433_v57 = vrot.slane %v5432_v16, 4  ;;  %v5419_v19 = vrot.slane %v5418_v6, 4  ;;  %v5381_v23 = vpop.permute.xlu1 %5380  ;;  %v5367_v51 = vpop.permute.xlu0 %5366 }
0x120b   : > { %v5413_v7 = vmul.f32 %v5381_v23, %v5336_v41  ;;  %v5411_v8 = vmul.f32 %v5367_v51, %v5334_v55 }
0x120c   : > { %v5434_v31 = vadd.f32 %v5433_v57, %v5432_v16  ;;  %v5420_v58 = vadd.f32 %v5419_v19, %v5418_v6 }
0x120d   : > { %v5439_v26 = vsel %vm855_vm1, %v5413_v7, 0.0  ;;  %v5425_v27 = vsel %vm855_vm1, %v5411_v8, 0.0 }
0x120e   : > { %v5435_v39 = vrot.slane %v5434_v31, 2  ;;  %v5421_v17 = vrot.slane %v5420_v58, 2  ;;  %v5440_v38 = vrot.slane %v5439_v26, 4  ;;  %v5426_v44 = vrot.slane %v5425_v27, 4  ;;  %v5395_v20 = vpop.permute.xlu1 %5394  ;;  %v5388_v18 = vpop.permute.xlu0 %5387 }
0x120f   : > { %v5415_v36 = vmul.f32 %v5395_v20, %v5338_v42  ;;  %v5414_v13 = vmul.f32 %v5388_v18, %v5337_v10 }
0x1210   : > { %v5436_v34 = vadd.f32 %v5435_v39, %v5434_v31  ;;  %v5422_v54 = vadd.f32 %v5421_v17, %v5420_v58  ;;  %v5441_v4 = vadd.f32 %v5440_v38, %v5439_v26  ;;  %v5427_v45 = vadd.f32 %v5426_v44, %v5425_v27 }
0x1211   : > { %v5453_v28 = vsel %vm855_vm1, %v5415_v36, 0.0  ;;  %v5446_v3 = vsel %vm855_vm1, %v5414_v13, 0.0 }
0x1212   : > { %v5442_v41 = vrot.slane %v5441_v4, 2  ;;  %v5428_v1 = vrot.slane %v5427_v45, 2  ;;  %v5409_v55 = vpop.permute.xlu1 %5408  ;;  %v5402_v48 = vpop.permute.xlu0 %5401  ;;  %v5454_v33 = vrot.slane %v5453_v28, 4  ;;  %v5447_v21 = vrot.slane %v5446_v3, 4 }
0x1213   : > { %v5417_v56 = vmul.f32 %v5409_v55, %v8598_v59  ;;  %v5416_v52 = vmul.f32 %v5402_v48, %v8591_v43  ;;  %v5437_v37 = vrot.slane %v5436_v34, 1  ;;  %v5423_v10 = vrot.slane %v5422_v54, 1 }
0x1214   : > { %v5443_v0 = vadd.f32 %v5442_v41, %v5441_v4  ;;  %v5429_v47 = vadd.f32 %v5428_v1, %v5427_v45  ;;  %v5455_v42 = vadd.f32 %v5454_v33, %v5453_v28  ;;  %v5448_v35 = vadd.f32 %v5447_v21, %v5446_v3 }
0x1215   : > { %v5467_v5 = vsel %vm855_vm1, %v5417_v56, 0.0  ;;  %v5460_v30 = vsel %vm855_vm1, %v5416_v52, 0.0  ;;  %v5424_v59 = vadd.f32 %v5423_v10, %v5422_v54  ;;  %v5438_v62 = vadd.f32 %v5437_v37, %v5436_v34 }
0x1216   : > { %v5444_v25 = vrot.slane %v5443_v0, 1  ;;  %v5430_v15 = vrot.slane %v5429_v47, 1  ;;  %v5468_v29 = vrot.slane %v5467_v5, 4  ;;  %v5461_v60 = vrot.slane %v5460_v30, 4 }
0x1217   : > { %v5456_v2 = vrot.slane %v5455_v42, 2  ;;  %v5449_v53 = vrot.slane %v5448_v35, 2 }
0x1218   : > { %v5431_v43 = vadd.f32 %v5430_v15, %v5429_v47  ;;  %v5469_v22 = vadd.f32 %v5468_v29, %v5467_v5  ;;  %v5462_v12 = vadd.f32 %v5461_v60, %v5460_v30  ;;  %v5445_v46 = vadd.f32 %v5444_v25, %v5443_v0 }
0x1219   : > { %v5457_v49 = vadd.f32 %v5456_v2, %v5455_v42  ;;  %v5450_v32 = vadd.f32 %v5449_v53, %v5448_v35 }
0x121a   : > { %v5485_v9 = vsel %vm5484_vm8, %v5431_v43, %v5424_v59  ;;  %v5470_v24 = vrot.slane %v5469_v22, 2  ;;  %v5463_v50 = vrot.slane %v5462_v12, 2 }
0x121b   : > { %v5458_v40 = vrot.slane %v5457_v49, 1  ;;  %v5451_v63 = vrot.slane %v5450_v32, 1  ;;  %v5487_v11 = vsel %vm5486_vm9, %v5438_v62, %v5485_v9  ;;  %v5616_v9 = vld [vmem:[%s8757_s16] sm:$0xff] }
0x121c   : > { %v5471_v61 = vadd.f32 %v5470_v24, %v5469_v22  ;;  %v5464_v14 = vadd.f32 %v5463_v50, %v5462_v12  ;;  %v5489_v16 = vsel %vm5488_vm10, %v5445_v46, %v5487_v11  ;;  %v6059_v11 = vld [vmem:[%s8758_s15] ss:$0 sm:$0xff] }
0x121d   : > { %v5459_v6 = vadd.f32 %v5458_v40, %v5457_v49  ;;  %v5452_v57 = vadd.f32 %v5451_v63, %v5450_v32  ;;  %v7152_v49 = vmov 0.0   ;;  %v5618_v32 = vld [vmem:[%s8757_s16 + $0x10] sm:$0xff] }
0x121e   : > { %v5472_v19 = vrot.slane %v5471_v61, 1  ;;  %v5465_v23 = vrot.slane %v5464_v14, 1  ;;  %6677 = vmatprep.subr.mxu0 %v7152_v49  ;;  %6685 = vmatprep.mubr.msk.f32.mxu0 %vm7153_vm15, %v7152_v49 }
0x121f   : > { %v5491_v51 = vsel %vm5490_vm11, %v5452_v57, %v5489_v16 }
0x1220   : > { %v5466_v7 = vadd.f32 %v5465_v23, %v5464_v14  ;;  %v5473_v8 = vadd.f32 %v5472_v19, %v5471_v61  ;;  %v5493_v31 = vsel %vm5492_vm12, %v5459_v6, %v5491_v51 }
0x1222   : > { %v5495_v58 = vsel %vm5494_vm13, %v5466_v7, %v5493_v31 }
0x1223   : > { %v5497_v26 = vsel %vm5496_vm14, %v5473_v8, %v5495_v58 }
0x1224   : > { %v5499_v27 = vsel %vm855_vm1, %v5497_v26, 0.0 }
0x1225   : > { %5500 = vadd.xlane.f32.xlu0 %v5499_v27 }
0x12ae   : > { %v5501_v39 = vpop.xlane.xlu0 %5500 }
0x12af   : > { %v5502_v17 = vmul.f32 0.03125, %v5501_v39 }
0x12b1   : > { %v5504_v38 = vrot.slane %v5502_v17, 1  ;;  %v5505_v44 = vrot.slane %v5502_v17, 2  ;;  %v5506_v20 = vrot.slane %v5502_v17, 3  ;;  %v5507_v18 = vrot.slane %v5502_v17, 4 }
0x12b2   : > { %v5508_v36 = vrot.slane %v5502_v17, 5  ;;  %v5509_v13 = vrot.slane %v5502_v17, 6  ;;  %v5510_v34 = vrot.slane %v5502_v17, 7  ;;  %v5519_v54 = vsub.f32 %v5424_v59, %v5502_v17 }
0x12b3   : > { %v5520_v4 = vsub.f32 %v5431_v43, %v5504_v38  ;;  %v5521_v45 = vsub.f32 %v5438_v62, %v5505_v44  ;;  %v5522_v28 = vsub.f32 %v5445_v46, %v5506_v20  ;;  %v5523_v3 = vsub.f32 %v5452_v57, %v5507_v18  ;;  %v5619_v62 = vld [vmem:[%s8757_s16 + $0x18] sm:$0xff]  ;;  %v5617_v46 = vld [vmem:[%s8757_s16 + $0x8] sm:$0xff] }
0x12b4   : > { %v5524_v41 = vsub.f32 %v5459_v6, %v5508_v36  ;;  %v5525_v1 = vsub.f32 %v5466_v7, %v5509_v13  ;;  %v5526_v55 = vsub.f32 %v5473_v8, %v5510_v34  ;;  %v5527_v52 = vmul.f32 %v5519_v54, %v5519_v54  ;;  %6678 = vmatpush3.msra.mxu0 %v5619_v62  ;;  %v6060_v36 = vld [vmem:[#allocation7] ss:$0 sm:$0xff] }
0x12b5   : > { %v5528_v48 = vmul.f32 %v5520_v4, %v5520_v4  ;;  %v5529_v33 = vmul.f32 %v5521_v45, %v5521_v45  ;;  %v5530_v21 = vmul.f32 %v5522_v28, %v5522_v28  ;;  %v5531_v56 = vmul.f32 %v5523_v3, %v5523_v3  ;;  %6679 = vmatprep.subr.mxu0 %v7152_v49 }
0x12b6   : > { %v5532_v37 = vmul.f32 %v5524_v41, %v5524_v41  ;;  %v5533_v47 = vmul.f32 %v5525_v1, %v5525_v1  ;;  %v5534_v42 = vmul.f32 %v5526_v55, %v5526_v55  ;;  %6680 = vmatpush3.msra.mxu0 %v5618_v32 }
0x12b7   : > { %v5543_v10 = vrot.slane %v5528_v48, 7  ;;  %v5545_v0 = vrot.slane %v5529_v33, 6  ;;  %v5547_v5 = vrot.slane %v5530_v21, 5  ;;  %v5549_v25 = vrot.slane %v5531_v56, 4  ;;  %6681 = vmatprep.subr.mxu0 %v7152_v49 }
0x12b8   : > { %v5551_v29 = vrot.slane %v5532_v37, 3  ;;  %v5553_v2 = vrot.slane %v5533_v47, 2  ;;  %v5555_v59 = vrot.slane %v5534_v42, 1  ;;  %6682 = vmatpush3.msra.mxu0 %v5617_v46 }
0x12b9   : > { %v5544_v35 = vsel %vm5484_vm8, %v5543_v10, %v5527_v52  ;;  %6683 = vmatprep.subr.mxu0 %v7152_v49 }
0x12ba   : > { %v5546_v30 = vsel %vm5486_vm9, %v5545_v0, %v5544_v35  ;;  %6684 = vmatpush3.msra.mxu0 %v5616_v9 }
0x12bb   : > { %v5548_v15 = vsel %vm5488_vm10, %v5547_v5, %v5546_v30 }
0x12bc   : > { %v5550_v60 = vsel %vm5490_vm11, %v5549_v25, %v5548_v15 }
0x12bd   : > { %v5552_v53 = vsel %vm5492_vm12, %v5551_v29, %v5550_v60 }
0x12be   : > { %v5554_v43 = vsel %vm5494_vm13, %v5553_v2, %v5552_v53 }
0x12bf   : > { %v5556_v22 = vsel %vm5496_vm14, %v5555_v59, %v5554_v43 }
0x12c0   : > { %v5558_v12 = vsel %vm855_vm1, %v5556_v22, 0.0 }
0x12c1   : > { %5559 = vadd.xlane.f32.xlu1 %v5558_v12 }
0x134a   : > { %v5560_v24 = vpop.xlane.xlu1 %5559 }
0x134b   : > { %v5561_v50 = vmul.f32 0.03125, %v5560_v24 }
0x134d   : > { %v5562_v40 = vadd.f32 1e-05, %v5561_v50 }
0x134f   : > { %6994 = vrsqrt.f32 %v5562_v40 }
0x135c   : > { %v6995_v63 = vpop.eup %6994 }
0x135d   : > { %v5565_v61 = vrot.slane %v6995_v63, 1  ;;  %v5566_v14 = vrot.slane %v6995_v63, 2  ;;  %v5567_v16 = vrot.slane %v6995_v63, 3  ;;  %v5568_v6 = vrot.slane %v6995_v63, 4 }
0x135e   : > { %v5569_v57 = vrot.slane %v6995_v63, 5  ;;  %v5570_v19 = vrot.slane %v6995_v63, 6  ;;  %v5571_v23 = vrot.slane %v6995_v63, 7  ;;  %v5580_v51 = vmul.f32 %v6995_v63, %v5519_v54 }
0x135f   : > { %v5581_v7 = vmul.f32 %v5565_v61, %v5520_v4  ;;  %v5582_v8 = vmul.f32 %v5566_v14, %v5521_v45  ;;  %v5583_v31 = vmul.f32 %v5567_v16, %v5522_v28  ;;  %v5584_v58 = vmul.f32 %v5568_v6, %v5523_v3 }
0x1360   : > { %v5585_v26 = vmul.f32 %v5569_v57, %v5524_v41  ;;  %v5586_v27 = vmul.f32 %v5570_v19, %v5525_v1  ;;  %v5587_v39 = vmul.f32 %v5571_v23, %v5526_v55  ;;  %v5594_v17 = vmul.f32 %v6059_v11, %v5580_v51 }
0x1361   : > { %v5595_v38 = vmul.f32 %v6059_v11, %v5581_v7  ;;  %v5596_v44 = vmul.f32 %v6059_v11, %v5582_v8  ;;  %v5597_v20 = vmul.f32 %v6059_v11, %v5583_v31  ;;  %v5598_v18 = vmul.f32 %v6059_v11, %v5584_v58 }
0x1362   : > { %v5599_v13 = vmul.f32 %v6059_v11, %v5585_v26  ;;  %v5600_v34 = vmul.f32 %v6059_v11, %v5586_v27  ;;  %v5601_v48 = vmul.f32 %v6059_v11, %v5587_v39  ;;  %v5608_v4 = vadd.f32 %v6060_v36, %v5594_v17 }
0x1363   : > { %v5609_v33 = vadd.f32 %v6060_v36, %v5595_v38  ;;  %v5610_v21 = vadd.f32 %v6060_v36, %v5596_v44  ;;  %v5611_v56 = vadd.f32 %v6060_v36, %v5597_v20  ;;  %v5612_v54 = vadd.f32 %v6060_v36, %v5598_v18 }
0x1364   : > { %v5613_v45 = vadd.f32 %v6060_v36, %v5599_v13  ;;  %v5614_v41 = vadd.f32 %v6060_v36, %v5600_v34  ;;  %v5615_v1 = vadd.f32 %v6060_v36, %v5601_v48 }
0x1365   : > { %v5628_v28 = vrot.slane %v5609_v33, 7  ;;  %v5630_v3 = vrot.slane %v5610_v21, 6  ;;  %v5632_v52 = vrot.slane %v5611_v56, 5  ;;  %v5634_v10 = vrot.slane %v5612_v54, 4 }
0x1366   : > { %v5636_v47 = vrot.slane %v5613_v45, 3  ;;  %v5638_v35 = vrot.slane %v5614_v41, 2  ;;  %v5640_v30 = vrot.slane %v5615_v1, 1 }
0x1367   : > { %v5629_v55 = vsel %vm5484_vm8, %v5628_v28, %v5608_v4 }
0x1368   : > { %v5631_v37 = vsel %vm5486_vm9, %v5630_v3, %v5629_v55 }
0x1369   : > { %v5633_v0 = vsel %vm5488_vm10, %v5632_v52, %v5631_v37 }
0x136a   : > { %v5635_v42 = vsel %vm5490_vm11, %v5634_v10, %v5633_v0 }
0x136b   : > { %v5637_v5 = vsel %vm5492_vm12, %v5636_v47, %v5635_v42 }
0x136c   : > { %v5639_v25 = vsel %vm5494_vm13, %v5638_v35, %v5637_v5 }
0x136d   : > { %v5641_v15 = vsel %vm5496_vm14, %v5640_v30, %v5639_v25 }
0x136e   : > { %6686 = vmatmul.mubr.msk.f32.vlgmr.msra.gmra.mxu0 %vm855_vm1, %v5641_v15 }
0x142e   : > { %v5710_v29 = vpop.f32.mrf.mxu0 }
0x142f   : > { %5715 = vst.msk [vmem:[#allocation9] sm:$0xff] %vm5714_vm0, %v5710_v29 }
0x1430   : > { %v6687_v60 = vpop.f32.mrf.mxu0 }
0x1431 PF: > { %s8759_s5 = sld [smem:[#allocation16_spill]]  ;;  %s7154_s20 = smov [#allocation9]  }
0x1432   : > { %s5725_s27 = sshll.u32 %s7154_s20, 4  ;;  %s5726_s27 = int_to_ptr.vmem [resolvable:$true] %s5725_s27 }
0x1433   : > { %s7050_s26 = scalar_lea.vmem %s5726_s27, 128  ;;  %p7057_p13 = scmp.lt.s32.totalorder %s5726_s27, %s5726_s27 }
0x1434   : > { %p7051_p12 = scmp.ne.s32.totalorder %s5726_s27, %s7050_s26  ;;  %p7058_p0 = scmp.lt.s32.totalorder %s7050_s26, %s7050_s26 }
0x1436   : > { %p7059_p2 = por %p7058_p0, %p7057_p13 }
0x1437   : > { %s8760_s7 = sadd.s32 4294967295, %s8759_s5  }
0x1438   : > { %p8659_p10 = scmp.eq.s32.totalorder %s8760_s7, 1 }
0x143a   : > { %p7052_p7 = pnand %p7051_p12, %p8659_p10 }
0x143c   : > { %p7053_p8 = pneg %p7052_p7 }
0x143e   : > { %p7060_p3 = pnand %p7059_p2, %p7053_p8 }
0x1440   : > { %7063 = shalt.err (!%p7060_p3)
}
0x1441   : > { %s8762_s19 = sld [smem:[#allocation30_spill]] }
0x1447   : > { %6695 = dma.vmem_to_hbm [thread:$0]  (%p8659_p10), %s5726_s27, 128, %s8762_s19, [#allocation6]  }
0x1448   : > { %7107 = dma.done.wait (%p8659_p10), [#allocation6], 128  }
0x1449   : > { %7109 = vsyncadd (%p8659_p10), [#allocation6], 4294967168 }
0x144a PF: > { %s8763_s18 = sld [smem:[#allocation16_spill]] }
0x144b   : > { %s8764_s27 = sld [smem:[#allocation13_spill]] }
0x144c   : > { %s8765_s28 = sld [smem:[#allocation14_spill]] }
0x144d   : > { %s8766_s29 = sld [smem:[#allocation18_spill]] }
0x144e   : > { %s8767_s30 = sld [smem:[#allocation15_spill]] }
0x144f   : > { %s8768_s0 = sld [smem:[#allocation17_spill]] }
0x1450   : > { %s33_s19 = sadd.s32 1, %s8763_s18  }
0x1451   : > { %p30_p6 = scmp.ge.s32.totalorder %s33_s19, 4  }
0x1453   :  { %32 = sbr.rel (!%p30_p6) target bundleno = 19 (0x13), region = 181 }
0x1458   :  { %5738 = vsyncpa [#allocation5], 1 }
0x1459   :  { %5740 = vsyncpa [#allocation5 + $0x1], 1 }
0x145a   :  { %5741 = vsyncpa [#allocation8], 1 }
0x145b   :  { %5742 = vsyncpa [#allocation6], 1 }
0x145c   :  { %5744 = vsyncpa [#allocation6 + $0x1], 1 }

</bundles_post_ra>
